<compile_context>
chip_gen: v7x
topology: tpu7x:2x2x1
jax: 0.10.0
libtpu: 0.0.40
codegen_flags: <defaults>
</compile_context>

<pallas_src>
import jax
import jax.numpy as jnp
from jax.experimental import pallas as pl
from jax.experimental.pallas import tpu as pltpu

EPS = 1e-5
HALO = 8      # zero rows kept above/below pooled buffers (conv zero padding)
LANES = 128   # channel count of every stage == TPU lane width
CIN = 23      # width of the raw input / conv1 kernel


# ---------------------------------------------------------------------------
# Fused kernel: conv1..conv3 (+BN fold, ReLU), pools, fc1, fc2 -> logits
# ---------------------------------------------------------------------------
def _fused_net_kernel(x_ref, w1_ref, b1_ref, w2_ref, b2_ref, w3_ref, b3_ref,
                      wf1_ref, bf1_ref, wf2_ref, bf2_ref,
                      o_ref,
                      a1_ref, p1_ref, a2_ref, p2_ref, a3_ref, p3f_ref):
    f32 = jnp.float32
    bf16 = jnp.bfloat16
    H1 = a1_ref.shape[0]          # rows into conv1 (1024)
    R2 = H1 // 4                  # rows into conv2 (after pool1) = 256
    R3 = H1 // 16                 # rows into conv3 (after pool2) = 64
    R4 = H1 // 64                 # rows into fc1   (after pool3) = 16

    zeros_halo = jnp.zeros((HALO, LANES), f32)
    w1 = w1_ref[...]              # (128,128) bf16, K-packed conv1 taps
    b1 = b1_ref[...]
    b2 = b2_ref[...]
    b3 = b3_ref[...]

    # ---- stage 1: conv1 (im2col K-packed) + folded BN + ReLU ----
    CH1 = 256
    for c in range(0, H1, CH1):
        acc = jnp.dot(x_ref[pl.ds(c, CH1), :], w1, preferred_element_type=f32)
        a1_ref[pl.ds(c, CH1), :] = jnp.maximum(acc + b1, 0.0)

    # ---- pool1: MaxPool2d((4,1)) materialized once, with zero halos ----
    p1_ref[pl.ds(0, HALO), :] = zeros_halo
    p1_ref[pl.ds(HALO + R2, HALO), :] = zeros_halo
    CH2 = 128
    for c in range(0, R2, CH2):
        p = a1_ref[pl.ds(4 * c, CH2, stride=4), :]
        for k in (1, 2, 3):
            p = jnp.maximum(p, a1_ref[pl.ds(4 * c + k, CH2, stride=4), :])
        p1_ref[pl.ds(HALO + c, CH2), :] = p

    # ---- stage 2: conv2 + bn2 + relu2 (3 dense +/-1-row taps) ----
    for c in range(0, R2, CH2):
        base = HALO + c
        acc = jnp.dot(p1_ref[pl.ds(base - 1, CH2), :].astype(bf16), w2_ref[0],
                      preferred_element_type=f32)
        acc = acc + jnp.dot(p1_ref[pl.ds(base, CH2), :].astype(bf16), w2_ref[1],
                            preferred_element_type=f32)
        acc = acc + jnp.dot(p1_ref[pl.ds(base + 1, CH2), :].astype(bf16), w2_ref[2],
                            preferred_element_type=f32)
        a2_ref[pl.ds(c, CH2), :] = jnp.maximum(acc + b2, 0.0)

    # ---- pool2 ----
    p2_ref[pl.ds(0, HALO), :] = zeros_halo
    p2_ref[pl.ds(HALO + R3, HALO), :] = zeros_halo
    p = a2_ref[pl.ds(0, R3, stride=4), :]
    for k in (1, 2, 3):
        p = jnp.maximum(p, a2_ref[pl.ds(k, R3, stride=4), :])
    p2_ref[pl.ds(HALO, R3), :] = p

    # ---- stage 3: conv3 + bn3 + relu3 ----
    acc = jnp.dot(p2_ref[pl.ds(HALO - 1, R3), :].astype(bf16), w3_ref[0],
                  preferred_element_type=f32)
    acc = acc + jnp.dot(p2_ref[pl.ds(HALO, R3), :].astype(bf16), w3_ref[1],
                        preferred_element_type=f32)
    acc = acc + jnp.dot(p2_ref[pl.ds(HALO + 1, R3), :].astype(bf16), w3_ref[2],
                        preferred_element_type=f32)
    a3_ref[...] = jnp.maximum(acc + b3, 0.0)

    # ---- pool3, flattened lane-wise into one (1, 16*128) row ----
    for h in range(R4):
        win = a3_ref[4 * h:4 * h + 4, :]
        p3f_ref[:, h * LANES:(h + 1) * LANES] = jnp.max(win, axis=0, keepdims=True)

    # ---- fc1 (single K=2048 dot) + fc2; lane-dense padded to 128 outputs ----
    z1 = jnp.dot(p3f_ref[...].astype(bf16), wf1_ref[...],
                 preferred_element_type=f32) + bf1_ref[...]
    z2 = jnp.dot(z1.astype(bf16), wf2_ref[...],
                 preferred_element_type=f32) + bf2_ref[...]
    o_ref[...] = z2          # (1,128) lane-dense per-sample logits


# ---------------------------------------------------------------------------
# Wrapper
# ---------------------------------------------------------------------------
def net_forward(x, params):
    """x: (N, 1, H, 23) NCHW; H = 1024 is forced by the conv/pool/fc geometry."""
    N, C, H, W = x.shape
    assert C == 1 and W == CIN and H == 64 * 16

    # conv1 im2col at pad time: row r = [x[r-1], x[r], x[r+1]] (zero padded at the
    # edges) -> 69 real lanes, zero-padded to 128, in bf16 (halves the input DMA).
    x2 = x[:, 0, :, :]                                        # (N, H, 23)
    xpad = jnp.pad(x2, ((0, 0), (1, 1), (0, 0)))
    xc = jnp.concatenate([xpad[:, :-2, :], xpad[:, 1:-1, :], xpad[:, 2:, :]],
                         axis=-1)                             # (N, H, 69)
    xp = jnp.pad(xc, ((0, 0), (0, 0), (0, LANES - 3 * CIN))).astype(jnp.bfloat16)

    logits = pl.pallas_call(
        _fused_net_kernel,
        out_shape=jax.ShapeDtypeStruct((N, 1, LANES), jnp.float32),
        grid=(N,),
        in_specs=[
            pl.BlockSpec((None, H, LANES), lambda i: (i, 0, 0)),    # x (im2col)
            pl.BlockSpec((LANES, LANES), lambda i: (0, 0)),         # w1 (K-packed)
            pl.BlockSpec((1, LANES), lambda i: (0, 0)),             # b1
            pl.BlockSpec((3, LANES, LANES), lambda i: (0, 0, 0)),   # w2
            pl.BlockSpec((1, LANES), lambda i: (0, 0)),             # b2
            pl.BlockSpec((3, LANES, LANES), lambda i: (0, 0, 0)),   # w3
            pl.BlockSpec((1, LANES), lambda i: (0, 0)),             # b3
            pl.BlockSpec((16 * LANES, LANES), lambda i: (0, 0)),    # wf1 (flat)
            pl.BlockSpec((1, LANES), lambda i: (0, 0)),             # bf1
            pl.BlockSpec((LANES, LANES), lambda i: (0, 0)),         # wf2
            pl.BlockSpec((1, LANES), lambda i: (0, 0)),             # bf2
        ],
        out_specs=pl.BlockSpec((None, 1, LANES), lambda i: (i, 0, 0)),
        scratch_shapes=[
            pltpu.VMEM((H, LANES), jnp.float32),                  # conv1 out
            pltpu.VMEM((2 * HALO + H // 4, LANES), jnp.float32),  # pool1 (+halo)
            pltpu.VMEM((H // 4, LANES), jnp.float32),             # conv2 out
            pltpu.VMEM((2 * HALO + H // 16, LANES), jnp.float32), # pool2 (+halo)
            pltpu.VMEM((H // 16, LANES), jnp.float32),            # conv3 out
            pltpu.VMEM((1, 16 * LANES), jnp.float32),             # pool3 flat
        ],
        compiler_params=pltpu.CompilerParams(
            # No cross-sample dependency in the kernel anymore (softmax is
            # outside) -> samples shard across TensorCores on v7x.
            dimension_semantics=("parallel",)),
    )(xp, params["w1"], params["b1"], params["w2"], params["b2"],
      params["w3"], params["b3"], params["wf1"], params["bf1"],
      params["wf2"], params["bf2"])

    # legacy nn.Softmax() on a 3-D (N,1,2) tensor => dim=0 (across the batch)
    probs = jax.nn.softmax(logits[:, 0, :2], axis=0)
    return probs.reshape(N, 1, 2)


# ---------------------------------------------------------------------------
# Parameter construction (BN folded, bf16 MXU weights, 128-lane padded)
# ---------------------------------------------------------------------------
def make_params(key):
    ks = jax.random.split(key, 22)

    def fold_conv_bn(kw, kb, kg, kbe, km, kv, cin, w_scale):
        # torch Conv2d weight (128,1,3,cin) + BatchNorm2d(128) folded (eval mode),
        # laid out as one (cin, 128) matrix per height tap.
        w = jax.random.normal(kw, (128, 3, cin), jnp.float32) * w_scale
        b = 0.05 * jax.random.normal(kb, (128,), jnp.float32)
        gamma = 1.0 + 0.05 * jax.random.normal(kg, (128,), jnp.float32)
        beta = 0.05 * jax.random.normal(kbe, (128,), jnp.float32)
        mean = 0.05 * jax.random.normal(km, (128,), jnp.float32)
        var = 1.0 + 0.05 * jnp.abs(jax.random.normal(kv, (128,), jnp.float32))
        s = gamma / jnp.sqrt(var + EPS)
        wt = jnp.transpose(w, (1, 2, 0)) * s[None, None, :]        # (3, cin, 128)
        bias = ((b - mean) * s + beta).reshape(1, LANES)
        return wt, bias

    # conv1+bn1: K-pack the 3 taps -> (69, 128), zero-pad K to 128, bf16.
    wt1, b1 = fold_conv_bn(*ks[0:6], CIN, 0.05)
    w1 = jnp.pad(wt1.reshape(3 * CIN, LANES),
                 ((0, LANES - 3 * CIN), (0, 0))).astype(jnp.bfloat16)

    # conv2/conv3 (+bn): (3, 128, 128) per-tap matrices, bf16.
    wt2, b2 = fold_conv_bn(*ks[6:12], LANES, 0.03)
    wt3, b3 = fold_conv_bn(*ks[12:18], LANES, 0.03)
    w2 = wt2.astype(jnp.bfloat16)
    w3 = wt3.astype(jnp.bfloat16)

    # fc1: Conv2d(1, 100, (16, 128)) -> (16, 128, 100), flattened to (2048, 128-pad).
    wf1 = jax.random.normal(ks[18], (100, 16, LANES), jnp.float32) * 0.02
    wf1 = jnp.transpose(wf1, (1, 2, 0)).reshape(16 * LANES, 100)
    wf1 = jnp.pad(wf1, ((0, 0), (0, LANES - 100))).astype(jnp.bfloat16)
    bf1 = jnp.pad(0.05 * jax.random.normal(ks[19], (100,), jnp.float32),
                  (0, LANES - 100)).reshape(1, LANES)

    # fc2: Conv2d(1, 2, (1, 100)) -> (100, 2), zero-padded to (128, 128).
    wf2 = jax.random.normal(ks[20], (2, 100), jnp.float32) * 0.05
    wf2 = jnp.pad(wf2.T, ((0, LANES - 100), (0, LANES - 2))).astype(jnp.bfloat16)
    bf2 = jnp.pad(0.05 * jax.random.normal(ks[21], (2,), jnp.float32),
                  (0, LANES - 2)).reshape(1, LANES)

    return dict(w1=w1, b1=b1, w2=w2, b2=b2, w3=w3, b3=b3,
                wf1=wf1, bf1=bf1, wf2=wf2, bf2=bf2)


# ---------------------------------------------------------------------------
# Pure-JAX reference with identical semantics & matmul precision
# ---------------------------------------------------------------------------
def net_forward_ref(x, params):
    N, _, H, W = x.shape
    f32, bf16 = jnp.float32, jnp.bfloat16

    # conv1 via the same im2col (bf16 operands, f32 accumulation)
    x2 = x[:, 0, :, :]
    xpad = jnp.pad(x2, ((0, 0), (1, 1), (0, 0)))
    xc = jnp.concatenate([xpad[:, :-2, :], xpad[:, 1:-1, :], xpad[:, 2:, :]],
                         axis=-1).astype(bf16)                    # (N, H, 69)
    w1 = params["w1"][:3 * CIN, :]
    h = jnp.einsum("nrk,ko->nro", xc, w1,
                   preferred_element_type=f32) + params["b1"]
    h = jnp.maximum(h, 0.0)
    h = h.reshape(N, -1, 4, LANES).max(axis=2)                    # pool1

    def conv_stage(h, w, b):
        hp = jnp.pad(h, ((0, 0), (1, 1), (0, 0))).astype(bf16)
        y = (jnp.einsum("nrc,co->nro", hp[:, :-2, :], w[0], preferred_element_type=f32)
             + jnp.einsum("nrc,co->nro", hp[:, 1:-1, :], w[1], preferred_element_type=f32)
             + jnp.einsum("nrc,co->nro", hp[:, 2:, :], w[2], preferred_element_type=f32)
             + b)
        y = jnp.maximum(y, 0.0)
        return y.reshape(N, -1, 4, LANES).max(axis=2)

    h = conv_stage(h, params["w2"], params["b2"])
    h = conv_stage(h, params["w3"], params["b3"])                 # (N, 16, 128)

    hf = h.reshape(N, 16 * LANES).astype(bf16)
    z1 = jnp.einsum("nk,ko->no", hf, params["wf1"],
                    preferred_element_type=f32) + params["bf1"]
    z2 = jnp.einsum("nk,ko->no", z1.astype(bf16), params["wf2"],
                    preferred_element_type=f32) + params["bf2"]
    probs = jax.nn.softmax(z2[:, :2], axis=0)      # legacy nn.Softmax() -> dim 0
    return probs.reshape(N, 1, 2)


if __name__ == "__main__":
    key = jax.random.PRNGKey(0)
    kx, kp = jax.random.split(key)
    # W=23 and H=1024 are the smallest shapes consistent with conv1's (3,23)
    # kernel, the three (4,1) pools, and fc1's (16,128) kernel.
    N, H, W = 2, 1024, 23
    x = jax.random.normal(kx, (N, 1, H, W), jnp.float32)
    params = make_params(kp)

    out = jax.block_until_ready(jax.jit(net_forward)(x, params))

    ref = net_forward_ref(x, params)
    assert out.shape == (N, 1, 2), out.shape
    assert jnp.allclose(out, ref, atol=2e-3, rtol=2e-3), float(
        jnp.max(jnp.abs(out - ref)))
    # legacy softmax(dim=0): probabilities sum to 1 across the batch axis
    assert jnp.allclose(jnp.sum(out, axis=0), 1.0, atol=1e-4)
    print("KERNEL_OK")
</pallas_src>

<mosaic_0001>
module attributes {stable_mosaic.version = 11 : i64} {
  func.func @_fused_net_kernel(%arg0: i32, %arg1: memref<1x1024x128xbf16, #tpu.memory_space<vmem>>, %arg2: memref<128x128xbf16, #tpu.memory_space<vmem>>, %arg3: memref<1x128xf32, #tpu.memory_space<vmem>>, %arg4: memref<3x128x128xbf16, #tpu.memory_space<vmem>>, %arg5: memref<1x128xf32, #tpu.memory_space<vmem>>, %arg6: memref<3x128x128xbf16, #tpu.memory_space<vmem>>, %arg7: memref<1x128xf32, #tpu.memory_space<vmem>>, %arg8: memref<2048x128xbf16, #tpu.memory_space<vmem>>, %arg9: memref<1x128xf32, #tpu.memory_space<vmem>>, %arg10: memref<128x128xbf16, #tpu.memory_space<vmem>>, %arg11: memref<1x128xf32, #tpu.memory_space<vmem>>, %arg12: memref<1x1x128xf32, #tpu.memory_space<vmem>>, %arg13: memref<1024x128xf32, #tpu.memory_space<vmem>>, %arg14: memref<272x128xf32, #tpu.memory_space<vmem>>, %arg15: memref<256x128xf32, #tpu.memory_space<vmem>>, %arg16: memref<80x128xf32, #tpu.memory_space<vmem>>, %arg17: memref<64x128xf32, #tpu.memory_space<vmem>>, %arg18: memref<1x2048xf32, #tpu.memory_space<vmem>>) attributes {dimension_semantics = [#tpu.dimension_semantics<parallel>], iteration_bounds = array<i64: 2>, scalar_prefetch = 0 : i64, scratch_operands = 6 : i64, tpu.core_type = #tpu.core_type<tc>, window_params = [{transform_indices = @transform_0, window_bounds = array<i64: 1, 1024, 128>}, {pipeline_mode = #tpu.pipeline_mode<synchronous>, transform_indices = @transform_1, window_bounds = array<i64: 128, 128>}, {pipeline_mode = #tpu.pipeline_mode<synchronous>, transform_indices = @transform_2, window_bounds = array<i64: 1, 128>}, {pipeline_mode = #tpu.pipeline_mode<synchronous>, transform_indices = @transform_3, window_bounds = array<i64: 3, 128, 128>}, {pipeline_mode = #tpu.pipeline_mode<synchronous>, transform_indices = @transform_4, window_bounds = array<i64: 1, 128>}, {pipeline_mode = #tpu.pipeline_mode<synchronous>, transform_indices = @transform_5, window_bounds = array<i64: 3, 128, 128>}, {pipeline_mode = #tpu.pipeline_mode<synchronous>, transform_indices = @transform_6, window_bounds = array<i64: 1, 128>}, {pipeline_mode = #tpu.pipeline_mode<synchronous>, transform_indices = @transform_7, window_bounds = array<i64: 2048, 128>}, {pipeline_mode = #tpu.pipeline_mode<synchronous>, transform_indices = @transform_8, window_bounds = array<i64: 1, 128>}, {pipeline_mode = #tpu.pipeline_mode<synchronous>, transform_indices = @transform_9, window_bounds = array<i64: 128, 128>}, {pipeline_mode = #tpu.pipeline_mode<synchronous>, transform_indices = @transform_10, window_bounds = array<i64: 1, 128>}, {transform_indices = @transform_11, window_bounds = array<i64: 1, 1, 128>}]} {
    %cst = arith.constant 0.000000e+00 : f32
    %0 = vector.broadcast %cst : f32 to vector<8x128xf32>
    %c0 = arith.constant 0 : index
    %c0_0 = arith.constant 0 : index
    %1 = vector.load %arg2[%c0, %c0_0] : memref<128x128xbf16, #tpu.memory_space<vmem>>, vector<128x128xbf16>
    %c0_1 = arith.constant 0 : index
    %c0_2 = arith.constant 0 : index
    %2 = vector.load %arg3[%c0_1, %c0_2] : memref<1x128xf32, #tpu.memory_space<vmem>>, vector<1x128xf32>
    %c0_3 = arith.constant 0 : index
    %c0_4 = arith.constant 0 : index
    %3 = vector.load %arg5[%c0_3, %c0_4] : memref<1x128xf32, #tpu.memory_space<vmem>>, vector<1x128xf32>
    %c0_5 = arith.constant 0 : index
    %c0_6 = arith.constant 0 : index
    %4 = vector.load %arg7[%c0_5, %c0_6] : memref<1x128xf32, #tpu.memory_space<vmem>>, vector<1x128xf32>
    %c0_7 = arith.constant 0 : index
    %c0_8 = arith.constant 0 : index
    %c0_9 = arith.constant 0 : index
    %5 = vector.load %arg1[%c0_7, %c0_8, %c0_9] : memref<1x1024x128xbf16, #tpu.memory_space<vmem>>, vector<1x256x128xbf16>
    %6 = vector.shape_cast %5 : vector<1x256x128xbf16> to vector<256x128xbf16>
    %cst_10 = arith.constant dense<0.000000e+00> : vector<256x128xf32>
    %7 = tpu.matmul %6, %1, %cst_10 {dimension_numbers = #tpu.dot_dimension_numbers<[1], [0], [0], [1], [0, 0, 1, 1], [], []>} : vector<256x128xbf16>, vector<128x128xbf16>, vector<256x128xf32> -> vector<256x128xf32>
    %8 = vector.broadcast %2 : vector<1x128xf32> to vector<256x128xf32>
    %9 = arith.addf %7, %8 : vector<256x128xf32>
    %cst_11 = arith.constant 0.000000e+00 : f32
    %10 = vector.broadcast %cst_11 : f32 to vector<256x128xf32>
    %11 = arith.maximumf %9, %10 : vector<256x128xf32>
    %c0_12 = arith.constant 0 : index
    %c0_13 = arith.constant 0 : index
    %12 = vector.load %arg13[%c0_12, %c0_13] : memref<1024x128xf32, #tpu.memory_space<vmem>>, vector<256x128xf32>
    tpu.vector_store %arg13[%c0_12, %c0_13], %11 {strides = array<i32>} : memref<1024x128xf32, #tpu.memory_space<vmem>>, vector<256x128xf32>,
    %c0_14 = arith.constant 0 : index
    %c256 = arith.constant 256 : index
    %c0_15 = arith.constant 0 : index
    %13 = vector.load %arg1[%c0_14, %c256, %c0_15] : memref<1x1024x128xbf16, #tpu.memory_space<vmem>>, vector<1x256x128xbf16>
    %14 = vector.shape_cast %13 : vector<1x256x128xbf16> to vector<256x128xbf16>
    %cst_16 = arith.constant dense<0.000000e+00> : vector<256x128xf32>
    %15 = tpu.matmul %14, %1, %cst_16 {dimension_numbers = #tpu.dot_dimension_numbers<[1], [0], [0], [1], [0, 0, 1, 1], [], []>} : vector<256x128xbf16>, vector<128x128xbf16>, vector<256x128xf32> -> vector<256x128xf32>
    %16 = vector.broadcast %2 : vector<1x128xf32> to vector<256x128xf32>
    %17 = arith.addf %15, %16 : vector<256x128xf32>
    %cst_17 = arith.constant 0.000000e+00 : f32
    %18 = vector.broadcast %cst_17 : f32 to vector<256x128xf32>
    %19 = arith.maximumf %17, %18 : vector<256x128xf32>
    %c256_18 = arith.constant 256 : index
    %c0_19 = arith.constant 0 : index
    %20 = vector.load %arg13[%c256_18, %c0_19] : memref<1024x128xf32, #tpu.memory_space<vmem>>, vector<256x128xf32>
    tpu.vector_store %arg13[%c256_18, %c0_19], %19 {strides = array<i32>} : memref<1024x128xf32, #tpu.memory_space<vmem>>, vector<256x128xf32>,
    %c0_20 = arith.constant 0 : index
    %c512 = arith.constant 512 : index
    %c0_21 = arith.constant 0 : index
    %21 = vector.load %arg1[%c0_20, %c512, %c0_21] : memref<1x1024x128xbf16, #tpu.memory_space<vmem>>, vector<1x256x128xbf16>
    %22 = vector.shape_cast %21 : vector<1x256x128xbf16> to vector<256x128xbf16>
    %cst_22 = arith.constant dense<0.000000e+00> : vector<256x128xf32>
    %23 = tpu.matmul %22, %1, %cst_22 {dimension_numbers = #tpu.dot_dimension_numbers<[1], [0], [0], [1], [0, 0, 1, 1], [], []>} : vector<256x128xbf16>, vector<128x128xbf16>, vector<256x128xf32> -> vector<256x128xf32>
    %24 = vector.broadcast %2 : vector<1x128xf32> to vector<256x128xf32>
    %25 = arith.addf %23, %24 : vector<256x128xf32>
    %cst_23 = arith.constant 0.000000e+00 : f32
    %26 = vector.broadcast %cst_23 : f32 to vector<256x128xf32>
    %27 = arith.maximumf %25, %26 : vector<256x128xf32>
    %c512_24 = arith.constant 512 : index
    %c0_25 = arith.constant 0 : index
    %28 = vector.load %arg13[%c512_24, %c0_25] : memref<1024x128xf32, #tpu.memory_space<vmem>>, vector<256x128xf32>
    tpu.vector_store %arg13[%c512_24, %c0_25], %27 {strides = array<i32>} : memref<1024x128xf32, #tpu.memory_space<vmem>>, vector<256x128xf32>,
    %c0_26 = arith.constant 0 : index
    %c768 = arith.constant 768 : index
    %c0_27 = arith.constant 0 : index
    %29 = vector.load %arg1[%c0_26, %c768, %c0_27] : memref<1x1024x128xbf16, #tpu.memory_space<vmem>>, vector<1x256x128xbf16>
    %30 = vector.shape_cast %29 : vector<1x256x128xbf16> to vector<256x128xbf16>
    %cst_28 = arith.constant dense<0.000000e+00> : vector<256x128xf32>
    %31 = tpu.matmul %30, %1, %cst_28 {dimension_numbers = #tpu.dot_dimension_numbers<[1], [0], [0], [1], [0, 0, 1, 1], [], []>} : vector<256x128xbf16>, vector<128x128xbf16>, vector<256x128xf32> -> vector<256x128xf32>
    %32 = vector.broadcast %2 : vector<1x128xf32> to vector<256x128xf32>
    %33 = arith.addf %31, %32 : vector<256x128xf32>
    %cst_29 = arith.constant 0.000000e+00 : f32
    %34 = vector.broadcast %cst_29 : f32 to vector<256x128xf32>
    %35 = arith.maximumf %33, %34 : vector<256x128xf32>
    %c768_30 = arith.constant 768 : index
    %c0_31 = arith.constant 0 : index
    %36 = vector.load %arg13[%c768_30, %c0_31] : memref<1024x128xf32, #tpu.memory_space<vmem>>, vector<256x128xf32>
    tpu.vector_store %arg13[%c768_30, %c0_31], %35 {strides = array<i32>} : memref<1024x128xf32, #tpu.memory_space<vmem>>, vector<256x128xf32>,
    %c0_32 = arith.constant 0 : index
    %c0_33 = arith.constant 0 : index
    %37 = vector.load %arg14[%c0_32, %c0_33] : memref<272x128xf32, #tpu.memory_space<vmem>>, vector<8x128xf32>
    tpu.vector_store %arg14[%c0_32, %c0_33], %0 {strides = array<i32>} : memref<272x128xf32, #tpu.memory_space<vmem>>, vector<8x128xf32>,
    %c264 = arith.constant 264 : index
    %c0_34 = arith.constant 0 : index
    %38 = vector.load %arg14[%c264, %c0_34] : memref<272x128xf32, #tpu.memory_space<vmem>>, vector<8x128xf32>
    tpu.vector_store %arg14[%c264, %c0_34], %0 {strides = array<i32>} : memref<272x128xf32, #tpu.memory_space<vmem>>, vector<8x128xf32>,
    %c0_35 = arith.constant 0 : index
    %c0_36 = arith.constant 0 : index
    %39 = tpu.strided_load %arg13[%c0_35, %c0_36] {strides = array<i32: 4, 1>} : memref<1024x128xf32, #tpu.memory_space<vmem>>, vector<128x128xf32>
    %c1 = arith.constant 1 : index
    %c0_37 = arith.constant 0 : index
    %40 = tpu.strided_load %arg13[%c1, %c0_37] {strides = array<i32: 4, 1>} : memref<1024x128xf32, #tpu.memory_space<vmem>>, vector<128x128xf32>
    %41 = arith.maximumf %39, %40 : vector<128x128xf32>
    %c2 = arith.constant 2 : index
    %c0_38 = arith.constant 0 : index
    %42 = tpu.strided_load %arg13[%c2, %c0_38] {strides = array<i32: 4, 1>} : memref<1024x128xf32, #tpu.memory_space<vmem>>, vector<128x128xf32>
    %43 = arith.maximumf %41, %42 : vector<128x128xf32>
    %c3 = arith.constant 3 : index
    %c0_39 = arith.constant 0 : index
    %44 = tpu.strided_load %arg13[%c3, %c0_39] {strides = array<i32: 4, 1>} : memref<1024x128xf32, #tpu.memory_space<vmem>>, vector<128x128xf32>
    %45 = arith.maximumf %43, %44 : vector<128x128xf32>
    %c8 = arith.constant 8 : index
    %c0_40 = arith.constant 0 : index
    %46 = vector.load %arg14[%c8, %c0_40] : memref<272x128xf32, #tpu.memory_space<vmem>>, vector<128x128xf32>
    tpu.vector_store %arg14[%c8, %c0_40], %45 {strides = array<i32>} : memref<272x128xf32, #tpu.memory_space<vmem>>, vector<128x128xf32>,
    %c512_41 = arith.constant 512 : index
    %c0_42 = arith.constant 0 : index
    %47 = tpu.strided_load %arg13[%c512_41, %c0_42] {strides = array<i32: 4, 1>} : memref<1024x128xf32, #tpu.memory_space<vmem>>, vector<128x128xf32>
    %c513 = arith.constant 513 : index
    %c0_43 = arith.constant 0 : index
    %48 = tpu.strided_load %arg13[%c513, %c0_43] {strides = array<i32: 4, 1>} : memref<1024x128xf32, #tpu.memory_space<vmem>>, vector<128x128xf32>
    %49 = arith.maximumf %47, %48 : vector<128x128xf32>
    %c514 = arith.constant 514 : index
    %c0_44 = arith.constant 0 : index
    %50 = tpu.strided_load %arg13[%c514, %c0_44] {strides = array<i32: 4, 1>} : memref<1024x128xf32, #tpu.memory_space<vmem>>, vector<128x128xf32>
    %51 = arith.maximumf %49, %50 : vector<128x128xf32>
    %c515 = arith.constant 515 : index
    %c0_45 = arith.constant 0 : index
    %52 = tpu.strided_load %arg13[%c515, %c0_45] {strides = array<i32: 4, 1>} : memref<1024x128xf32, #tpu.memory_space<vmem>>, vector<128x128xf32>
    %53 = arith.maximumf %51, %52 : vector<128x128xf32>
    %c136 = arith.constant 136 : index
    %c0_46 = arith.constant 0 : index
    %54 = vector.load %arg14[%c136, %c0_46] : memref<272x128xf32, #tpu.memory_space<vmem>>, vector<128x128xf32>
    tpu.vector_store %arg14[%c136, %c0_46], %53 {strides = array<i32>} : memref<272x128xf32, #tpu.memory_space<vmem>>, vector<128x128xf32>,
    %c7 = arith.constant 7 : index
    %c0_47 = arith.constant 0 : index
    %55 = vector.load %arg14[%c7, %c0_47] : memref<272x128xf32, #tpu.memory_space<vmem>>, vector<128x128xf32>
    %56 = arith.truncf %55 : vector<128x128xf32> to vector<128x128xbf16>
    %c0_48 = arith.constant 0 : index
    %c0_49 = arith.constant 0 : index
    %c0_50 = arith.constant 0 : index
    %57 = vector.load %arg4[%c0_48, %c0_49, %c0_50] : memref<3x128x128xbf16, #tpu.memory_space<vmem>>, vector<1x128x128xbf16>
    %58 = vector.shape_cast %57 : vector<1x128x128xbf16> to vector<128x128xbf16>
    %cst_51 = arith.constant dense<0.000000e+00> : vector<128x128xf32>
    %59 = tpu.matmul %56, %58, %cst_51 {dimension_numbers = #tpu.dot_dimension_numbers<[1], [0], [0], [1], [0, 0, 1, 1], [], []>} : vector<128x128xbf16>, vector<128x128xbf16>, vector<128x128xf32> -> vector<128x128xf32>
    %c8_52 = arith.constant 8 : index
    %c0_53 = arith.constant 0 : index
    %60 = vector.load %arg14[%c8_52, %c0_53] : memref<272x128xf32, #tpu.memory_space<vmem>>, vector<128x128xf32>
    %61 = arith.truncf %60 : vector<128x128xf32> to vector<128x128xbf16>
    %c1_54 = arith.constant 1 : index
    %c0_55 = arith.constant 0 : index
    %c0_56 = arith.constant 0 : index
    %62 = vector.load %arg4[%c1_54, %c0_55, %c0_56] : memref<3x128x128xbf16, #tpu.memory_space<vmem>>, vector<1x128x128xbf16>
    %63 = vector.shape_cast %62 : vector<1x128x128xbf16> to vector<128x128xbf16>
    %cst_57 = arith.constant dense<0.000000e+00> : vector<128x128xf32>
    %64 = tpu.matmul %61, %63, %cst_57 {dimension_numbers = #tpu.dot_dimension_numbers<[1], [0], [0], [1], [0, 0, 1, 1], [], []>} : vector<128x128xbf16>, vector<128x128xbf16>, vector<128x128xf32> -> vector<128x128xf32>
    %65 = arith.addf %59, %64 : vector<128x128xf32>
    %c9 = arith.constant 9 : index
    %c0_58 = arith.constant 0 : index
    %66 = vector.load %arg14[%c9, %c0_58] : memref<272x128xf32, #tpu.memory_space<vmem>>, vector<128x128xf32>
    %67 = arith.truncf %66 : vector<128x128xf32> to vector<128x128xbf16>
    %c2_59 = arith.constant 2 : index
    %c0_60 = arith.constant 0 : index
    %c0_61 = arith.constant 0 : index
    %68 = vector.load %arg4[%c2_59, %c0_60, %c0_61] : memref<3x128x128xbf16, #tpu.memory_space<vmem>>, vector<1x128x128xbf16>
    %69 = vector.shape_cast %68 : vector<1x128x128xbf16> to vector<128x128xbf16>
    %cst_62 = arith.constant dense<0.000000e+00> : vector<128x128xf32>
    %70 = tpu.matmul %67, %69, %cst_62 {dimension_numbers = #tpu.dot_dimension_numbers<[1], [0], [0], [1], [0, 0, 1, 1], [], []>} : vector<128x128xbf16>, vector<128x128xbf16>, vector<128x128xf32> -> vector<128x128xf32>
    %71 = arith.addf %65, %70 : vector<128x128xf32>
    %72 = vector.broadcast %3 : vector<1x128xf32> to vector<128x128xf32>
    %73 = arith.addf %71, %72 : vector<128x128xf32>
    %cst_63 = arith.constant 0.000000e+00 : f32
    %74 = vector.broadcast %cst_63 : f32 to vector<128x128xf32>
    %75 = arith.maximumf %73, %74 : vector<128x128xf32>
    %c0_64 = arith.constant 0 : index
    %c0_65 = arith.constant 0 : index
    %76 = vector.load %arg15[%c0_64, %c0_65] : memref<256x128xf32, #tpu.memory_space<vmem>>, vector<128x128xf32>
    tpu.vector_store %arg15[%c0_64, %c0_65], %75 {strides = array<i32>} : memref<256x128xf32, #tpu.memory_space<vmem>>, vector<128x128xf32>,
    %c135 = arith.constant 135 : index
    %c0_66 = arith.constant 0 : index
    %77 = vector.load %arg14[%c135, %c0_66] : memref<272x128xf32, #tpu.memory_space<vmem>>, vector<128x128xf32>
    %78 = arith.truncf %77 : vector<128x128xf32> to vector<128x128xbf16>
    %c0_67 = arith.constant 0 : index
    %c0_68 = arith.constant 0 : index
    %c0_69 = arith.constant 0 : index
    %79 = vector.load %arg4[%c0_67, %c0_68, %c0_69] : memref<3x128x128xbf16, #tpu.memory_space<vmem>>, vector<1x128x128xbf16>
    %80 = vector.shape_cast %79 : vector<1x128x128xbf16> to vector<128x128xbf16>
    %cst_70 = arith.constant dense<0.000000e+00> : vector<128x128xf32>
    %81 = tpu.matmul %78, %80, %cst_70 {dimension_numbers = #tpu.dot_dimension_numbers<[1], [0], [0], [1], [0, 0, 1, 1], [], []>} : vector<128x128xbf16>, vector<128x128xbf16>, vector<128x128xf32> -> vector<128x128xf32>
    %c136_71 = arith.constant 136 : index
    %c0_72 = arith.constant 0 : index
    %82 = vector.load %arg14[%c136_71, %c0_72] : memref<272x128xf32, #tpu.memory_space<vmem>>, vector<128x128xf32>
    %83 = arith.truncf %82 : vector<128x128xf32> to vector<128x128xbf16>
    %c1_73 = arith.constant 1 : index
    %c0_74 = arith.constant 0 : index
    %c0_75 = arith.constant 0 : index
    %84 = vector.load %arg4[%c1_73, %c0_74, %c0_75] : memref<3x128x128xbf16, #tpu.memory_space<vmem>>, vector<1x128x128xbf16>
    %85 = vector.shape_cast %84 : vector<1x128x128xbf16> to vector<128x128xbf16>
    %cst_76 = arith.constant dense<0.000000e+00> : vector<128x128xf32>
    %86 = tpu.matmul %83, %85, %cst_76 {dimension_numbers = #tpu.dot_dimension_numbers<[1], [0], [0], [1], [0, 0, 1, 1], [], []>} : vector<128x128xbf16>, vector<128x128xbf16>, vector<128x128xf32> -> vector<128x128xf32>
    %87 = arith.addf %81, %86 : vector<128x128xf32>
    %c137 = arith.constant 137 : index
    %c0_77 = arith.constant 0 : index
    %88 = vector.load %arg14[%c137, %c0_77] : memref<272x128xf32, #tpu.memory_space<vmem>>, vector<128x128xf32>
    %89 = arith.truncf %88 : vector<128x128xf32> to vector<128x128xbf16>
    %c2_78 = arith.constant 2 : index
    %c0_79 = arith.constant 0 : index
    %c0_80 = arith.constant 0 : index
    %90 = vector.load %arg4[%c2_78, %c0_79, %c0_80] : memref<3x128x128xbf16, #tpu.memory_space<vmem>>, vector<1x128x128xbf16>
    %91 = vector.shape_cast %90 : vector<1x128x128xbf16> to vector<128x128xbf16>
    %cst_81 = arith.constant dense<0.000000e+00> : vector<128x128xf32>
    %92 = tpu.matmul %89, %91, %cst_81 {dimension_numbers = #tpu.dot_dimension_numbers<[1], [0], [0], [1], [0, 0, 1, 1], [], []>} : vector<128x128xbf16>, vector<128x128xbf16>, vector<128x128xf32> -> vector<128x128xf32>
    %93 = arith.addf %87, %92 : vector<128x128xf32>
    %94 = vector.broadcast %3 : vector<1x128xf32> to vector<128x128xf32>
    %95 = arith.addf %93, %94 : vector<128x128xf32>
    %cst_82 = arith.constant 0.000000e+00 : f32
    %96 = vector.broadcast %cst_82 : f32 to vector<128x128xf32>
    %97 = arith.maximumf %95, %96 : vector<128x128xf32>
    %c128 = arith.constant 128 : index
    %c0_83 = arith.constant 0 : index
    %98 = vector.load %arg15[%c128, %c0_83] : memref<256x128xf32, #tpu.memory_space<vmem>>, vector<128x128xf32>
    tpu.vector_store %arg15[%c128, %c0_83], %97 {strides = array<i32>} : memref<256x128xf32, #tpu.memory_space<vmem>>, vector<128x128xf32>,
    %c0_84 = arith.constant 0 : index
    %c0_85 = arith.constant 0 : index
    %99 = vector.load %arg16[%c0_84, %c0_85] : memref<80x128xf32, #tpu.memory_space<vmem>>, vector<8x128xf32>
    tpu.vector_store %arg16[%c0_84, %c0_85], %0 {strides = array<i32>} : memref<80x128xf32, #tpu.memory_space<vmem>>, vector<8x128xf32>,
    %c72 = arith.constant 72 : index
    %c0_86 = arith.constant 0 : index
    %100 = vector.load %arg16[%c72, %c0_86] : memref<80x128xf32, #tpu.memory_space<vmem>>, vector<8x128xf32>
    tpu.vector_store %arg16[%c72, %c0_86], %0 {strides = array<i32>} : memref<80x128xf32, #tpu.memory_space<vmem>>, vector<8x128xf32>,
    %c0_87 = arith.constant 0 : index
    %c0_88 = arith.constant 0 : index
    %101 = tpu.strided_load %arg15[%c0_87, %c0_88] {strides = array<i32: 4, 1>} : memref<256x128xf32, #tpu.memory_space<vmem>>, vector<64x128xf32>
    %c1_89 = arith.constant 1 : index
    %c0_90 = arith.constant 0 : index
    %102 = tpu.strided_load %arg15[%c1_89, %c0_90] {strides = array<i32: 4, 1>} : memref<256x128xf32, #tpu.memory_space<vmem>>, vector<64x128xf32>
    %103 = arith.maximumf %101, %102 : vector<64x128xf32>
    %c2_91 = arith.constant 2 : index
    %c0_92 = arith.constant 0 : index
    %104 = tpu.strided_load %arg15[%c2_91, %c0_92] {strides = array<i32: 4, 1>} : memref<256x128xf32, #tpu.memory_space<vmem>>, vector<64x128xf32>
    %105 = arith.maximumf %103, %104 : vector<64x128xf32>
    %c3_93 = arith.constant 3 : index
    %c0_94 = arith.constant 0 : index
    %106 = tpu.strided_load %arg15[%c3_93, %c0_94] {strides = array<i32: 4, 1>} : memref<256x128xf32, #tpu.memory_space<vmem>>, vector<64x128xf32>
    %107 = arith.maximumf %105, %106 : vector<64x128xf32>
    %c8_95 = arith.constant 8 : index
    %c0_96 = arith.constant 0 : index
    %108 = vector.load %arg16[%c8_95, %c0_96] : memref<80x128xf32, #tpu.memory_space<vmem>>, vector<64x128xf32>
    tpu.vector_store %arg16[%c8_95, %c0_96], %107 {strides = array<i32>} : memref<80x128xf32, #tpu.memory_space<vmem>>, vector<64x128xf32>,
    %c7_97 = arith.constant 7 : index
    %c0_98 = arith.constant 0 : index
    %109 = vector.load %arg16[%c7_97, %c0_98] : memref<80x128xf32, #tpu.memory_space<vmem>>, vector<64x128xf32>
    %110 = arith.truncf %109 : vector<64x128xf32> to vector<64x128xbf16>
    %c0_99 = arith.constant 0 : index
    %c0_100 = arith.constant 0 : index
    %c0_101 = arith.constant 0 : index
    %111 = vector.load %arg6[%c0_99, %c0_100, %c0_101] : memref<3x128x128xbf16, #tpu.memory_space<vmem>>, vector<1x128x128xbf16>
    %112 = vector.shape_cast %111 : vector<1x128x128xbf16> to vector<128x128xbf16>
    %cst_102 = arith.constant dense<0.000000e+00> : vector<64x128xf32>
    %113 = tpu.matmul %110, %112, %cst_102 {dimension_numbers = #tpu.dot_dimension_numbers<[1], [0], [0], [1], [0, 0, 1, 1], [], []>} : vector<64x128xbf16>, vector<128x128xbf16>, vector<64x128xf32> -> vector<64x128xf32>
    %c8_103 = arith.constant 8 : index
    %c0_104 = arith.constant 0 : index
    %114 = vector.load %arg16[%c8_103, %c0_104] : memref<80x128xf32, #tpu.memory_space<vmem>>, vector<64x128xf32>
    %115 = arith.truncf %114 : vector<64x128xf32> to vector<64x128xbf16>
    %c1_105 = arith.constant 1 : index
    %c0_106 = arith.constant 0 : index
    %c0_107 = arith.constant 0 : index
    %116 = vector.load %arg6[%c1_105, %c0_106, %c0_107] : memref<3x128x128xbf16, #tpu.memory_space<vmem>>, vector<1x128x128xbf16>
    %117 = vector.shape_cast %116 : vector<1x128x128xbf16> to vector<128x128xbf16>
    %cst_108 = arith.constant dense<0.000000e+00> : vector<64x128xf32>
    %118 = tpu.matmul %115, %117, %cst_108 {dimension_numbers = #tpu.dot_dimension_numbers<[1], [0], [0], [1], [0, 0, 1, 1], [], []>} : vector<64x128xbf16>, vector<128x128xbf16>, vector<64x128xf32> -> vector<64x128xf32>
    %119 = arith.addf %113, %118 : vector<64x128xf32>
    %c9_109 = arith.constant 9 : index
    %c0_110 = arith.constant 0 : index
    %120 = vector.load %arg16[%c9_109, %c0_110] : memref<80x128xf32, #tpu.memory_space<vmem>>, vector<64x128xf32>
    %121 = arith.truncf %120 : vector<64x128xf32> to vector<64x128xbf16>
    %c2_111 = arith.constant 2 : index
    %c0_112 = arith.constant 0 : index
    %c0_113 = arith.constant 0 : index
    %122 = vector.load %arg6[%c2_111, %c0_112, %c0_113] : memref<3x128x128xbf16, #tpu.memory_space<vmem>>, vector<1x128x128xbf16>
    %123 = vector.shape_cast %122 : vector<1x128x128xbf16> to vector<128x128xbf16>
    %cst_114 = arith.constant dense<0.000000e+00> : vector<64x128xf32>
    %124 = tpu.matmul %121, %123, %cst_114 {dimension_numbers = #tpu.dot_dimension_numbers<[1], [0], [0], [1], [0, 0, 1, 1], [], []>} : vector<64x128xbf16>, vector<128x128xbf16>, vector<64x128xf32> -> vector<64x128xf32>
    %125 = arith.addf %119, %124 : vector<64x128xf32>
    %126 = vector.broadcast %4 : vector<1x128xf32> to vector<64x128xf32>
    %127 = arith.addf %125, %126 : vector<64x128xf32>
    %cst_115 = arith.constant 0.000000e+00 : f32
    %128 = vector.broadcast %cst_115 : f32 to vector<64x128xf32>
    %129 = arith.maximumf %127, %128 : vector<64x128xf32>
    %c0_116 = arith.constant 0 : index
    %c0_117 = arith.constant 0 : index
    %130 = vector.load %arg17[%c0_116, %c0_117] : memref<64x128xf32, #tpu.memory_space<vmem>>, vector<64x128xf32>
    tpu.vector_store %arg17[%c0_116, %c0_117], %129 {strides = array<i32>} : memref<64x128xf32, #tpu.memory_space<vmem>>, vector<64x128xf32>,
    %c0_118 = arith.constant 0 : index
    %c0_119 = arith.constant 0 : index
    %131 = vector.load %arg17[%c0_118, %c0_119] : memref<64x128xf32, #tpu.memory_space<vmem>>, vector<4x128xf32>
    %cst_120 = arith.constant dense<0xFF800000> : vector<128xf32>
    %132 = vector.multi_reduction <maximumf>, %131, %cst_120 [0] : vector<4x128xf32> to vector<128xf32>
    %133 = vector.shape_cast %132 : vector<128xf32> to vector<1x128xf32>
    %c0_121 = arith.constant 0 : index
    %c0_122 = arith.constant 0 : index
    %134 = vector.load %arg18[%c0_121, %c0_122] : memref<1x2048xf32, #tpu.memory_space<vmem>>, vector<1x128xf32>
    tpu.vector_store %arg18[%c0_121, %c0_122], %133 {strides = array<i32>} : memref<1x2048xf32, #tpu.memory_space<vmem>>, vector<1x128xf32>,
    %c4 = arith.constant 4 : index
    %c0_123 = arith.constant 0 : index
    %135 = vector.load %arg17[%c4, %c0_123] : memref<64x128xf32, #tpu.memory_space<vmem>>, vector<4x128xf32>
    %cst_124 = arith.constant dense<0xFF800000> : vector<128xf32>
    %136 = vector.multi_reduction <maximumf>, %135, %cst_124 [0] : vector<4x128xf32> to vector<128xf32>
    %137 = vector.shape_cast %136 : vector<128xf32> to vector<1x128xf32>
    %c0_125 = arith.constant 0 : index
    %c128_126 = arith.constant 128 : index
    %138 = vector.load %arg18[%c0_125, %c128_126] : memref<1x2048xf32, #tpu.memory_space<vmem>>, vector<1x128xf32>
    tpu.vector_store %arg18[%c0_125, %c128_126], %137 {strides = array<i32>} : memref<1x2048xf32, #tpu.memory_space<vmem>>, vector<1x128xf32>,
    %c8_127 = arith.constant 8 : index
    %c0_128 = arith.constant 0 : index
    %139 = vector.load %arg17[%c8_127, %c0_128] : memref<64x128xf32, #tpu.memory_space<vmem>>, vector<4x128xf32>
    %cst_129 = arith.constant dense<0xFF800000> : vector<128xf32>
    %140 = vector.multi_reduction <maximumf>, %139, %cst_129 [0] : vector<4x128xf32> to vector<128xf32>
    %141 = vector.shape_cast %140 : vector<128xf32> to vector<1x128xf32>
    %c0_130 = arith.constant 0 : index
    %c256_131 = arith.constant 256 : index
    %142 = vector.load %arg18[%c0_130, %c256_131] : memref<1x2048xf32, #tpu.memory_space<vmem>>, vector<1x128xf32>
    tpu.vector_store %arg18[%c0_130, %c256_131], %141 {strides = array<i32>} : memref<1x2048xf32, #tpu.memory_space<vmem>>, vector<1x128xf32>,
    %c12 = arith.constant 12 : index
    %c0_132 = arith.constant 0 : index
    %143 = vector.load %arg17[%c12, %c0_132] : memref<64x128xf32, #tpu.memory_space<vmem>>, vector<4x128xf32>
    %cst_133 = arith.constant dense<0xFF800000> : vector<128xf32>
    %144 = vector.multi_reduction <maximumf>, %143, %cst_133 [0] : vector<4x128xf32> to vector<128xf32>
    %145 = vector.shape_cast %144 : vector<128xf32> to vector<1x128xf32>
    %c0_134 = arith.constant 0 : index
    %c384 = arith.constant 384 : index
    %146 = vector.load %arg18[%c0_134, %c384] : memref<1x2048xf32, #tpu.memory_space<vmem>>, vector<1x128xf32>
    tpu.vector_store %arg18[%c0_134, %c384], %145 {strides = array<i32>} : memref<1x2048xf32, #tpu.memory_space<vmem>>, vector<1x128xf32>,
    %c16 = arith.constant 16 : index
    %c0_135 = arith.constant 0 : index
    %147 = vector.load %arg17[%c16, %c0_135] : memref<64x128xf32, #tpu.memory_space<vmem>>, vector<4x128xf32>
    %cst_136 = arith.constant dense<0xFF800000> : vector<128xf32>
    %148 = vector.multi_reduction <maximumf>, %147, %cst_136 [0] : vector<4x128xf32> to vector<128xf32>
    %149 = vector.shape_cast %148 : vector<128xf32> to vector<1x128xf32>
    %c0_137 = arith.constant 0 : index
    %c512_138 = arith.constant 512 : index
    %150 = vector.load %arg18[%c0_137, %c512_138] : memref<1x2048xf32, #tpu.memory_space<vmem>>, vector<1x128xf32>
    tpu.vector_store %arg18[%c0_137, %c512_138], %149 {strides = array<i32>} : memref<1x2048xf32, #tpu.memory_space<vmem>>, vector<1x128xf32>,
    %c20 = arith.constant 20 : index
    %c0_139 = arith.constant 0 : index
    %151 = vector.load %arg17[%c20, %c0_139] : memref<64x128xf32, #tpu.memory_space<vmem>>, vector<4x128xf32>
    %cst_140 = arith.constant dense<0xFF800000> : vector<128xf32>
    %152 = vector.multi_reduction <maximumf>, %151, %cst_140 [0] : vector<4x128xf32> to vector<128xf32>
    %153 = vector.shape_cast %152 : vector<128xf32> to vector<1x128xf32>
    %c0_141 = arith.constant 0 : index
    %c640 = arith.constant 640 : index
    %154 = vector.load %arg18[%c0_141, %c640] : memref<1x2048xf32, #tpu.memory_space<vmem>>, vector<1x128xf32>
    tpu.vector_store %arg18[%c0_141, %c640], %153 {strides = array<i32>} : memref<1x2048xf32, #tpu.memory_space<vmem>>, vector<1x128xf32>,
    %c24 = arith.constant 24 : index
    %c0_142 = arith.constant 0 : index
    %155 = vector.load %arg17[%c24, %c0_142] : memref<64x128xf32, #tpu.memory_space<vmem>>, vector<4x128xf32>
    %cst_143 = arith.constant dense<0xFF800000> : vector<128xf32>
    %156 = vector.multi_reduction <maximumf>, %155, %cst_143 [0] : vector<4x128xf32> to vector<128xf32>
    %157 = vector.shape_cast %156 : vector<128xf32> to vector<1x128xf32>
    %c0_144 = arith.constant 0 : index
    %c768_145 = arith.constant 768 : index
    %158 = vector.load %arg18[%c0_144, %c768_145] : memref<1x2048xf32, #tpu.memory_space<vmem>>, vector<1x128xf32>
    tpu.vector_store %arg18[%c0_144, %c768_145], %157 {strides = array<i32>} : memref<1x2048xf32, #tpu.memory_space<vmem>>, vector<1x128xf32>,
    %c28 = arith.constant 28 : index
    %c0_146 = arith.constant 0 : index
    %159 = vector.load %arg17[%c28, %c0_146] : memref<64x128xf32, #tpu.memory_space<vmem>>, vector<4x128xf32>
    %cst_147 = arith.constant dense<0xFF800000> : vector<128xf32>
    %160 = vector.multi_reduction <maximumf>, %159, %cst_147 [0] : vector<4x128xf32> to vector<128xf32>
    %161 = vector.shape_cast %160 : vector<128xf32> to vector<1x128xf32>
    %c0_148 = arith.constant 0 : index
    %c896 = arith.constant 896 : index
    %162 = vector.load %arg18[%c0_148, %c896] : memref<1x2048xf32, #tpu.memory_space<vmem>>, vector<1x128xf32>
    tpu.vector_store %arg18[%c0_148, %c896], %161 {strides = array<i32>} : memref<1x2048xf32, #tpu.memory_space<vmem>>, vector<1x128xf32>,
    %c32 = arith.constant 32 : index
    %c0_149 = arith.constant 0 : index
    %163 = vector.load %arg17[%c32, %c0_149] : memref<64x128xf32, #tpu.memory_space<vmem>>, vector<4x128xf32>
    %cst_150 = arith.constant dense<0xFF800000> : vector<128xf32>
    %164 = vector.multi_reduction <maximumf>, %163, %cst_150 [0] : vector<4x128xf32> to vector<128xf32>
    %165 = vector.shape_cast %164 : vector<128xf32> to vector<1x128xf32>
    %c0_151 = arith.constant 0 : index
    %c1024 = arith.constant 1024 : index
    %166 = vector.load %arg18[%c0_151, %c1024] : memref<1x2048xf32, #tpu.memory_space<vmem>>, vector<1x128xf32>
    tpu.vector_store %arg18[%c0_151, %c1024], %165 {strides = array<i32>} : memref<1x2048xf32, #tpu.memory_space<vmem>>, vector<1x128xf32>,
    %c36 = arith.constant 36 : index
    %c0_152 = arith.constant 0 : index
    %167 = vector.load %arg17[%c36, %c0_152] : memref<64x128xf32, #tpu.memory_space<vmem>>, vector<4x128xf32>
    %cst_153 = arith.constant dense<0xFF800000> : vector<128xf32>
    %168 = vector.multi_reduction <maximumf>, %167, %cst_153 [0] : vector<4x128xf32> to vector<128xf32>
    %169 = vector.shape_cast %168 : vector<128xf32> to vector<1x128xf32>
    %c0_154 = arith.constant 0 : index
    %c1152 = arith.constant 1152 : index
    %170 = vector.load %arg18[%c0_154, %c1152] : memref<1x2048xf32, #tpu.memory_space<vmem>>, vector<1x128xf32>
    tpu.vector_store %arg18[%c0_154, %c1152], %169 {strides = array<i32>} : memref<1x2048xf32, #tpu.memory_space<vmem>>, vector<1x128xf32>,
    %c40 = arith.constant 40 : index
    %c0_155 = arith.constant 0 : index
    %171 = vector.load %arg17[%c40, %c0_155] : memref<64x128xf32, #tpu.memory_space<vmem>>, vector<4x128xf32>
    %cst_156 = arith.constant dense<0xFF800000> : vector<128xf32>
    %172 = vector.multi_reduction <maximumf>, %171, %cst_156 [0] : vector<4x128xf32> to vector<128xf32>
    %173 = vector.shape_cast %172 : vector<128xf32> to vector<1x128xf32>
    %c0_157 = arith.constant 0 : index
    %c1280 = arith.constant 1280 : index
    %174 = vector.load %arg18[%c0_157, %c1280] : memref<1x2048xf32, #tpu.memory_space<vmem>>, vector<1x128xf32>
    tpu.vector_store %arg18[%c0_157, %c1280], %173 {strides = array<i32>} : memref<1x2048xf32, #tpu.memory_space<vmem>>, vector<1x128xf32>,
    %c44 = arith.constant 44 : index
    %c0_158 = arith.constant 0 : index
    %175 = vector.load %arg17[%c44, %c0_158] : memref<64x128xf32, #tpu.memory_space<vmem>>, vector<4x128xf32>
    %cst_159 = arith.constant dense<0xFF800000> : vector<128xf32>
    %176 = vector.multi_reduction <maximumf>, %175, %cst_159 [0] : vector<4x128xf32> to vector<128xf32>
    %177 = vector.shape_cast %176 : vector<128xf32> to vector<1x128xf32>
    %c0_160 = arith.constant 0 : index
    %c1408 = arith.constant 1408 : index
    %178 = vector.load %arg18[%c0_160, %c1408] : memref<1x2048xf32, #tpu.memory_space<vmem>>, vector<1x128xf32>
    tpu.vector_store %arg18[%c0_160, %c1408], %177 {strides = array<i32>} : memref<1x2048xf32, #tpu.memory_space<vmem>>, vector<1x128xf32>,
    %c48 = arith.constant 48 : index
    %c0_161 = arith.constant 0 : index
    %179 = vector.load %arg17[%c48, %c0_161] : memref<64x128xf32, #tpu.memory_space<vmem>>, vector<4x128xf32>
    %cst_162 = arith.constant dense<0xFF800000> : vector<128xf32>
    %180 = vector.multi_reduction <maximumf>, %179, %cst_162 [0] : vector<4x128xf32> to vector<128xf32>
    %181 = vector.shape_cast %180 : vector<128xf32> to vector<1x128xf32>
    %c0_163 = arith.constant 0 : index
    %c1536 = arith.constant 1536 : index
    %182 = vector.load %arg18[%c0_163, %c1536] : memref<1x2048xf32, #tpu.memory_space<vmem>>, vector<1x128xf32>
    tpu.vector_store %arg18[%c0_163, %c1536], %181 {strides = array<i32>} : memref<1x2048xf32, #tpu.memory_space<vmem>>, vector<1x128xf32>,
    %c52 = arith.constant 52 : index
    %c0_164 = arith.constant 0 : index
    %183 = vector.load %arg17[%c52, %c0_164] : memref<64x128xf32, #tpu.memory_space<vmem>>, vector<4x128xf32>
    %cst_165 = arith.constant dense<0xFF800000> : vector<128xf32>
    %184 = vector.multi_reduction <maximumf>, %183, %cst_165 [0] : vector<4x128xf32> to vector<128xf32>
    %185 = vector.shape_cast %184 : vector<128xf32> to vector<1x128xf32>
    %c0_166 = arith.constant 0 : index
    %c1664 = arith.constant 1664 : index
    %186 = vector.load %arg18[%c0_166, %c1664] : memref<1x2048xf32, #tpu.memory_space<vmem>>, vector<1x128xf32>
    tpu.vector_store %arg18[%c0_166, %c1664], %185 {strides = array<i32>} : memref<1x2048xf32, #tpu.memory_space<vmem>>, vector<1x128xf32>,
    %c56 = arith.constant 56 : index
    %c0_167 = arith.constant 0 : index
    %187 = vector.load %arg17[%c56, %c0_167] : memref<64x128xf32, #tpu.memory_space<vmem>>, vector<4x128xf32>
    %cst_168 = arith.constant dense<0xFF800000> : vector<128xf32>
    %188 = vector.multi_reduction <maximumf>, %187, %cst_168 [0] : vector<4x128xf32> to vector<128xf32>
    %189 = vector.shape_cast %188 : vector<128xf32> to vector<1x128xf32>
    %c0_169 = arith.constant 0 : index
    %c1792 = arith.constant 1792 : index
    %190 = vector.load %arg18[%c0_169, %c1792] : memref<1x2048xf32, #tpu.memory_space<vmem>>, vector<1x128xf32>
    tpu.vector_store %arg18[%c0_169, %c1792], %189 {strides = array<i32>} : memref<1x2048xf32, #tpu.memory_space<vmem>>, vector<1x128xf32>,
    %c60 = arith.constant 60 : index
    %c0_170 = arith.constant 0 : index
    %191 = vector.load %arg17[%c60, %c0_170] : memref<64x128xf32, #tpu.memory_space<vmem>>, vector<4x128xf32>
    %cst_171 = arith.constant dense<0xFF800000> : vector<128xf32>
    %192 = vector.multi_reduction <maximumf>, %191, %cst_171 [0] : vector<4x128xf32> to vector<128xf32>
    %193 = vector.shape_cast %192 : vector<128xf32> to vector<1x128xf32>
    %c0_172 = arith.constant 0 : index
    %c1920 = arith.constant 1920 : index
    %194 = vector.load %arg18[%c0_172, %c1920] : memref<1x2048xf32, #tpu.memory_space<vmem>>, vector<1x128xf32>
    tpu.vector_store %arg18[%c0_172, %c1920], %193 {strides = array<i32>} : memref<1x2048xf32, #tpu.memory_space<vmem>>, vector<1x128xf32>,
    %c0_173 = arith.constant 0 : index
    %c0_174 = arith.constant 0 : index
    %195 = vector.load %arg18[%c0_173, %c0_174] : memref<1x2048xf32, #tpu.memory_space<vmem>>, vector<1x2048xf32>
    %196 = arith.truncf %195 : vector<1x2048xf32> to vector<1x2048xbf16>
    %c0_175 = arith.constant 0 : index
    %c0_176 = arith.constant 0 : index
    %197 = vector.load %arg8[%c0_175, %c0_176] : memref<2048x128xbf16, #tpu.memory_space<vmem>>, vector<2048x128xbf16>
    %cst_177 = arith.constant dense<0.000000e+00> : vector<1x128xf32>
    %198 = tpu.matmul %196, %197, %cst_177 {dimension_numbers = #tpu.dot_dimension_numbers<[1], [0], [0], [1], [0, 0, 1, 1], [], []>} : vector<1x2048xbf16>, vector<2048x128xbf16>, vector<1x128xf32> -> vector<1x128xf32>
    %c0_178 = arith.constant 0 : index
    %c0_179 = arith.constant 0 : index
    %199 = vector.load %arg9[%c0_178, %c0_179] : memref<1x128xf32, #tpu.memory_space<vmem>>, vector<1x128xf32>
    %200 = arith.addf %198, %199 : vector<1x128xf32>
    %201 = arith.truncf %200 : vector<1x128xf32> to vector<1x128xbf16>
    %c0_180 = arith.constant 0 : index
    %c0_181 = arith.constant 0 : index
    %202 = vector.load %arg10[%c0_180, %c0_181] : memref<128x128xbf16, #tpu.memory_space<vmem>>, vector<128x128xbf16>
    %cst_182 = arith.constant dense<0.000000e+00> : vector<1x128xf32>
    %203 = tpu.matmul %201, %202, %cst_182 {dimension_numbers = #tpu.dot_dimension_numbers<[1], [0], [0], [1], [0, 0, 1, 1], [], []>} : vector<1x128xbf16>, vector<128x128xbf16>, vector<1x128xf32> -> vector<1x128xf32>
    %c0_183 = arith.constant 0 : index
    %c0_184 = arith.constant 0 : index
    %204 = vector.load %arg11[%c0_183, %c0_184] : memref<1x128xf32, #tpu.memory_space<vmem>>, vector<1x128xf32>
    %205 = arith.addf %203, %204 : vector<1x128xf32>
    %c0_185 = arith.constant 0 : index
    %c0_186 = arith.constant 0 : index
    %c0_187 = arith.constant 0 : index
    %206 = vector.load %arg12[%c0_185, %c0_186, %c0_187] : memref<1x1x128xf32, #tpu.memory_space<vmem>>, vector<1x1x128xf32>
    %207 = vector.shape_cast %206 : vector<1x1x128xf32> to vector<1x128xf32>
    %208 = vector.shape_cast %205 : vector<1x128xf32> to vector<1x1x128xf32>
    tpu.vector_store %arg12[%c0_185, %c0_186, %c0_187], %208 {strides = array<i32>} : memref<1x1x128xf32, #tpu.memory_space<vmem>>, vector<1x1x128xf32>,
    return
  }
  func.func @transform_0(%arg0: i32) -> (i32, i32, i32) {
    %c0_i32 = arith.constant 0 : i32
    %c0_i32_0 = arith.constant 0 : i32
    %c0_i32_1 = arith.constant 0 : i32
    return %arg0, %c0_i32, %c0_i32_0 : i32, i32, i32
  }
  func.func @transform_1(%arg0: i32) -> (i32, i32) {
    %c0_i32 = arith.constant 0 : i32
    %c0_i32_0 = arith.constant 0 : i32
    %c0_i32_1 = arith.constant 0 : i32
    return %c0_i32, %c0_i32_0 : i32, i32
  }
  func.func @transform_2(%arg0: i32) -> (i32, i32) {
    %c0_i32 = arith.constant 0 : i32
    %c0_i32_0 = arith.constant 0 : i32
    %c0_i32_1 = arith.constant 0 : i32
    return %c0_i32, %c0_i32_0 : i32, i32
  }
  func.func @transform_3(%arg0: i32) -> (i32, i32, i32) {
    %c0_i32 = arith.constant 0 : i32
    %c0_i32_0 = arith.constant 0 : i32
    %c0_i32_1 = arith.constant 0 : i32
    %c0_i32_2 = arith.constant 0 : i32
    return %c0_i32, %c0_i32_0, %c0_i32_1 : i32, i32, i32
  }
  func.func @transform_4(%arg0: i32) -> (i32, i32) {
    %c0_i32 = arith.constant 0 : i32
    %c0_i32_0 = arith.constant 0 : i32
    %c0_i32_1 = arith.constant 0 : i32
    return %c0_i32, %c0_i32_0 : i32, i32
  }
  func.func @transform_5(%arg0: i32) -> (i32, i32, i32) {
    %c0_i32 = arith.constant 0 : i32
    %c0_i32_0 = arith.constant 0 : i32
    %c0_i32_1 = arith.constant 0 : i32
    %c0_i32_2 = arith.constant 0 : i32
    return %c0_i32, %c0_i32_0, %c0_i32_1 : i32, i32, i32
  }
  func.func @transform_6(%arg0: i32) -> (i32, i32) {
    %c0_i32 = arith.constant 0 : i32
    %c0_i32_0 = arith.constant 0 : i32
    %c0_i32_1 = arith.constant 0 : i32
    return %c0_i32, %c0_i32_0 : i32, i32
  }
  func.func @transform_7(%arg0: i32) -> (i32, i32) {
    %c0_i32 = arith.constant 0 : i32
    %c0_i32_0 = arith.constant 0 : i32
    %c0_i32_1 = arith.constant 0 : i32
    return %c0_i32, %c0_i32_0 : i32, i32
  }
  func.func @transform_8(%arg0: i32) -> (i32, i32) {
    %c0_i32 = arith.constant 0 : i32
    %c0_i32_0 = arith.constant 0 : i32
    %c0_i32_1 = arith.constant 0 : i32
    return %c0_i32, %c0_i32_0 : i32, i32
  }
  func.func @transform_9(%arg0: i32) -> (i32, i32) {
    %c0_i32 = arith.constant 0 : i32
    %c0_i32_0 = arith.constant 0 : i32
    %c0_i32_1 = arith.constant 0 : i32
    return %c0_i32, %c0_i32_0 : i32, i32
  }
  func.func @transform_10(%arg0: i32) -> (i32, i32) {
    %c0_i32 = arith.constant 0 : i32
    %c0_i32_0 = arith.constant 0 : i32
    %c0_i32_1 = arith.constant 0 : i32
    return %c0_i32, %c0_i32_0 : i32, i32
  }
  func.func @transform_11(%arg0: i32) -> (i32, i32, i32) {
    %c0_i32 = arith.constant 0 : i32
    %c0_i32_0 = arith.constant 0 : i32
    %c0_i32_1 = arith.constant 0 : i32
    return %arg0, %c0_i32, %c0_i32_0 : i32, i32, i32
  }
}

</mosaic_0001>

<bundles_post_ra>
// kernel: net_forward.1
= control target key start
LH: loop header
LB: loop body
LE: loop exit
PB: predicated region body
PF: predicated region fallthrough
CT: control target
= control target key end

     0   :  { %s7529_s17 = smov 0   ;;  %s8746_s0 = inlined_call_operand.vmem [shape: bf16[2,1024,128], index: 0, kind: input, shape index: {}]   ;;  %s8747_s1 = inlined_call_operand.vmem [shape: bf16[128,128], index: 1, kind: input, shape index: {}]   ;;  %s8748_s2 = inlined_call_operand.vmem [shape: f32[1,128], index: 2, kind: input, shape index: {}]   ;;  %s8749_s3 = inlined_call_operand.vmem [shape: bf16[3,128,128], index: 3, kind: input, shape index: {}]   ;;  %s8750_s4 = inlined_call_operand.vmem [shape: f32[1,128], index: 4, kind: input, shape index: {}]   ;;  %s8751_s5 = inlined_call_operand.vmem [shape: bf16[3,128,128], index: 5, kind: input, shape index: {}]   ;;  %s8752_s6 = inlined_call_operand.vmem [shape: f32[1,128], index: 6, kind: input, shape index: {}]   ;;  %s8753_s7 = inlined_call_operand.vmem [shape: bf16[2048,128], index: 7, kind: input, shape index: {}]   ;;  %s8754_s8 = inlined_call_operand.vmem [shape: f32[1,128], index: 8, kind: input, shape index: {}]   ;;  %s8755_s9 = inlined_call_operand.vmem [shape: bf16[128,128], index: 9, kind: input, shape index: {}]   ;;  %s8756_s10 = inlined_call_operand.vmem [shape: f32[1,128], index: 10, kind: input, shape index: {}]   ;;  %s8757_s11 = inlined_call_operand.vmem [shape: f32[2,1,128], index: 11, kind: output, shape index: {}]  }
   0x1 LB: > { %s5808_s18 = sadd.s32 4294967295, %s7465_s17   ;;  %p5812_p0 = scmp.ge.s32.totalorder %s7465_s17, 1  ;;  %s7465_s17 = sphi %s7529_s17, %s21_s17  }
   0x2   : > { %p337_p1 = scmp.lt.s32.totalorder %s7465_s17, 3 }
   0x4   : > { %p338_p2 = pnand %p5812_p0, %p337_p1 }
   0x5   : > { %v7176_v0 = vld [vmem:[%s8747_s1] sm:$0xff] (!%p338_p2)   ;;  %p375_p3 = scmp.lt.s32.totalorder (!%p338_p2), %s5808_s18, 1  ;;  %v7543_v1 = vld [vmem:[%s8747_s1 + $0x8] sm:$0xff] (!%p338_p2)   ;;  %v7552_v2 = vld [vmem:[%s8747_s1 + $0x10] sm:$0xff] (!%p338_p2)   ;;  %vm4061_vm0 = vcmask (!%p338_p2), 1043456   ;;  %vm7468_vm2 = vmmov (!%p338_p2), 0  }
   0x6   : > { %341 = sbr.rel (%p338_p2) target bundleno = 1572 (0x624), region = 64  ;;  %6610 = vmatprep.subr.bf16.mxu0 (!%p338_p2), %v7176_v0  ;;  %6658 = vmatprep.subr.bf16.mxu1 (!%p338_p2), %v7176_v0  ;;  %v7565_v3 = vld [vmem:[%s8747_s1 + $0x18] sm:$0xff] (!%p338_p2)   ;;  %v7578_v6 = vld [vmem:[%s8747_s1 + $0x20] sm:$0xff] (!%p338_p2)   ;;  %v7587_v7 = vld [vmem:[%s8747_s1 + $0x28] sm:$0xff] (!%p338_p2)  }
   0x7   : > { %6611 = vmatpush3.bf16.msra.mxu0 (!%p338_p2), %v7176_v0  ;;  %6659 = vmatpush3.bf16.msra.mxu1 (!%p338_p2), %v7176_v0  ;;  %v7596_v8 = vld [vmem:[%s8747_s1 + $0x30] sm:$0xff] (!%p338_p2)   ;;  %v7605_v9 = vld [vmem:[%s8747_s1 + $0x38] sm:$0xff] (!%p338_p2)  }
   0x8   : > { %6612 = vmatprep.subr.bf16.mxu0 (!%p338_p2), %v7543_v1  ;;  %6660 = vmatprep.subr.bf16.mxu1 (!%p338_p2), %v7543_v1 }
   0xb   : > { %6613 = vmatpush3.bf16.msra.mxu0 (!%p338_p2), %v7543_v1  ;;  %6661 = vmatpush3.bf16.msra.mxu1 (!%p338_p2), %v7543_v1 }
   0xc   : > { %6614 = vmatprep.subr.bf16.mxu0 (!%p338_p2), %v7552_v2  ;;  %6662 = vmatprep.subr.bf16.mxu1 (!%p338_p2), %v7552_v2 }
   0xd   : > { %s8761_s18 = smov (!%p375_p3, %s5808_s18), 1 }
   0xe   : > { %s6196_s25 = sshll.u32 %s8761_s18, 9  ;;  %s382_s30 = scalar_lea.vmem %s8757_s11, %s8761_s18 }
   0xf   : > { %s7558_s28 = scalar_lea.vmem %s8746_s0, %s6196_s25  ;;  %6615 = vmatpush3.bf16.msra.mxu0 %v7552_v2  ;;  %6663 = vmatpush3.bf16.msra.mxu1 %v7552_v2 }
  0x10   : > { %v7184_v4 = vld [vmem:[%s7558_s28] sm:$0xff]   ;;  %6616 = vmatprep.subr.bf16.mxu0 %v7565_v3  ;;  %6664 = vmatprep.subr.bf16.mxu1 %v7565_v3  ;;  %v7186_v10 = vld [vmem:[%s7558_s28 + $0x8] sm:$0xff]   ;;  %v7188_v12 = vld [vmem:[%s7558_s28 + $0x10] sm:$0xff]  }
  0x11   : > { %v7185_v5 = vld [vmem:[%s7558_s28 + $0x80] sm:$0xff]   ;;  %6626 = vmatprep.mubr.bf16.mxu0 %v7184_v4  ;;  %v7187_v11 = vld [vmem:[%s7558_s28 + $0x88] sm:$0xff]   ;;  %v7189_v13 = vld [vmem:[%s7558_s28 + $0x90] sm:$0xff]  }
  0x12   : > { %6674 = vmatprep.mubr.bf16.mxu1 %v7185_v5  ;;  %v7190_v14 = vld [vmem:[%s7558_s28 + $0x18] sm:$0xff]   ;;  %v7192_v16 = vld [vmem:[%s7558_s28 + $0x20] sm:$0xff]   ;;  %v7194_v18 = vld [vmem:[%s7558_s28 + $0x28] sm:$0xff]  }
  0x13   : > { %6617 = vmatpush3.bf16.msra.mxu0 %v7565_v3  ;;  %6665 = vmatpush3.bf16.msra.mxu1 %v7565_v3  ;;  %v7191_v15 = vld [vmem:[%s7558_s28 + $0x98] sm:$0xff]   ;;  %v7193_v17 = vld [vmem:[%s7558_s28 + $0xa0] sm:$0xff]   ;;  %v7195_v19 = vld [vmem:[%s7558_s28 + $0xa8] sm:$0xff]  }
  0x14   : > { %6618 = vmatprep.subr.bf16.mxu0 %v7578_v6  ;;  %6666 = vmatprep.subr.bf16.mxu1 %v7578_v6  ;;  %v7196_v20 = vld [vmem:[%s7558_s28 + $0x30] sm:$0xff]   ;;  %v7198_v22 = vld [vmem:[%s7558_s28 + $0x38] sm:$0xff]   ;;  %v7200_v24 = vld [vmem:[%s7558_s28 + $0x40] sm:$0xff]  }
  0x15   : > { %v7197_v21 = vld [vmem:[%s7558_s28 + $0xb0] sm:$0xff]   ;;  %v7199_v23 = vld [vmem:[%s7558_s28 + $0xb8] sm:$0xff]   ;;  %v7201_v25 = vld [vmem:[%s7558_s28 + $0xc0] sm:$0xff]  }
  0x16   : > { %v7202_v26 = vld [vmem:[%s7558_s28 + $0x48] sm:$0xff]   ;;  %v7204_v28 = vld [vmem:[%s7558_s28 + $0x50] sm:$0xff]   ;;  %v7206_v30 = vld [vmem:[%s7558_s28 + $0x58] sm:$0xff]  }
  0x17   : > { %6619 = vmatpush3.bf16.msra.mxu0 %v7578_v6  ;;  %6667 = vmatpush3.bf16.msra.mxu1 %v7578_v6  ;;  %v7203_v27 = vld [vmem:[%s7558_s28 + $0xc8] sm:$0xff]   ;;  %v7205_v29 = vld [vmem:[%s7558_s28 + $0xd0] sm:$0xff]   ;;  %v7207_v31 = vld [vmem:[%s7558_s28 + $0xd8] sm:$0xff]  }
  0x18   : > { %6620 = vmatprep.subr.bf16.mxu0 %v7587_v7  ;;  %6668 = vmatprep.subr.bf16.mxu1 %v7587_v7  ;;  %v7208_v32 = vld [vmem:[%s7558_s28 + $0x60] sm:$0xff]   ;;  %v7210_v34 = vld [vmem:[%s7558_s28 + $0x68] sm:$0xff]   ;;  %v7212_v36 = vld [vmem:[%s7558_s28 + $0x70] sm:$0xff]  }
  0x19   : > { %v7209_v33 = vld [vmem:[%s7558_s28 + $0xe0] sm:$0xff]   ;;  %v7211_v35 = vld [vmem:[%s7558_s28 + $0xe8] sm:$0xff]   ;;  %v7213_v37 = vld [vmem:[%s7558_s28 + $0xf0] sm:$0xff]  }
  0x1a   : > { %v7214_v38 = vld [vmem:[%s7558_s28 + $0x78] sm:$0xff]   ;;  %v7216_v40 = vld [vmem:[%s7558_s28 + $0x100] sm:$0xff]   ;;  %v7218_v42 = vld [vmem:[%s7558_s28 + $0x108] sm:$0xff]  }
  0x1b   : > { %6621 = vmatpush3.bf16.msra.mxu0 %v7587_v7  ;;  %6669 = vmatpush3.bf16.msra.mxu1 %v7587_v7  ;;  %v7215_v39 = vld [vmem:[%s7558_s28 + $0xf8] sm:$0xff]   ;;  %v7217_v41 = vld [vmem:[%s7558_s28 + $0x180] sm:$0xff]   ;;  %v7219_v43 = vld [vmem:[%s7558_s28 + $0x188] sm:$0xff]  }
  0x1c   : > { %6622 = vmatprep.subr.bf16.mxu0 %v7596_v8  ;;  %6670 = vmatprep.subr.bf16.mxu1 %v7596_v8  ;;  %v7220_v44 = vld [vmem:[%s7558_s28 + $0x110] sm:$0xff]   ;;  %v7222_v46 = vld [vmem:[%s7558_s28 + $0x118] sm:$0xff]   ;;  %v7224_v48 = vld [vmem:[%s7558_s28 + $0x120] sm:$0xff]  }
  0x1d   : > { %v7221_v45 = vld [vmem:[%s7558_s28 + $0x190] sm:$0xff]   ;;  %v7223_v47 = vld [vmem:[%s7558_s28 + $0x198] sm:$0xff]   ;;  %v7225_v49 = vld [vmem:[%s7558_s28 + $0x1a0] sm:$0xff]  }
  0x1e   : > { %v7226_v50 = vld [vmem:[%s7558_s28 + $0x128] sm:$0xff]   ;;  %v7228_v52 = vld [vmem:[%s7558_s28 + $0x130] sm:$0xff]   ;;  %v7230_v54 = vld [vmem:[%s7558_s28 + $0x138] sm:$0xff]  }
  0x1f   : > { %6623 = vmatpush3.bf16.msra.mxu0 %v7596_v8  ;;  %6671 = vmatpush3.bf16.msra.mxu1 %v7596_v8  ;;  %v7227_v51 = vld [vmem:[%s7558_s28 + $0x1a8] sm:$0xff]   ;;  %v7229_v53 = vld [vmem:[%s7558_s28 + $0x1b0] sm:$0xff]   ;;  %v7231_v55 = vld [vmem:[%s7558_s28 + $0x1b8] sm:$0xff]  }
  0x20   : > { %6624 = vmatprep.subr.bf16.mxu0 %v7605_v9  ;;  %6672 = vmatprep.subr.bf16.mxu1 %v7605_v9  ;;  %v7232_v56 = vld [vmem:[%s7558_s28 + $0x140] sm:$0xff]   ;;  %v7234_v58 = vld [vmem:[%s7558_s28 + $0x148] sm:$0xff]   ;;  %v7236_v60 = vld [vmem:[%s7558_s28 + $0x150] sm:$0xff]  }
  0x21   : > { %v7233_v57 = vld [vmem:[%s7558_s28 + $0x1c0] sm:$0xff]   ;;  %v7235_v59 = vld [vmem:[%s7558_s28 + $0x1c8] sm:$0xff]   ;;  %v7237_v61 = vld [vmem:[%s7558_s28 + $0x1d0] sm:$0xff]  }
  0x22   : > { %v7238_v62 = vld [vmem:[%s7558_s28 + $0x158] sm:$0xff]   ;;  %v7242_v4 = vld [vmem:[%s7558_s28 + $0x168] sm:$0xff]  }
  0x23   : > { %6625 = vmatpush3.bf16.msra.mxu0 %v7605_v9  ;;  %6673 = vmatpush3.bf16.msra.mxu1 %v7605_v9  ;;  %v7239_v63 = vld [vmem:[%s7558_s28 + $0x1d8] sm:$0xff]   ;;  %v7243_v5 = vld [vmem:[%s7558_s28 + $0x1e8] sm:$0xff]  }
  0x24   : > { %6706 = vmatprep.subr.bf16.mxu0 %v7176_v0  ;;  %6754 = vmatprep.subr.bf16.mxu1 %v7176_v0 }
  0x26   : > { %6627 = vmatmul.mubr.bf16.vlgmr.msra.gmra.mrb[0].mxu0 %v7186_v10  ;;  %6675 = vmatmul.mubr.bf16.vlgmr.msra.gmra.mrb[0].mxu1 %v7187_v11  ;;  %v7246_v10 = vld [vmem:[%s7558_s28 + $0x178] sm:$0xff]  }
  0x27   : > { %6707 = vmatpush3.bf16.msra.mxu0 %v7176_v0  ;;  %6630 = vmatprep.mubr.bf16.mxu0 %v7188_v12  ;;  %v7247_v11 = vld [vmem:[%s7558_s28 + $0x1f8] sm:$0xff]  }
  0x28   : > { %6678 = vmatprep.mubr.bf16.mxu1 %v7189_v13  ;;  %6708 = vmatprep.subr.bf16.mxu0 %v7543_v1  ;;  %v7251_v12 = vld [vmem:[%s8749_s3 + $0x58] sm:$0xff]   ;;  %v7252_v13 = vld [vmem:[%s8749_s3 + $0x60] sm:$0xff]  }
  0x29   : > { %6755 = vmatpush3.bf16.msra.mxu1 %v7176_v0  ;;  %v7240_v0 = vld [vmem:[%s7558_s28 + $0x160] sm:$0xff]  }
  0x2a   : > { %6756 = vmatprep.subr.bf16.mxu1 %v7543_v1 }
  0x2b   : > { %6709 = vmatpush3.bf16.msra.mxu0 %v7543_v1 }
  0x2c   : > { %6710 = vmatprep.subr.bf16.mxu0 %v7552_v2 }
  0x2d   : > { %6757 = vmatpush3.bf16.msra.mxu1 %v7543_v1  ;;  %v7241_v1 = vld [vmem:[%s7558_s28 + $0x1e0] sm:$0xff]  }
  0x2e   : > { %6631 = vmatmul.mubr.bf16.gmra.mrb[4].mxu0 %v7190_v14  ;;  %6679 = vmatmul.mubr.bf16.gmra.mrb[4].mxu1 %v7191_v15  ;;  %v7253_v14 = vld [vmem:[%s8749_s3 + $0x68] sm:$0xff]   ;;  %v7254_v15 = vld [vmem:[%s8749_s3 + $0x70] sm:$0xff]  }
  0x2f   : > { %6634 = vmatprep.mubr.bf16.mxu0 %v7192_v16  ;;  %6682 = vmatprep.mubr.bf16.mxu1 %v7193_v17  ;;  %v7255_v16 = vld [vmem:[%s8749_s3 + $0x78] sm:$0xff]   ;;  %v7730_v17 = vld [vmem:[%s8749_s3] sm:$0xff]  }
  0x30   : > { %6711 = vmatpush3.bf16.msra.mxu0 %v7552_v2  ;;  %6758 = vmatprep.subr.bf16.mxu1 %v7552_v2 }
  0x31   : > { %6712 = vmatprep.subr.bf16.mxu0 %v7565_v3  ;;  %6759 = vmatpush3.bf16.msra.mxu1 %v7552_v2  ;;  %v7248_v2 = vld [vmem:[%s8749_s3 + $0x40] sm:$0xff]  }
  0x32   : > { %6760 = vmatprep.subr.bf16.mxu1 %v7565_v3 }
  0x34   : > { %6713 = vmatpush3.bf16.msra.mxu0 %v7565_v3 }
  0x35   : > { %6714 = vmatprep.subr.bf16.mxu0 %v7578_v6  ;;  %6761 = vmatpush3.bf16.msra.mxu1 %v7565_v3  ;;  %v7249_v3 = vld [vmem:[%s8749_s3 + $0x48] sm:$0xff]  }
  0x36   : > { %6635 = vmatmul.mubr.bf16.gmra.mrb[8].mxu0 %v7194_v18  ;;  %6683 = vmatmul.mubr.bf16.gmra.mrb[8].mxu1 %v7195_v19  ;;  %v7257_v18 = vld [vmem:[%s8749_s3 + $0x40] sm:$0xff]   ;;  %v7260_v19 = vld [vmem:[%s8749_s3 + $0x48] sm:$0xff]  }
  0x37   : > { %6638 = vmatprep.mubr.bf16.mxu0 %v7196_v20  ;;  %6686 = vmatprep.mubr.bf16.mxu1 %v7197_v21  ;;  %v7263_v20 = vld [vmem:[%s8749_s3 + $0x50] sm:$0xff]   ;;  %v7265_v21 = vld [vmem:[%s8749_s3 + $0x58] sm:$0xff]  }
  0x38   : > { %6715 = vmatpush3.bf16.msra.mxu0 %v7578_v6  ;;  %6762 = vmatprep.subr.bf16.mxu1 %v7578_v6 }
  0x39   : > { %6716 = vmatprep.subr.bf16.mxu0 %v7587_v7  ;;  %6763 = vmatpush3.bf16.msra.mxu1 %v7578_v6  ;;  %v7244_v6 = vld [vmem:[%s7558_s28 + $0x170] sm:$0xff]  }
  0x3a   : > { %6764 = vmatprep.subr.bf16.mxu1 %v7587_v7 }
  0x3c   : > { %6717 = vmatpush3.bf16.msra.mxu0 %v7587_v7 }
  0x3d   : > { %6718 = vmatprep.subr.bf16.mxu0 %v7596_v8  ;;  %6765 = vmatpush3.bf16.msra.mxu1 %v7587_v7  ;;  %v7245_v7 = vld [vmem:[%s7558_s28 + $0x1f0] sm:$0xff]  }
  0x3e   : > { %6639 = vmatmul.mubr.bf16.gmra.mrb[12].mxu0 %v7198_v22  ;;  %6687 = vmatmul.mubr.bf16.gmra.mrb[12].mxu1 %v7199_v23  ;;  %v7267_v22 = vld [vmem:[%s8749_s3 + $0x60] sm:$0xff]   ;;  %v7269_v23 = vld [vmem:[%s8749_s3 + $0x68] sm:$0xff]  }
  0x3f   : > { %6642 = vmatprep.mubr.bf16.mxu0 %v7200_v24  ;;  %6690 = vmatprep.mubr.bf16.mxu1 %v7201_v25  ;;  %v7271_v24 = vld [vmem:[%s8749_s3 + $0x70] sm:$0xff]   ;;  %v7273_v25 = vld [vmem:[%s8749_s3 + $0x78] sm:$0xff]  }
  0x40   : > { %6719 = vmatpush3.bf16.msra.mxu0 %v7596_v8  ;;  %6766 = vmatprep.subr.bf16.mxu1 %v7596_v8 }
  0x41   : > { %6720 = vmatprep.subr.bf16.mxu0 %v7605_v9  ;;  %6767 = vmatpush3.bf16.msra.mxu1 %v7596_v8  ;;  %v7250_v8 = vld [vmem:[%s8749_s3 + $0x50] sm:$0xff]  }
  0x42   : > { %6768 = vmatprep.subr.bf16.mxu1 %v7605_v9 }
  0x44   : > { %6721 = vmatpush3.bf16.msra.mxu0 %v7605_v9 }
  0x45   : > { %6769 = vmatpush3.bf16.msra.mxu1 %v7605_v9  ;;  %6802 = vmatprep.subr.bf16.mxu0 %v7248_v2  ;;  %v7467_v9 = vmov 0.0  }
  0x46   : > { %6643 = vmatmul.mubr.bf16.gmra.mrb[16].mxu0 %v7202_v26  ;;  %6691 = vmatmul.mubr.bf16.gmra.mrb[16].mxu1 %v7203_v27  ;;  %1869 = vst [vmem:[#allocation3] sm:$0xff] %v7467_v9  ;;  %1870 = vst [vmem:[#allocation3 + $0x108] sm:$0xff] %v7467_v9  ;;  %v7760_v26 = vld [vmem:[%s8748_s2] ss:$0 sm:$0xff] }
  0x47   : > { %6646 = vmatprep.mubr.bf16.mxu0 %v7204_v28  ;;  %6694 = vmatprep.mubr.bf16.mxu1 %v7205_v29  ;;  %3500 = vst [vmem:[#allocation5] sm:$0xff] %v7467_v9  ;;  %3501 = vst [vmem:[#allocation5 + $0x48] sm:$0xff] %v7467_v9 }
  0x48   : > { %6898 = vmatprep.subr.bf16.mxu1 %v7257_v18 }
  0x4e   : > { %6647 = vmatmul.mubr.bf16.gmra.mrb[20].mxu0 %v7206_v30  ;;  %6695 = vmatmul.mubr.bf16.gmra.mrb[20].mxu1 %v7207_v31 }
  0x4f   : > { %6650 = vmatprep.mubr.bf16.mxu0 %v7208_v32  ;;  %6698 = vmatprep.mubr.bf16.mxu1 %v7209_v33 }
  0x56   : > { %6651 = vmatmul.mubr.bf16.gmra.mrb[24].mxu0 %v7210_v34  ;;  %6699 = vmatmul.mubr.bf16.gmra.mrb[24].mxu1 %v7211_v35 }
  0x57   : > { %6654 = vmatprep.mubr.bf16.mxu0 %v7212_v36  ;;  %6702 = vmatprep.mubr.bf16.mxu1 %v7213_v37 }
  0x5e   : > { %6655 = vmatmul.mubr.bf16.gmra.mrb[28].mxu0 %v7214_v38  ;;  %6703 = vmatmul.mubr.bf16.gmra.mrb[28].mxu1 %v7215_v39 }
  0x5f   : > { %6722 = vmatprep.mubr.bf16.mxu0 %v7216_v40  ;;  %6770 = vmatprep.mubr.bf16.mxu1 %v7217_v41 }
  0x66   : > { %6723 = vmatmul.mubr.bf16.vlgmr.msra.gmra.mrb[32].mxu0 %v7218_v42  ;;  %6771 = vmatmul.mubr.bf16.vlgmr.msra.gmra.mrb[32].mxu1 %v7219_v43 }
  0x67   : > { %6726 = vmatprep.mubr.bf16.mxu0 %v7220_v44  ;;  %6774 = vmatprep.mubr.bf16.mxu1 %v7221_v45 }
  0x68   : > { %6803 = vmatpush3.bf16.msra.mxu0 %v7248_v2  ;;  %6899 = vmatpush3.bf16.msra.mxu1 %v7257_v18 }
  0x69   : > { %6804 = vmatprep.subr.bf16.mxu0 %v7249_v3  ;;  %6900 = vmatprep.subr.bf16.mxu1 %v7260_v19 }
  0x6c   : > { %6805 = vmatpush3.bf16.msra.mxu0 %v7249_v3  ;;  %6901 = vmatpush3.bf16.msra.mxu1 %v7260_v19 }
  0x6d   : > { %6806 = vmatprep.subr.bf16.mxu0 %v7250_v8  ;;  %6902 = vmatprep.subr.bf16.mxu1 %v7263_v20 }
  0x6e   : > { %6727 = vmatmul.mubr.bf16.gmra.mrb[36].mxu0 %v7222_v46  ;;  %6775 = vmatmul.mubr.bf16.gmra.mrb[36].mxu1 %v7223_v47 }
  0x6f   : > { %6730 = vmatprep.mubr.bf16.mxu0 %v7224_v48  ;;  %6778 = vmatprep.mubr.bf16.mxu1 %v7225_v49 }
  0x70   : > { %6807 = vmatpush3.bf16.msra.mxu0 %v7250_v8  ;;  %6903 = vmatpush3.bf16.msra.mxu1 %v7263_v20 }
  0x71   : > { %6808 = vmatprep.subr.bf16.mxu0 %v7251_v12  ;;  %6904 = vmatprep.subr.bf16.mxu1 %v7265_v21 }
  0x74   : > { %6809 = vmatpush3.bf16.msra.mxu0 %v7251_v12  ;;  %6905 = vmatpush3.bf16.msra.mxu1 %v7265_v21 }
  0x75   : > { %6810 = vmatprep.subr.bf16.mxu0 %v7252_v13  ;;  %6906 = vmatprep.subr.bf16.mxu1 %v7267_v22 }
  0x76   : > { %6731 = vmatmul.mubr.bf16.gmra.mrb[40].mxu0 %v7226_v50  ;;  %6779 = vmatmul.mubr.bf16.gmra.mrb[40].mxu1 %v7227_v51 }
  0x77   : > { %6734 = vmatprep.mubr.bf16.mxu0 %v7228_v52  ;;  %6782 = vmatprep.mubr.bf16.mxu1 %v7229_v53 }
  0x78   : > { %6811 = vmatpush3.bf16.msra.mxu0 %v7252_v13  ;;  %6907 = vmatpush3.bf16.msra.mxu1 %v7267_v22 }
  0x79   : > { %6812 = vmatprep.subr.bf16.mxu0 %v7253_v14  ;;  %6908 = vmatprep.subr.bf16.mxu1 %v7269_v23 }
  0x7c   : > { %6813 = vmatpush3.bf16.msra.mxu0 %v7253_v14  ;;  %6909 = vmatpush3.bf16.msra.mxu1 %v7269_v23 }
  0x7d   : > { %6814 = vmatprep.subr.bf16.mxu0 %v7254_v15  ;;  %6910 = vmatprep.subr.bf16.mxu1 %v7271_v24 }
  0x7e   : > { %6735 = vmatmul.mubr.bf16.gmra.mrb[44].mxu0 %v7230_v54  ;;  %6783 = vmatmul.mubr.bf16.gmra.mrb[44].mxu1 %v7231_v55 }
  0x7f   : > { %6738 = vmatprep.mubr.bf16.mxu0 %v7232_v56  ;;  %6786 = vmatprep.mubr.bf16.mxu1 %v7233_v57 }
  0x80   : > { %6815 = vmatpush3.bf16.msra.mxu0 %v7254_v15  ;;  %6911 = vmatpush3.bf16.msra.mxu1 %v7271_v24 }
  0x81   : > { %6816 = vmatprep.subr.bf16.mxu0 %v7255_v16  ;;  %6912 = vmatprep.subr.bf16.mxu1 %v7273_v25 }
  0x84   : > { %6817 = vmatpush3.bf16.msra.mxu0 %v7255_v16  ;;  %6913 = vmatpush3.bf16.msra.mxu1 %v7273_v25 }
  0x85   : > { %6834 = vmatprep.subr.bf16.mxu0 %v7730_v17 }
  0x86   : > { %6739 = vmatmul.mubr.bf16.gmra.mrb[48].mxu0 %v7234_v58  ;;  %6787 = vmatmul.mubr.bf16.gmra.mrb[48].mxu1 %v7235_v59 }
  0x87   : > { %6742 = vmatprep.mubr.bf16.mxu0 %v7236_v60  ;;  %6790 = vmatprep.mubr.bf16.mxu1 %v7237_v61 }
  0x8e   : > { %6743 = vmatmul.mubr.bf16.gmra.mrb[52].mxu0 %v7238_v62  ;;  %6791 = vmatmul.mubr.bf16.gmra.mrb[52].mxu1 %v7239_v63 }
  0x8f   : > { %6746 = vmatprep.mubr.bf16.mxu0 %v7240_v0  ;;  %6794 = vmatprep.mubr.bf16.mxu1 %v7241_v1 }
  0x96   : > { %6747 = vmatmul.mubr.bf16.gmra.mrb[56].mxu0 %v7242_v4  ;;  %6795 = vmatmul.mubr.bf16.gmra.mrb[56].mxu1 %v7243_v5 }
  0x97   : > { %6750 = vmatprep.mubr.bf16.mxu0 %v7244_v6  ;;  %6798 = vmatprep.mubr.bf16.mxu1 %v7245_v7 }
  0x9e   : > { %6751 = vmatmul.mubr.bf16.gmra.mrb[60].mxu0 %v7246_v10  ;;  %6799 = vmatmul.mubr.bf16.gmra.mrb[60].mxu1 %v7247_v11 }
  0xf9   : > { %v6628_v27 = vpop.f32.mrb[0].mxu0  ;;  %v6676_v28 = vpop.f32.mrb[0].mxu1 }
  0xfa   : > { %v628_v29 = vadd.f32 %v6628_v27, %v7760_v26  ;;  %v619_v30 = vpop.f32.mrb[1].mxu0  ;;  %v981_v31 = vadd.f32 %v6676_v28, %v7760_v26  ;;  %v972_v32 = vpop.f32.mrb[1].mxu1 }
  0xfb   : > { %v620_v33 = vadd.f32 %v7760_v26, %v619_v30  ;;  %v6629_v34 = vpop.f32.mrb[2].mxu0  ;;  %v973_v35 = vadd.f32 %v7760_v26, %v972_v32  ;;  %v6677_v36 = vpop.f32.mrb[2].mxu1 }
  0xfc   : > { %v748_v37 = vmax.f32 %v628_v29, 0.0  ;;  %v631_v38 = vadd.f32 %v6629_v34, %v7760_v26  ;;  %v622_v39 = vpop.f32.mrb[3].mxu0  ;;  %v1101_v40 = vmax.f32 %v981_v31, 0.0  ;;  %v984_v41 = vadd.f32 %v6677_v36, %v7760_v26  ;;  %v975_v42 = vpop.f32.mrb[3].mxu1  ;;  %v7280_v29 = vld [vmem:[%s8749_s3] sm:$0xff]  }
  0xfd   : > { %v746_v43 = vmax.f32 %v620_v33, 0.0  ;;  %v623_v44 = vadd.f32 %v7760_v26, %v622_v39  ;;  %v1099_v45 = vmax.f32 %v973_v35, 0.0  ;;  %v976_v46 = vadd.f32 %v7760_v26, %v975_v42  ;;  %6930 = vmatprep.subr.bf16.mxu1 %v7280_v29 }
  0xfe   : > { %780 = vst [vmem:[#allocation2 + $0x10] sm:$0xff] %v748_v37  ;;  %v749_v47 = vmax.f32 %v631_v38, 0.0  ;;  %1133 = vst [vmem:[#allocation2 + $0x110] sm:$0xff] %v1101_v40  ;;  %v1102_v48 = vmax.f32 %v984_v41, 0.0 }
  0xff   : > { %778 = vst [vmem:[#allocation2] sm:$0xff] %v746_v43  ;;  %v747_v49 = vmax.f32 %v623_v44, 0.0  ;;  %1131 = vst [vmem:[#allocation2 + $0x100] sm:$0xff] %v1099_v45  ;;  %v1100_v50 = vmax.f32 %v976_v46, 0.0 }
 0x100   : > { %781 = vst [vmem:[#allocation2 + $0x18] sm:$0xff] %v749_v47  ;;  %1134 = vst [vmem:[#allocation2 + $0x118] sm:$0xff] %v1102_v48 }
 0x101   : > { %779 = vst [vmem:[#allocation2 + $0x8] sm:$0xff] %v747_v49  ;;  %v6632_v51 = vpop.f32.mrb[4].mxu0  ;;  %1132 = vst [vmem:[#allocation2 + $0x108] sm:$0xff] %v1100_v50  ;;  %v6680_v52 = vpop.f32.mrb[4].mxu1 }
 0x102   : > { %v644_v53 = vadd.f32 %v6632_v51, %v7760_v26  ;;  %v635_v54 = vpop.f32.mrb[5].mxu0  ;;  %v997_v55 = vadd.f32 %v6680_v52, %v7760_v26  ;;  %v988_v56 = vpop.f32.mrb[5].mxu1 }
 0x103   : > { %v636_v57 = vadd.f32 %v7760_v26, %v635_v54  ;;  %v6633_v58 = vpop.f32.mrb[6].mxu0  ;;  %v989_v59 = vadd.f32 %v7760_v26, %v988_v56  ;;  %v6681_v60 = vpop.f32.mrb[6].mxu1 }
 0x104   : > { %v752_v61 = vmax.f32 %v644_v53, 0.0  ;;  %v647_v62 = vadd.f32 %v6633_v58, %v7760_v26  ;;  %v1105_v63 = vmax.f32 %v997_v55, 0.0  ;;  %v638_v0 = vpop.f32.mrb[7].mxu0  ;;  %v1000_v1 = vadd.f32 %v6681_v60, %v7760_v26  ;;  %v991_v2 = vpop.f32.mrb[7].mxu1 }
 0x105   : > { %v750_v3 = vmax.f32 %v636_v57, 0.0  ;;  %v639_v4 = vadd.f32 %v7760_v26, %v638_v0  ;;  %v1103_v5 = vmax.f32 %v989_v59, 0.0  ;;  %v992_v6 = vadd.f32 %v7760_v26, %v991_v2 }
 0x106   : > { %784 = vst [vmem:[#allocation2 + $0x30] sm:$0xff] %v752_v61  ;;  %v753_v7 = vmax.f32 %v647_v62, 0.0  ;;  %1137 = vst [vmem:[#allocation2 + $0x130] sm:$0xff] %v1105_v63  ;;  %v1106_v8 = vmax.f32 %v1000_v1, 0.0 }
 0x107   : > { %782 = vst [vmem:[#allocation2 + $0x20] sm:$0xff] %v750_v3  ;;  %v751_v9 = vmax.f32 %v639_v4, 0.0  ;;  %1135 = vst [vmem:[#allocation2 + $0x120] sm:$0xff] %v1103_v5  ;;  %v1104_v10 = vmax.f32 %v992_v6, 0.0 }
 0x108   : > { %v1871_v11 = vld [vmem:[#allocation2] ss:$4 sm:$0xff]  ;;  %v1903_v12 = vld [vmem:[#allocation2 + $0x1] ss:$4 sm:$0xff]  ;;  %785 = vst [vmem:[#allocation2 + $0x38] sm:$0xff] %v753_v7  ;;  %1138 = vst [vmem:[#allocation2 + $0x138] sm:$0xff] %v1106_v8 }
 0x109   : > { %v1934_v13 = vmax.f32 %v1871_v11, %v1903_v12  ;;  %v1887_v14 = vld [vmem:[#allocation2 + $0x100] ss:$4 sm:$0xff]  ;;  %v1919_v15 = vld [vmem:[#allocation2 + $0x101] ss:$4 sm:$0xff]  ;;  %783 = vst [vmem:[#allocation2 + $0x28] sm:$0xff] %v751_v9  ;;  %1136 = vst [vmem:[#allocation2 + $0x128] sm:$0xff] %v1104_v10 }
 0x10a   : > { %v1951_v16 = vld [vmem:[#allocation2 + $0x2] ss:$4 sm:$0xff]  ;;  %v1942_v18 = vmax.f32 %v1887_v14, %v1919_v15  ;;  %v6636_v20 = vpop.f32.mrb[8].mxu0  ;;  %v6684_v21 = vpop.f32.mrb[8].mxu1  ;;  %v2015_v23 = vld [vmem:[#allocation2 + $0x103] ss:$4 sm:$0xff] }
 0x10b   : > { %v1967_v19 = vld [vmem:[#allocation2 + $0x102] ss:$4 sm:$0xff]  ;;  %v1982_v22 = vmax.f32 %v1934_v13, %v1951_v16  ;;  %v660_v24 = vadd.f32 %v6636_v20, %v7760_v26  ;;  %v1013_v25 = vadd.f32 %v6684_v21, %v7760_v26  ;;  %v651_v27 = vpop.f32.mrb[9].mxu0  ;;  %v1004_v28 = vpop.f32.mrb[9].mxu1  ;;  %v1999_v30 = vld [vmem:[#allocation2 + $0x3] ss:$4 sm:$0xff] }
 0x10c   : > { %v1990_v31 = vmax.f32 %v1942_v18, %v1967_v19  ;;  %v652_v32 = vadd.f32 %v7760_v26, %v651_v27  ;;  %v1005_v33 = vadd.f32 %v7760_v26, %v1004_v28  ;;  %v6637_v34 = vpop.f32.mrb[10].mxu0  ;;  %v6685_v35 = vpop.f32.mrb[10].mxu1 }
 0x10d   : > { %v7785_v36 = vmax.f32 %v1982_v22, %v1999_v30  ;;  %v756_v37 = vmax.f32 %v660_v24, 0.0  ;;  %v1109_v38 = vmax.f32 %v1013_v25, 0.0  ;;  %v663_v39 = vadd.f32 %v6637_v34, %v7760_v26  ;;  %v654_v40 = vpop.f32.mrb[11].mxu0  ;;  %v1007_v41 = vpop.f32.mrb[11].mxu1 }
 0x10e   : > { %v2038_v42 = vmax.f32 %v1990_v31, %v2015_v23  ;;  %v754_v43 = vmax.f32 %v652_v32, 0.0  ;;  %v1107_v44 = vmax.f32 %v1005_v33, 0.0  ;;  %v1016_v45 = vadd.f32 %v6685_v35, %v7760_v26 }
 0x10f   : > { %2046 = vst [vmem:[#allocation3 + $0x8] sm:$0xff] %v7785_v36  ;;  %788 = vst [vmem:[#allocation2 + $0x50] sm:$0xff] %v756_v37  ;;  %v757_v46 = vmax.f32 %v663_v39, 0.0  ;;  %v655_v47 = vadd.f32 %v7760_v26, %v654_v40  ;;  %v1008_v48 = vadd.f32 %v7760_v26, %v1007_v41 }
 0x110   : > { %1141 = vst [vmem:[#allocation2 + $0x150] sm:$0xff] %v1109_v38  ;;  %2054 = vst [vmem:[#allocation3 + $0x48] sm:$0xff] %v2038_v42  ;;  %v1873_v49 = vld [vmem:[#allocation2 + $0x20] ss:$4 sm:$0xff]  ;;  %v1905_v50 = vld [vmem:[#allocation2 + $0x21] ss:$4 sm:$0xff] }
 0x111   : > { %786 = vst [vmem:[#allocation2 + $0x40] sm:$0xff] %v754_v43  ;;  %1139 = vst [vmem:[#allocation2 + $0x140] sm:$0xff] %v1107_v44  ;;  %v1935_v51 = vmax.f32 %v1873_v49, %v1905_v50  ;;  %v1889_v52 = vld [vmem:[#allocation2 + $0x120] ss:$4 sm:$0xff]  ;;  %v1921_v53 = vld [vmem:[#allocation2 + $0x121] ss:$4 sm:$0xff] }
 0x112   : > { %789 = vst [vmem:[#allocation2 + $0x58] sm:$0xff] %v757_v46  ;;  %v1953_v54 = vld [vmem:[#allocation2 + $0x22] ss:$4 sm:$0xff]  ;;  %v1943_v55 = vmax.f32 %v1889_v52, %v1921_v53  ;;  %v1110_v57 = vmax.f32 %v1016_v45, 0.0  ;;  %v755_v58 = vmax.f32 %v655_v47, 0.0  ;;  %v1108_v61 = vmax.f32 %v1008_v48, 0.0 }
 0x113   : > { %v1969_v56 = vld [vmem:[#allocation2 + $0x122] ss:$4 sm:$0xff]  ;;  %v1983_v59 = vmax.f32 %v1935_v51, %v1953_v54  ;;  %v2017_v60 = vld [vmem:[#allocation2 + $0x123] ss:$4 sm:$0xff]  ;;  %v6640_v62 = vpop.f32.mrb[12].mxu0  ;;  %v6688_v63 = vpop.f32.mrb[12].mxu1 }
 0x114   : > { %v2001_v0 = vld [vmem:[#allocation2 + $0x23] ss:$4 sm:$0xff]  ;;  %v1991_v1 = vmax.f32 %v1943_v55, %v1969_v56  ;;  %1142 = vst [vmem:[#allocation2 + $0x158] sm:$0xff] %v1110_v57  ;;  %787 = vst [vmem:[#allocation2 + $0x48] sm:$0xff] %v755_v58  ;;  %v676_v2 = vadd.f32 %v6640_v62, %v7760_v26  ;;  %v1029_v3 = vadd.f32 %v6688_v63, %v7760_v26  ;;  %v667_v4 = vpop.f32.mrb[13].mxu0  ;;  %v1020_v5 = vpop.f32.mrb[13].mxu1 }
 0x115   : > { %v2031_v6 = vmax.f32 %v1983_v59, %v2001_v0  ;;  %1140 = vst [vmem:[#allocation2 + $0x148] sm:$0xff] %v1108_v61  ;;  %v668_v7 = vadd.f32 %v7760_v26, %v667_v4  ;;  %v1021_v8 = vadd.f32 %v7760_v26, %v1020_v5  ;;  %v6641_v9 = vpop.f32.mrb[14].mxu0  ;;  %v6689_v10 = vpop.f32.mrb[14].mxu1 }
 0x116   : > { %v2039_v11 = vmax.f32 %v1991_v1, %v2017_v60  ;;  %v760_v12 = vmax.f32 %v676_v2, 0.0  ;;  %v1113_v13 = vmax.f32 %v1029_v3, 0.0  ;;  %v679_v14 = vadd.f32 %v6641_v9, %v7760_v26  ;;  %v670_v15 = vpop.f32.mrb[15].mxu0  ;;  %v1023_v16 = vpop.f32.mrb[15].mxu1 }
 0x117   : > { %2047 = vst [vmem:[#allocation3 + $0x10] sm:$0xff] %v2031_v6  ;;  %v758_v18 = vmax.f32 %v668_v7, 0.0  ;;  %v1111_v19 = vmax.f32 %v1021_v8, 0.0  ;;  %v1032_v20 = vadd.f32 %v6689_v10, %v7760_v26  ;;  %v671_v21 = vadd.f32 %v7760_v26, %v670_v15 }
 0x118   : > { %2055 = vst [vmem:[#allocation3 + $0x50] sm:$0xff] %v2039_v11  ;;  %792 = vst [vmem:[#allocation2 + $0x70] sm:$0xff] %v760_v12  ;;  %v761_v22 = vmax.f32 %v679_v14, 0.0  ;;  %v1024_v23 = vadd.f32 %v7760_v26, %v1023_v16  ;;  %v2310_v24 = vpack.c.bf16 %v2031_v6, %v7785_v36 }
 0x119   : > { %1145 = vst [vmem:[#allocation2 + $0x170] sm:$0xff] %v1113_v13  ;;  %790 = vst [vmem:[#allocation2 + $0x60] sm:$0xff] %v758_v18  ;;  %v1114_v25 = vmax.f32 %v1032_v20, 0.0  ;;  %v759_v27 = vmax.f32 %v671_v21, 0.0  ;;  %v6644_v28 = vpop.f32.mrb[16].mxu0  ;;  %v6692_v29 = vpop.f32.mrb[16].mxu1 }
 0x11a   : > { %1143 = vst [vmem:[#allocation2 + $0x160] sm:$0xff] %v1111_v19  ;;  %793 = vst [vmem:[#allocation2 + $0x78] sm:$0xff] %v761_v22  ;;  %v1112_v30 = vmax.f32 %v1024_v23, 0.0  ;;  %v692_v31 = vadd.f32 %v6644_v28, %v7760_v26  ;;  %v1045_v32 = vadd.f32 %v6692_v29, %v7760_v26  ;;  %v683_v33 = vpop.f32.mrb[17].mxu0  ;;  %v1036_v34 = vpop.f32.mrb[17].mxu1  ;;  %6818 = vmatprep.mubr.bf16.mxu0 %v2310_v24 }
 0x11b   : > { %v1875_v35 = vld [vmem:[#allocation2 + $0x40] ss:$4 sm:$0xff]  ;;  %v1907_v37 = vld [vmem:[#allocation2 + $0x41] ss:$4 sm:$0xff]  ;;  %1146 = vst [vmem:[#allocation2 + $0x178] sm:$0xff] %v1114_v25  ;;  %791 = vst [vmem:[#allocation2 + $0x68] sm:$0xff] %v759_v27  ;;  %v684_v36 = vadd.f32 %v7760_v26, %v683_v33  ;;  %v1037_v38 = vadd.f32 %v7760_v26, %v1036_v34 }
 0x11c   : > { %v1936_v39 = vmax.f32 %v1875_v35, %v1907_v37  ;;  %v1891_v40 = vld [vmem:[#allocation2 + $0x140] ss:$4 sm:$0xff]  ;;  %v1923_v41 = vld [vmem:[#allocation2 + $0x141] ss:$4 sm:$0xff]  ;;  %1144 = vst [vmem:[#allocation2 + $0x168] sm:$0xff] %v1112_v30  ;;  %v764_v45 = vmax.f32 %v692_v31, 0.0 }
 0x11d   : > { %v1955_v42 = vld [vmem:[#allocation2 + $0x42] ss:$4 sm:$0xff]  ;;  %v1944_v43 = vmax.f32 %v1891_v40, %v1923_v41  ;;  %v1117_v46 = vmax.f32 %v1045_v32, 0.0  ;;  %v2019_v48 = vld [vmem:[#allocation2 + $0x143] ss:$4 sm:$0xff]  ;;  %v762_v49 = vmax.f32 %v684_v36, 0.0 }
 0x11e   : > { %v1971_v44 = vld [vmem:[#allocation2 + $0x142] ss:$4 sm:$0xff]  ;;  %v1984_v47 = vmax.f32 %v1936_v39, %v1955_v42  ;;  %v1115_v50 = vmax.f32 %v1037_v38, 0.0  ;;  %v6645_v51 = vpop.f32.mrb[18].mxu0  ;;  %v6693_v52 = vpop.f32.mrb[18].mxu1  ;;  %796 = vst [vmem:[#allocation2 + $0x90] sm:$0xff] %v764_v45 }
 0x11f   : > { %v2003_v53 = vld [vmem:[#allocation2 + $0x43] ss:$4 sm:$0xff]  ;;  %v1992_v54 = vmax.f32 %v1944_v43, %v1971_v44  ;;  %1149 = vst [vmem:[#allocation2 + $0x190] sm:$0xff] %v1117_v46  ;;  %v695_v55 = vadd.f32 %v6645_v51, %v7760_v26  ;;  %v1048_v56 = vadd.f32 %v6693_v52, %v7760_v26  ;;  %v686_v57 = vpop.f32.mrb[19].mxu0  ;;  %v1039_v58 = vpop.f32.mrb[19].mxu1  ;;  %794 = vst [vmem:[#allocation2 + $0x80] sm:$0xff] %v762_v49 }
 0x120   : > { %v7807_v59 = vmax.f32 %v1984_v47, %v2003_v53  ;;  %1147 = vst [vmem:[#allocation2 + $0x180] sm:$0xff] %v1115_v50  ;;  %v687_v60 = vadd.f32 %v7760_v26, %v686_v57  ;;  %v1040_v61 = vadd.f32 %v7760_v26, %v1039_v58  ;;  %v7258_v44 = vld [vmem:[%s8749_s3 + $0x8] sm:$0xff]  }
 0x121   : > { %v2040_v62 = vmax.f32 %v1992_v54, %v2019_v48  ;;  %v765_v63 = vmax.f32 %v695_v55, 0.0  ;;  %v1118_v0 = vmax.f32 %v1048_v56, 0.0  ;;  %v6648_v1 = vpop.f32.mrb[20].mxu0  ;;  %v6696_v2 = vpop.f32.mrb[20].mxu1 }
 0x122   : > { %2048 = vst [vmem:[#allocation3 + $0x18] sm:$0xff] %v7807_v59  ;;  %v1877_v3 = vld [vmem:[#allocation2 + $0x60] ss:$4 sm:$0xff]  ;;  %v1909_v4 = vld [vmem:[#allocation2 + $0x61] ss:$4 sm:$0xff]  ;;  %v708_v5 = vadd.f32 %v6648_v1, %v7760_v26  ;;  %v1061_v6 = vadd.f32 %v6696_v2, %v7760_v26  ;;  %v763_v13 = vmax.f32 %v687_v60, 0.0 }
 0x123   : > { %2056 = vst [vmem:[#allocation3 + $0x58] sm:$0xff] %v2040_v62  ;;  %v1937_v7 = vmax.f32 %v1877_v3, %v1909_v4  ;;  %v1893_v8 = vld [vmem:[#allocation2 + $0x160] ss:$4 sm:$0xff]  ;;  %v1925_v9 = vld [vmem:[#allocation2 + $0x161] ss:$4 sm:$0xff]  ;;  %797 = vst [vmem:[#allocation2 + $0x98] sm:$0xff] %v765_v63 }
 0x124   : > { %1150 = vst [vmem:[#allocation2 + $0x198] sm:$0xff] %v1118_v0  ;;  %v1957_v10 = vld [vmem:[#allocation2 + $0x62] ss:$4 sm:$0xff]  ;;  %v1945_v11 = vmax.f32 %v1893_v8, %v1925_v9  ;;  %v1116_v14 = vmax.f32 %v1040_v61, 0.0  ;;  %v2021_v16 = vld [vmem:[#allocation2 + $0x163] ss:$4 sm:$0xff] }
 0x125   : > { %v1973_v12 = vld [vmem:[#allocation2 + $0x162] ss:$4 sm:$0xff]  ;;  %v1985_v15 = vmax.f32 %v1937_v7, %v1957_v10  ;;  %v768_v18 = vmax.f32 %v708_v5, 0.0  ;;  %v1121_v19 = vmax.f32 %v1061_v6, 0.0  ;;  %v699_v20 = vpop.f32.mrb[21].mxu0  ;;  %v1052_v21 = vpop.f32.mrb[21].mxu1 }
 0x126   : > { %v2005_v22 = vld [vmem:[#allocation2 + $0x63] ss:$4 sm:$0xff]  ;;  %v1993_v23 = vmax.f32 %v1945_v11, %v1973_v12  ;;  %795 = vst [vmem:[#allocation2 + $0x88] sm:$0xff] %v763_v13  ;;  %1148 = vst [vmem:[#allocation2 + $0x188] sm:$0xff] %v1116_v14  ;;  %v700_v24 = vadd.f32 %v7760_v26, %v699_v20  ;;  %v1053_v25 = vadd.f32 %v7760_v26, %v1052_v21  ;;  %v6649_v27 = vpop.f32.mrb[22].mxu0  ;;  %v6697_v28 = vpop.f32.mrb[22].mxu1 }
 0x127   : > { %v2033_v29 = vmax.f32 %v1985_v15, %v2005_v22  ;;  %800 = vst [vmem:[#allocation2 + $0xb0] sm:$0xff] %v768_v18  ;;  %1153 = vst [vmem:[#allocation2 + $0x1b0] sm:$0xff] %v1121_v19  ;;  %v711_v30 = vadd.f32 %v6649_v27, %v7760_v26  ;;  %v1064_v31 = vadd.f32 %v6697_v28, %v7760_v26  ;;  %v702_v32 = vpop.f32.mrb[23].mxu0  ;;  %v1055_v33 = vpop.f32.mrb[23].mxu1  ;;  %v7259_v1 = vld [vmem:[%s8749_s3 + $0x10] sm:$0xff]   ;;  %v7261_v20 = vld [vmem:[%s8749_s3 + $0x18] sm:$0xff]  }
 0x128   : > { %v7818_v34 = vmax.f32 %v1993_v23, %v2021_v16  ;;  %v766_v35 = vmax.f32 %v700_v24, 0.0  ;;  %v1119_v37 = vmax.f32 %v1053_v25, 0.0  ;;  %v703_v36 = vadd.f32 %v7760_v26, %v702_v32 }
 0x129   : > { %2049 = vst [vmem:[#allocation3 + $0x20] sm:$0xff] %v2033_v29  ;;  %v769_v38 = vmax.f32 %v711_v30, 0.0  ;;  %v1122_v39 = vmax.f32 %v1064_v31, 0.0  ;;  %v1056_v40 = vadd.f32 %v7760_v26, %v1055_v33  ;;  %v6652_v41 = vpop.f32.mrb[24].mxu0  ;;  %v6700_v42 = vpop.f32.mrb[24].mxu1  ;;  %v2311_v43 = vpack.c.bf16 %v2033_v29, %v7807_v59 }
 0x12a   : > { %2057 = vst [vmem:[#allocation3 + $0x60] sm:$0xff] %v7818_v34  ;;  %798 = vst [vmem:[#allocation2 + $0xa0] sm:$0xff] %v766_v35  ;;  %v767_v45 = vmax.f32 %v703_v36, 0.0  ;;  %v724_v46 = vadd.f32 %v6652_v41, %v7760_v26  ;;  %v1077_v47 = vadd.f32 %v6700_v42, %v7760_v26  ;;  %v715_v48 = vpop.f32.mrb[25].mxu0  ;;  %v1068_v49 = vpop.f32.mrb[25].mxu1 }
 0x12b   : > { %1151 = vst [vmem:[#allocation2 + $0x1a0] sm:$0xff] %v1119_v37  ;;  %801 = vst [vmem:[#allocation2 + $0xb8] sm:$0xff] %v769_v38  ;;  %v1120_v50 = vmax.f32 %v1056_v40, 0.0  ;;  %v716_v51 = vadd.f32 %v7760_v26, %v715_v48  ;;  %v1069_v52 = vadd.f32 %v7760_v26, %v1068_v49  ;;  %v6653_v53 = vpop.f32.mrb[26].mxu0  ;;  %v6701_v54 = vpop.f32.mrb[26].mxu1  ;;  %6819 = vmatmul.mubr.bf16.vlgmr.msra.gmra.mrb[64].mxu0 %v2311_v43  ;;  %v7262_v37 = vld [vmem:[%s8749_s3 + $0x20] sm:$0xff]  }
 0x12c   : > { %1154 = vst [vmem:[#allocation2 + $0x1b8] sm:$0xff] %v1122_v39  ;;  %799 = vst [vmem:[#allocation2 + $0xa8] sm:$0xff] %v767_v45  ;;  %v772_v55 = vmax.f32 %v724_v46, 0.0  ;;  %v1125_v56 = vmax.f32 %v1077_v47, 0.0  ;;  %v727_v57 = vadd.f32 %v6653_v53, %v7760_v26  ;;  %v1080_v58 = vadd.f32 %v6701_v54, %v7760_v26  ;;  %v718_v59 = vpop.f32.mrb[27].mxu0  ;;  %v1071_v60 = vpop.f32.mrb[27].mxu1  ;;  %6835 = vmatpush3.bf16.msra.mxu0 %v7730_v17 }
 0x12d   : > { %v1879_v61 = vld [vmem:[#allocation2 + $0x80] ss:$4 sm:$0xff]  ;;  %v1911_v62 = vld [vmem:[#allocation2 + $0x81] ss:$4 sm:$0xff]  ;;  %1152 = vst [vmem:[#allocation2 + $0x1a8] sm:$0xff] %v1120_v50  ;;  %v719_v63 = vadd.f32 %v7760_v26, %v718_v59  ;;  %v1072_v0 = vadd.f32 %v7760_v26, %v1071_v60  ;;  %6836 = vmatprep.subr.bf16.mxu0 %v7258_v44  ;;  %v770_v7 = vmax.f32 %v716_v51, 0.0 }
 0x12e   : > { %v1938_v2 = vmax.f32 %v1879_v61, %v1911_v62  ;;  %v1895_v3 = vld [vmem:[#allocation2 + $0x180] ss:$4 sm:$0xff]  ;;  %v1927_v4 = vld [vmem:[#allocation2 + $0x181] ss:$4 sm:$0xff]  ;;  %804 = vst [vmem:[#allocation2 + $0xd0] sm:$0xff] %v772_v55  ;;  %1157 = vst [vmem:[#allocation2 + $0x1d0] sm:$0xff] %v1125_v56 }
 0x12f   : > { %v1959_v5 = vld [vmem:[#allocation2 + $0x82] ss:$4 sm:$0xff]  ;;  %v1946_v6 = vmax.f32 %v1895_v3, %v1927_v4  ;;  %v1123_v8 = vmax.f32 %v1069_v52, 0.0  ;;  %v2023_v10 = vld [vmem:[#allocation2 + $0x183] ss:$4 sm:$0xff]  ;;  %v773_v11 = vmax.f32 %v727_v57, 0.0 }
 0x130   : > { %v1975_v17 = vld [vmem:[#allocation2 + $0x182] ss:$4 sm:$0xff]  ;;  %v1986_v9 = vmax.f32 %v1938_v2, %v1959_v5  ;;  %v1126_v12 = vmax.f32 %v1080_v58, 0.0  ;;  %v771_v13 = vmax.f32 %v719_v63, 0.0  ;;  %6837 = vmatpush3.bf16.msra.mxu0 %v7258_v44  ;;  %v2007_v14 = vld [vmem:[#allocation2 + $0x83] ss:$4 sm:$0xff] }
 0x131   : > { %v1994_v15 = vmax.f32 %v1946_v6, %v1975_v17  ;;  %802 = vst [vmem:[#allocation2 + $0xc0] sm:$0xff] %v770_v7  ;;  %1155 = vst [vmem:[#allocation2 + $0x1c0] sm:$0xff] %v1123_v8  ;;  %v1124_v16 = vmax.f32 %v1072_v0, 0.0  ;;  %v6656_v18 = vpop.f32.mrb[28].mxu0  ;;  %v6704_v19 = vpop.f32.mrb[28].mxu1  ;;  %6838 = vmatprep.subr.bf16.mxu0 %v7259_v1  ;;  %v7264_v60 = vld [vmem:[%s8749_s3 + $0x28] sm:$0xff]  }
 0x132   : > { %v7842_v21 = vmax.f32 %v1986_v9, %v2007_v14  ;;  %805 = vst [vmem:[#allocation2 + $0xd8] sm:$0xff] %v773_v11  ;;  %1158 = vst [vmem:[#allocation2 + $0x1d8] sm:$0xff] %v1126_v12  ;;  %v740_v22 = vadd.f32 %v6656_v18, %v7760_v26  ;;  %v1093_v23 = vadd.f32 %v6704_v19, %v7760_v26  ;;  %v731_v24 = vpop.f32.mrb[29].mxu0  ;;  %v1084_v25 = vpop.f32.mrb[29].mxu1  ;;  %v7266_v18 = vld [vmem:[%s8749_s3 + $0x30] sm:$0xff]  }
 0x133   : > { %803 = vst [vmem:[#allocation2 + $0xc8] sm:$0xff] %v771_v13  ;;  %v7846_v27 = vmax.f32 %v1994_v15, %v2023_v10  ;;  %v1881_v28 = vld [vmem:[#allocation2 + $0xa0] ss:$4 sm:$0xff]  ;;  %v1913_v29 = vld [vmem:[#allocation2 + $0xa1] ss:$4 sm:$0xff]  ;;  %1156 = vst [vmem:[#allocation2 + $0x1c8] sm:$0xff] %v1124_v16  ;;  %v732_v30 = vadd.f32 %v7760_v26, %v731_v24  ;;  %v1085_v31 = vadd.f32 %v7760_v26, %v1084_v25 }
 0x134   : > { %2050 = vst [vmem:[#allocation3 + $0x28] sm:$0xff] %v7842_v21  ;;  %v1939_v32 = vmax.f32 %v1881_v28, %v1913_v29  ;;  %v1897_v33 = vld [vmem:[#allocation2 + $0x1a0] ss:$4 sm:$0xff]  ;;  %v1929_v35 = vld [vmem:[#allocation2 + $0x1a1] ss:$4 sm:$0xff]  ;;  %6839 = vmatpush3.bf16.msra.mxu0 %v7259_v1  ;;  %v776_v40 = vmax.f32 %v740_v22, 0.0 }
 0x135   : > { %2058 = vst [vmem:[#allocation3 + $0x68] sm:$0xff] %v7846_v27  ;;  %v1961_v36 = vld [vmem:[#allocation2 + $0xa2] ss:$4 sm:$0xff]  ;;  %v1947_v38 = vmax.f32 %v1897_v33, %v1929_v35  ;;  %v1129_v41 = vmax.f32 %v1093_v23, 0.0  ;;  %6840 = vmatprep.subr.bf16.mxu0 %v7261_v20  ;;  %v2025_v43 = vld [vmem:[#allocation2 + $0x1a3] ss:$4 sm:$0xff] }
 0x136   : > { %v1977_v39 = vld [vmem:[#allocation2 + $0x1a2] ss:$4 sm:$0xff]  ;;  %v1987_v42 = vmax.f32 %v1939_v32, %v1961_v36  ;;  %v774_v44 = vmax.f32 %v732_v30, 0.0  ;;  %v1127_v45 = vmax.f32 %v1085_v31, 0.0  ;;  %v6657_v46 = vpop.f32.mrb[30].mxu0  ;;  %v6705_v47 = vpop.f32.mrb[30].mxu1 }
 0x137   : > { %v2009_v48 = vld [vmem:[#allocation2 + $0xa3] ss:$4 sm:$0xff]  ;;  %v1995_v49 = vmax.f32 %v1947_v38, %v1977_v39  ;;  %808 = vst [vmem:[#allocation2 + $0xf0] sm:$0xff] %v776_v40  ;;  %1161 = vst [vmem:[#allocation2 + $0x1f0] sm:$0xff] %v1129_v41  ;;  %v743_v50 = vadd.f32 %v6657_v46, %v7760_v26  ;;  %v1096_v51 = vadd.f32 %v6705_v47, %v7760_v26  ;;  %v734_v52 = vpop.f32.mrb[31].mxu0  ;;  %v1087_v53 = vpop.f32.mrb[31].mxu1 }
 0x138   : > { %v2035_v54 = vmax.f32 %v1987_v42, %v2009_v48  ;;  %806 = vst [vmem:[#allocation2 + $0xe0] sm:$0xff] %v774_v44  ;;  %1159 = vst [vmem:[#allocation2 + $0x1e0] sm:$0xff] %v1127_v45  ;;  %v735_v55 = vadd.f32 %v7760_v26, %v734_v52  ;;  %v1088_v56 = vadd.f32 %v7760_v26, %v1087_v53  ;;  %6841 = vmatpush3.bf16.msra.mxu0 %v7261_v20  ;;  %v7268_v41 = vld [vmem:[%s8749_s3 + $0x38] sm:$0xff]  }
 0x139   : > { %v7859_v57 = vmax.f32 %v1995_v49, %v2025_v43  ;;  %6842 = vmatprep.subr.bf16.mxu0 %v7262_v37  ;;  %v777_v4 = vmax.f32 %v743_v50, 0.0  ;;  %v1130_v5 = vmax.f32 %v1096_v51, 0.0  ;;  %v6724_v9 = vpop.f32.mrb[32].mxu0  ;;  %v6772_v10 = vpop.f32.mrb[32].mxu1 }
 0x13a   : > { %v1883_v58 = vld [vmem:[#allocation2 + $0xc0] ss:$4 sm:$0xff]  ;;  %v1915_v59 = vld [vmem:[#allocation2 + $0xc1] ss:$4 sm:$0xff]  ;;  %2051 = vst [vmem:[#allocation3 + $0x30] sm:$0xff] %v2035_v54  ;;  %v2312_v0 = vpack.c.bf16 %v2035_v54, %v7842_v21  ;;  %v775_v7 = vmax.f32 %v735_v55, 0.0  ;;  %v1334_v13 = vadd.f32 %v6724_v9, %v7760_v26  ;;  %v1687_v15 = vadd.f32 %v6772_v10, %v7760_v26 }
 0x13b   : > { %v1940_v61 = vmax.f32 %v1883_v58, %v1915_v59  ;;  %v1899_v62 = vld [vmem:[#allocation2 + $0x1c0] ss:$4 sm:$0xff]  ;;  %v1931_v63 = vld [vmem:[#allocation2 + $0x1c1] ss:$4 sm:$0xff]  ;;  %2059 = vst [vmem:[#allocation3 + $0x70] sm:$0xff] %v7859_v57  ;;  %v1128_v8 = vmax.f32 %v1088_v56, 0.0 }
 0x13c   : > { %v1963_v1 = vld [vmem:[#allocation2 + $0xc2] ss:$4 sm:$0xff]  ;;  %v1948_v2 = vmax.f32 %v1899_v62, %v1931_v63  ;;  %v2027_v17 = vld [vmem:[#allocation2 + $0x1c3] ss:$4 sm:$0xff]  ;;  %6822 = vmatprep.mubr.bf16.mxu0 %v2312_v0  ;;  %6843 = vmatpush3.bf16.msra.mxu0 %v7262_v37  ;;  %809 = vst [vmem:[#allocation2 + $0xf8] sm:$0xff] %v777_v4  ;;  %1162 = vst [vmem:[#allocation2 + $0x1f8] sm:$0xff] %v1130_v5 }
 0x13d   : > { %v1979_v3 = vld [vmem:[#allocation2 + $0x1c2] ss:$4 sm:$0xff]  ;;  %v1988_v6 = vmax.f32 %v1940_v61, %v1963_v1  ;;  %v2011_v11 = vld [vmem:[#allocation2 + $0xc3] ss:$4 sm:$0xff]  ;;  %v1325_v14 = vpop.f32.mrb[33].mxu0  ;;  %v1678_v16 = vpop.f32.mrb[33].mxu1  ;;  %6844 = vmatprep.subr.bf16.mxu0 %v7264_v60 }
 0x13e   : > { %v1996_v12 = vmax.f32 %v1948_v2, %v1979_v3  ;;  %807 = vst [vmem:[#allocation2 + $0xe8] sm:$0xff] %v775_v7  ;;  %1160 = vst [vmem:[#allocation2 + $0x1e8] sm:$0xff] %v1128_v8  ;;  %v1326_v20 = vadd.f32 %v7760_v26, %v1325_v14  ;;  %v6725_v21 = vpop.f32.mrb[34].mxu0  ;;  %v1679_v22 = vadd.f32 %v7760_v26, %v1678_v16  ;;  %v6773_v23 = vpop.f32.mrb[34].mxu1  ;;  %v1454_v25 = vmax.f32 %v1334_v13, 0.0  ;;  %v7897_v0 = vld [vmem:[%s8749_s3 + $0x80] sm:$0xff]  }
 0x13f   : > { %v7871_v19 = vmax.f32 %v1988_v6, %v2011_v11  ;;  %v1337_v28 = vadd.f32 %v6725_v21, %v7760_v26  ;;  %v1328_v29 = vpop.f32.mrb[35].mxu0  ;;  %v1807_v30 = vmax.f32 %v1687_v15, 0.0  ;;  %v1681_v31 = vpop.f32.mrb[35].mxu1  ;;  %v1690_v37 = vadd.f32 %v6773_v23, %v7760_v26 }
 0x140   : > { %v7875_v24 = vmax.f32 %v1996_v12, %v2027_v17  ;;  %v1452_v32 = vmax.f32 %v1326_v20, 0.0  ;;  %v1329_v33 = vadd.f32 %v7760_v26, %v1328_v29  ;;  %v1805_v35 = vmax.f32 %v1679_v22, 0.0  ;;  %6845 = vmatpush3.bf16.msra.mxu0 %v7264_v60  ;;  %1486 = vst [vmem:[#allocation2 + $0x210] sm:$0xff] %v1454_v25  ;;  %v2303_v29 = vld [vmem:[#allocation3 + $0x50] sm:$0xff] }
 0x141   : > { %2052 = vst [vmem:[#allocation3 + $0x38] sm:$0xff] %v7871_v19  ;;  %v1455_v36 = vmax.f32 %v1337_v28, 0.0  ;;  %1839 = vst [vmem:[#allocation2 + $0x310] sm:$0xff] %v1807_v30  ;;  %v6728_v38 = vpop.f32.mrb[36].mxu0  ;;  %v1682_v39 = vadd.f32 %v7760_v26, %v1681_v31  ;;  %v6776_v40 = vpop.f32.mrb[36].mxu1  ;;  %6846 = vmatprep.subr.bf16.mxu0 %v7266_v18  ;;  %v1808_v44 = vmax.f32 %v1690_v37, 0.0 }
 0x142   : > { %2060 = vst [vmem:[#allocation3 + $0x78] sm:$0xff] %v7875_v24  ;;  %1484 = vst [vmem:[#allocation2 + $0x200] sm:$0xff] %v1452_v32  ;;  %v1453_v42 = vmax.f32 %v1329_v33, 0.0  ;;  %v1350_v43 = vadd.f32 %v6728_v38, %v7760_v26  ;;  %v1341_v45 = vpop.f32.mrb[37].mxu0  ;;  %v1703_v46 = vadd.f32 %v6776_v40, %v7760_v26  ;;  %v1694_v47 = vpop.f32.mrb[37].mxu1  ;;  %v2302_v28 = vld [vmem:[#allocation3 + $0x48] sm:$0xff] }
 0x143   : > { %1837 = vst [vmem:[#allocation2 + $0x300] sm:$0xff] %v1805_v35  ;;  %1487 = vst [vmem:[#allocation2 + $0x218] sm:$0xff] %v1455_v36  ;;  %v1342_v48 = vadd.f32 %v7760_v26, %v1341_v45  ;;  %v1806_v49 = vmax.f32 %v1682_v39, 0.0  ;;  %v6729_v50 = vpop.f32.mrb[38].mxu0  ;;  %v1695_v51 = vadd.f32 %v7760_v26, %v1694_v47  ;;  %v6777_v52 = vpop.f32.mrb[38].mxu1  ;;  %v2314_v45 = vpack.c.bf16 %v2303_v29, %v2302_v28 }
 0x144   : > { %1485 = vst [vmem:[#allocation2 + $0x208] sm:$0xff] %v1453_v42  ;;  %v1458_v53 = vmax.f32 %v1350_v43, 0.0  ;;  %1840 = vst [vmem:[#allocation2 + $0x318] sm:$0xff] %v1808_v44  ;;  %v1353_v54 = vadd.f32 %v6729_v50, %v7760_v26  ;;  %v1811_v55 = vmax.f32 %v1703_v46, 0.0  ;;  %v1344_v56 = vpop.f32.mrb[39].mxu0  ;;  %v1706_v58 = vadd.f32 %v6777_v52, %v7760_v26  ;;  %v1697_v59 = vpop.f32.mrb[39].mxu1  ;;  %6847 = vmatpush3.bf16.msra.mxu0 %v7266_v18 }
 0x145   : > { %v1885_v60 = vld [vmem:[#allocation2 + $0xe0] ss:$4 sm:$0xff]  ;;  %v1917_v61 = vld [vmem:[#allocation2 + $0xe1] ss:$4 sm:$0xff]  ;;  %1838 = vst [vmem:[#allocation2 + $0x308] sm:$0xff] %v1806_v49  ;;  %v1345_v62 = vadd.f32 %v7760_v26, %v1344_v56  ;;  %v1698_v63 = vadd.f32 %v7760_v26, %v1697_v59  ;;  %6848 = vmatprep.subr.bf16.mxu0 %v7268_v41  ;;  %v1456_v17 = vmax.f32 %v1342_v48, 0.0 }
 0x146   : > { %v1941_v1 = vmax.f32 %v1885_v60, %v1917_v61  ;;  %v1901_v2 = vld [vmem:[#allocation2 + $0x1e0] ss:$4 sm:$0xff]  ;;  %v1933_v3 = vld [vmem:[#allocation2 + $0x1e1] ss:$4 sm:$0xff]  ;;  %1490 = vst [vmem:[#allocation2 + $0x230] sm:$0xff] %v1458_v53  ;;  %1843 = vst [vmem:[#allocation2 + $0x330] sm:$0xff] %v1811_v55 }
 0x147   : > { %v1965_v4 = vld [vmem:[#allocation2 + $0xe2] ss:$4 sm:$0xff]  ;;  %v1949_v5 = vmax.f32 %v1901_v2, %v1933_v3  ;;  %v1459_v7 = vmax.f32 %v1353_v54, 0.0  ;;  %v2029_v9 = vld [vmem:[#allocation2 + $0x1e3] ss:$4 sm:$0xff]  ;;  %v1457_v10 = vmax.f32 %v1345_v62, 0.0 }
 0x148   : > { %v1981_v6 = vld [vmem:[#allocation2 + $0x1e2] ss:$4 sm:$0xff]  ;;  %v1989_v8 = vmax.f32 %v1941_v1, %v1965_v4  ;;  %v1809_v11 = vmax.f32 %v1695_v51, 0.0  ;;  %v1812_v12 = vmax.f32 %v1706_v58, 0.0  ;;  %6849 = vmatpush3.bf16.msra.mxu0 %v7268_v41  ;;  %v2013_v13 = vld [vmem:[#allocation2 + $0xe3] ss:$4 sm:$0xff] }
 0x149   : > { %v1997_v14 = vmax.f32 %v1949_v5, %v1981_v6  ;;  %1488 = vst [vmem:[#allocation2 + $0x220] sm:$0xff] %v1456_v17  ;;  %1491 = vst [vmem:[#allocation2 + $0x238] sm:$0xff] %v1459_v7  ;;  %v1810_v15 = vmax.f32 %v1698_v63, 0.0  ;;  %v6732_v16 = vpop.f32.mrb[40].mxu0  ;;  %v6780_v18 = vpop.f32.mrb[40].mxu1  ;;  %6866 = vmatprep.subr.bf16.mxu0 %v7897_v0  ;;  %v2304_v1 = vld [vmem:[#allocation3 + $0x58] sm:$0xff] }
 0x14a   : > { %v2037_v20 = vmax.f32 %v1989_v8, %v2013_v13  ;;  %1489 = vst [vmem:[#allocation2 + $0x228] sm:$0xff] %v1457_v10  ;;  %1841 = vst [vmem:[#allocation2 + $0x320] sm:$0xff] %v1809_v11  ;;  %v1366_v21 = vadd.f32 %v6732_v16, %v7760_v26  ;;  %v1719_v22 = vadd.f32 %v6780_v18, %v7760_v26  ;;  %v1357_v23 = vpop.f32.mrb[41].mxu0  ;;  %v1710_v25 = vpop.f32.mrb[41].mxu1 }
 0x14b   : > { %1844 = vst [vmem:[#allocation2 + $0x338] sm:$0xff] %v1812_v12  ;;  %v7902_v30 = vmax.f32 %v1997_v14, %v2029_v9  ;;  %v2063_v31 = vld [vmem:[#allocation2 + $0x200] ss:$4 sm:$0xff]  ;;  %v2095_v32 = vld [vmem:[#allocation2 + $0x201] ss:$4 sm:$0xff]  ;;  %1842 = vst [vmem:[#allocation2 + $0x328] sm:$0xff] %v1810_v15  ;;  %v1358_v33 = vadd.f32 %v7760_v26, %v1357_v23  ;;  %v1711_v35 = vadd.f32 %v7760_v26, %v1710_v25 }
 0x14c   : > { %2053 = vst [vmem:[#allocation3 + $0x40] sm:$0xff] %v2037_v20  ;;  %v2126_v37 = vmax.f32 %v2063_v31, %v2095_v32  ;;  %v2079_v36 = vld [vmem:[#allocation2 + $0x300] ss:$4 sm:$0xff]  ;;  %v2111_v38 = vld [vmem:[#allocation2 + $0x301] ss:$4 sm:$0xff]  ;;  %v2313_v39 = vpack.c.bf16 %v2037_v20, %v7871_v19  ;;  %v1462_v43 = vmax.f32 %v1366_v21, 0.0  ;;  %v2315_v15 = vpack.c.bf16 %v7818_v34, %v2304_v1 }
 0x14d   : > { %2061 = vst [vmem:[#allocation3 + $0x80] sm:$0xff] %v7902_v30  ;;  %v2143_v40 = vld [vmem:[#allocation2 + $0x202] ss:$4 sm:$0xff]  ;;  %v2134_v41 = vmax.f32 %v2079_v36, %v2111_v38  ;;  %v1815_v44 = vmax.f32 %v1719_v22, 0.0  ;;  %v2207_v47 = vld [vmem:[#allocation2 + $0x303] ss:$4 sm:$0xff]  ;;  %v2316_v25 = vpack.c.bf16 %v7859_v57, %v7846_v27 }
 0x14e   : > { %v2159_v42 = vld [vmem:[#allocation2 + $0x302] ss:$4 sm:$0xff]  ;;  %v2174_v46 = vmax.f32 %v2126_v37, %v2143_v40  ;;  %v1460_v48 = vmax.f32 %v1358_v33, 0.0  ;;  %v1813_v49 = vmax.f32 %v1711_v35, 0.0  ;;  %v6733_v50 = vpop.f32.mrb[42].mxu0  ;;  %v6781_v26 = vpop.f32.mrb[42].mxu1  ;;  %6823 = vmatmul.mubr.bf16.gmra.mrb[68].mxu0 %v2313_v39 }
 0x14f   : > { %v2191_v51 = vld [vmem:[#allocation2 + $0x203] ss:$4 sm:$0xff]  ;;  %v2182_v52 = vmax.f32 %v2134_v41, %v2159_v42  ;;  %1494 = vst [vmem:[#allocation2 + $0x250] sm:$0xff] %v1462_v43  ;;  %1847 = vst [vmem:[#allocation2 + $0x350] sm:$0xff] %v1815_v44  ;;  %v7911_v19 = vld [vmem:[%s8748_s2] ss:$0 sm:$0xff]  ;;  %6826 = vmatprep.mubr.bf16.mxu0 %v2314_v45 }
 0x150   : > { %v1369_v53 = vadd.f32 %v7911_v19, %v6733_v50  ;;  %v1722_v54 = vadd.f32 %v7911_v19, %v6781_v26  ;;  %v1360_v55 = vpop.f32.mrb[43].mxu0  ;;  %v1713_v56 = vpop.f32.mrb[43].mxu1  ;;  %v7915_v58 = vmax.f32 %v2174_v46, %v2191_v51  ;;  %1492 = vst [vmem:[#allocation2 + $0x240] sm:$0xff] %v1460_v48  ;;  %1845 = vst [vmem:[#allocation2 + $0x340] sm:$0xff] %v1813_v49 }
 0x151   : > { %v1361_v59 = vadd.f32 %v7911_v19, %v1360_v55  ;;  %v1714_v60 = vadd.f32 %v7911_v19, %v1713_v56  ;;  %v2230_v61 = vmax.f32 %v2182_v52, %v2207_v47  ;;  %v2065_v62 = vld [vmem:[#allocation2 + $0x220] ss:$4 sm:$0xff]  ;;  %v2097_v63 = vld [vmem:[#allocation2 + $0x221] ss:$4 sm:$0xff]  ;;  %v2145_v5 = vld [vmem:[#allocation2 + $0x222] ss:$4 sm:$0xff] }
 0x152   : > { %2238 = vst [vmem:[#allocation3 + $0x88] sm:$0xff] %v7915_v58  ;;  %v2127_v2 = vmax.f32 %v2065_v62, %v2097_v63  ;;  %v2081_v3 = vld [vmem:[#allocation2 + $0x320] ss:$4 sm:$0xff]  ;;  %v2113_v4 = vld [vmem:[#allocation2 + $0x321] ss:$4 sm:$0xff]  ;;  %v1463_v7 = vmax.f32 %v1369_v53, 0.0 }
 0x153   : > { %2246 = vst [vmem:[#allocation3 + $0xc8] sm:$0xff] %v2230_v61  ;;  %v2135_v6 = vmax.f32 %v2081_v3, %v2113_v4  ;;  %v2161_v17 = vld [vmem:[#allocation2 + $0x322] ss:$4 sm:$0xff]  ;;  %v1816_v8 = vmax.f32 %v1722_v54, 0.0  ;;  %v2209_v10 = vld [vmem:[#allocation2 + $0x323] ss:$4 sm:$0xff] }
 0x154   : > { %v2175_v9 = vmax.f32 %v2127_v2, %v2145_v5  ;;  %v1461_v11 = vmax.f32 %v1361_v59, 0.0  ;;  %v1814_v12 = vmax.f32 %v1714_v60, 0.0  ;;  %v6736_v13 = vpop.f32.mrb[44].mxu0  ;;  %v6784_v14 = vpop.f32.mrb[44].mxu1  ;;  %v2193_v16 = vld [vmem:[#allocation2 + $0x223] ss:$4 sm:$0xff] }
 0x155   : > { %v2183_v18 = vmax.f32 %v2135_v6, %v2161_v17  ;;  %1495 = vst [vmem:[#allocation2 + $0x258] sm:$0xff] %v1463_v7  ;;  %1848 = vst [vmem:[#allocation2 + $0x358] sm:$0xff] %v1816_v8  ;;  %v1382_v20 = vadd.f32 %v7911_v19, %v6736_v13  ;;  %v1735_v21 = vadd.f32 %v7911_v19, %v6784_v14  ;;  %v1373_v22 = vpop.f32.mrb[45].mxu0  ;;  %v1726_v23 = vpop.f32.mrb[45].mxu1  ;;  %v2255_v52 = vld [vmem:[#allocation3 + $0xf] sm:$0xff]  ;;  %v2254_v3 = vld [vmem:[#allocation3 + $0x7] sm:$0xff] }
 0x156   : > { %v2223_v28 = vmax.f32 %v2175_v9, %v2193_v16  ;;  %1493 = vst [vmem:[#allocation2 + $0x248] sm:$0xff] %v1461_v11  ;;  %1846 = vst [vmem:[#allocation2 + $0x348] sm:$0xff] %v1814_v12  ;;  %v1374_v29 = vadd.f32 %v7911_v19, %v1373_v22  ;;  %v1727_v34 = vadd.f32 %v7911_v19, %v1726_v23  ;;  %v6737_v31 = vpop.f32.mrb[46].mxu0  ;;  %v6785_v32 = vpop.f32.mrb[46].mxu1  ;;  %6827 = vmatmul.mubr.bf16.gmra.mrb[72].mxu0 %v2315_v15 }
 0x157   : > { %v2231_v33 = vmax.f32 %v2183_v18, %v2209_v10  ;;  %v1466_v35 = vmax.f32 %v1382_v20, 0.0  ;;  %v1819_v37 = vmax.f32 %v1735_v21, 0.0  ;;  %v1385_v36 = vadd.f32 %v7911_v19, %v6737_v31  ;;  %v1376_v38 = vpop.f32.mrb[47].mxu0  ;;  %v1729_v39 = vpop.f32.mrb[47].mxu1  ;;  %6830 = vmatprep.mubr.bf16.mxu0 %v2316_v25 }
 0x158   : > { %2239 = vst [vmem:[#allocation3 + $0x90] sm:$0xff] %v2223_v28  ;;  %v1464_v27 = vmax.f32 %v1374_v29, 0.0  ;;  %v1817_v57 = vmax.f32 %v1727_v34, 0.0  ;;  %v1738_v40 = vadd.f32 %v7911_v19, %v6785_v32  ;;  %v1377_v41 = vadd.f32 %v7911_v19, %v1376_v38  ;;  %v2257_v29 = vld [vmem:[#allocation3 + $0x1f] sm:$0xff] }
 0x159   : > { %2247 = vst [vmem:[#allocation3 + $0xd0] sm:$0xff] %v2231_v33  ;;  %1498 = vst [vmem:[#allocation2 + $0x270] sm:$0xff] %v1466_v35  ;;  %v1467_v42 = vmax.f32 %v1385_v36, 0.0  ;;  %v1730_v43 = vadd.f32 %v7911_v19, %v1729_v39  ;;  %v6740_v44 = vpop.f32.mrb[48].mxu0  ;;  %v6788_v45 = vpop.f32.mrb[48].mxu1  ;;  %v2937_v46 = vpack.c.bf16 %v2223_v28, %v7915_v58  ;;  %v2317_v58 = vpack.c.bf16 %v7902_v30, %v7875_v24  ;;  %v7949_v36 = vld [vmem:[%s8749_s3 + $0x88] sm:$0xff]  }
 0x15a   : > { %1851 = vst [vmem:[#allocation2 + $0x370] sm:$0xff] %v1819_v37  ;;  %1496 = vst [vmem:[#allocation2 + $0x260] sm:$0xff] %v1464_v27  ;;  %v1820_v47 = vmax.f32 %v1738_v40, 0.0  ;;  %v1465_v48 = vmax.f32 %v1377_v41, 0.0  ;;  %v1398_v49 = vadd.f32 %v7911_v19, %v6740_v44  ;;  %v1751_v50 = vadd.f32 %v7911_v19, %v6788_v45  ;;  %v1389_v26 = vpop.f32.mrb[49].mxu0  ;;  %v1742_v51 = vpop.f32.mrb[49].mxu1 }
 0x15b   : > { %1849 = vst [vmem:[#allocation2 + $0x360] sm:$0xff] %v1817_v57  ;;  %1499 = vst [vmem:[#allocation2 + $0x278] sm:$0xff] %v1467_v42  ;;  %v1818_v53 = vmax.f32 %v1730_v43, 0.0  ;;  %v1390_v54 = vadd.f32 %v7911_v19, %v1389_v26  ;;  %v1743_v55 = vadd.f32 %v7911_v19, %v1742_v51  ;;  %v6741_v56 = vpop.f32.mrb[50].mxu0  ;;  %v6789_v59 = vpop.f32.mrb[50].mxu1  ;;  %6914 = vmatprep.mubr.bf16.mxu1 %v2937_v46  ;;  %v2259_v37 = vld [vmem:[#allocation3 + $0x2f] sm:$0xff] }
 0x15c   : > { %1852 = vst [vmem:[#allocation2 + $0x378] sm:$0xff] %v1820_v47  ;;  %1497 = vst [vmem:[#allocation2 + $0x268] sm:$0xff] %v1465_v48  ;;  %v1470_v60 = vmax.f32 %v1398_v49, 0.0  ;;  %v1823_v61 = vmax.f32 %v1751_v50, 0.0  ;;  %v1401_v62 = vadd.f32 %v7911_v19, %v6741_v56  ;;  %v1754_v63 = vadd.f32 %v7911_v19, %v6789_v59  ;;  %v1392_v1 = vpop.f32.mrb[51].mxu0  ;;  %v1745_v2 = vpop.f32.mrb[51].mxu1 }
 0x15d   : > { %v2067_v4 = vld [vmem:[#allocation2 + $0x240] ss:$4 sm:$0xff]  ;;  %v2099_v5 = vld [vmem:[#allocation2 + $0x241] ss:$4 sm:$0xff]  ;;  %1850 = vst [vmem:[#allocation2 + $0x368] sm:$0xff] %v1818_v53  ;;  %v1393_v6 = vadd.f32 %v7911_v19, %v1392_v1  ;;  %v1746_v17 = vadd.f32 %v7911_v19, %v1745_v2  ;;  %v2270_v24 = vpack.c.bf16 %v2255_v52, %v2254_v3  ;;  %v1468_v12 = vmax.f32 %v1390_v54, 0.0 }
 0x15e   : > { %v2128_v30 = vmax.f32 %v2067_v4, %v2099_v5  ;;  %v2083_v7 = vld [vmem:[#allocation2 + $0x340] ss:$4 sm:$0xff]  ;;  %v2115_v8 = vld [vmem:[#allocation2 + $0x341] ss:$4 sm:$0xff]  ;;  %1502 = vst [vmem:[#allocation2 + $0x290] sm:$0xff] %v1470_v60  ;;  %1855 = vst [vmem:[#allocation2 + $0x390] sm:$0xff] %v1823_v61  ;;  %6831 = vmatmul.mubr.bf16.gmra.mrb[76].mxu0 %v2317_v58 }
 0x15f   : > { %v2147_v9 = vld [vmem:[#allocation2 + $0x242] ss:$4 sm:$0xff]  ;;  %v2136_v10 = vmax.f32 %v2083_v7, %v2115_v8  ;;  %v1821_v13 = vmax.f32 %v1743_v55, 0.0  ;;  %6850 = vmatprep.mubr.bf16.mxu0 %v2270_v24  ;;  %v2211_v15 = vld [vmem:[#allocation2 + $0x343] ss:$4 sm:$0xff]  ;;  %v1471_v16 = vmax.f32 %v1401_v62, 0.0 }
 0x160   : > { %v2163_v11 = vld [vmem:[#allocation2 + $0x342] ss:$4 sm:$0xff]  ;;  %v2176_v14 = vmax.f32 %v2128_v30, %v2147_v9  ;;  %v1824_v18 = vmax.f32 %v1754_v63, 0.0  ;;  %v1469_v20 = vmax.f32 %v1393_v6, 0.0  ;;  %v2195_v21 = vld [vmem:[#allocation2 + $0x243] ss:$4 sm:$0xff] }
 0x161   : > { %v2184_v22 = vmax.f32 %v2136_v10, %v2163_v11  ;;  %1500 = vst [vmem:[#allocation2 + $0x280] sm:$0xff] %v1468_v12  ;;  %1853 = vst [vmem:[#allocation2 + $0x380] sm:$0xff] %v1821_v13  ;;  %v1822_v23 = vmax.f32 %v1746_v17, 0.0  ;;  %v6744_v25 = vpop.f32.mrb[52].mxu0  ;;  %v6792_v28 = vpop.f32.mrb[52].mxu1  ;;  %v2256_v41 = vld [vmem:[#allocation3 + $0x17] sm:$0xff] }
 0x162   : > { %v7942_v34 = vmax.f32 %v2176_v14, %v2195_v21  ;;  %1503 = vst [vmem:[#allocation2 + $0x298] sm:$0xff] %v1471_v16  ;;  %1856 = vst [vmem:[#allocation2 + $0x398] sm:$0xff] %v1824_v18  ;;  %v1414_v31 = vadd.f32 %v7911_v19, %v6744_v25  ;;  %v1767_v32 = vadd.f32 %v7911_v19, %v6792_v28  ;;  %v1405_v33 = vpop.f32.mrb[53].mxu0  ;;  %v1758_v35 = vpop.f32.mrb[53].mxu1  ;;  %v2258_v46 = vld [vmem:[#allocation3 + $0x27] sm:$0xff]  ;;  %v7274_v5 = vld [vmem:[%s8749_s3 + $0x90] sm:$0xff]  }
 0x163   : > { %1501 = vst [vmem:[#allocation2 + $0x288] sm:$0xff] %v1469_v20  ;;  %v7951_v38 = vmax.f32 %v2184_v22, %v2211_v15  ;;  %v2069_v39 = vld [vmem:[#allocation2 + $0x260] ss:$4 sm:$0xff]  ;;  %v2101_v27 = vld [vmem:[#allocation2 + $0x261] ss:$4 sm:$0xff]  ;;  %1854 = vst [vmem:[#allocation2 + $0x388] sm:$0xff] %v1822_v23  ;;  %v1406_v57 = vadd.f32 %v7911_v19, %v1405_v33  ;;  %v1759_v40 = vadd.f32 %v7911_v19, %v1758_v35 }
 0x164   : > { %2240 = vst [vmem:[#allocation3 + $0x98] sm:$0xff] %v7942_v34  ;;  %v2129_v42 = vmax.f32 %v2069_v39, %v2101_v27  ;;  %v2085_v43 = vld [vmem:[#allocation2 + $0x360] ss:$4 sm:$0xff]  ;;  %v2117_v44 = vld [vmem:[#allocation2 + $0x361] ss:$4 sm:$0xff]  ;;  %v2271_v45 = vpack.c.bf16 %v2257_v29, %v2256_v41  ;;  %v1474_v50 = vmax.f32 %v1414_v31, 0.0  ;;  %v2272_v51 = vpack.c.bf16 %v2259_v37, %v2258_v46 }
 0x165   : > { %2248 = vst [vmem:[#allocation3 + $0xd8] sm:$0xff] %v7951_v38  ;;  %v2149_v47 = vld [vmem:[#allocation2 + $0x262] ss:$4 sm:$0xff]  ;;  %v2137_v48 = vmax.f32 %v2085_v43, %v2117_v44  ;;  %v1827_v26 = vmax.f32 %v1767_v32, 0.0  ;;  %v2213_v53 = vld [vmem:[#allocation2 + $0x363] ss:$4 sm:$0xff] }
 0x166   : > { %v2165_v49 = vld [vmem:[#allocation2 + $0x362] ss:$4 sm:$0xff]  ;;  %v2177_v52 = vmax.f32 %v2129_v42, %v2149_v47  ;;  %v1472_v54 = vmax.f32 %v1406_v57, 0.0  ;;  %v1825_v55 = vmax.f32 %v1759_v40, 0.0  ;;  %v6745_v56 = vpop.f32.mrb[54].mxu0  ;;  %v6793_v59 = vpop.f32.mrb[54].mxu1  ;;  %6851 = vmatmul.mubr.bf16.vlgmr.msra.gmra.mrb[64].mxu0 %v2271_v45 }
 0x167   : > { %v2197_v58 = vld [vmem:[#allocation2 + $0x263] ss:$4 sm:$0xff]  ;;  %v2185_v60 = vmax.f32 %v2137_v48, %v2165_v49  ;;  %1506 = vst [vmem:[#allocation2 + $0x2b0] sm:$0xff] %v1474_v50  ;;  %1859 = vst [vmem:[#allocation2 + $0x3b0] sm:$0xff] %v1827_v26  ;;  %v1417_v61 = vadd.f32 %v7911_v19, %v6745_v56  ;;  %v1770_v62 = vadd.f32 %v7911_v19, %v6793_v59  ;;  %v1408_v63 = vpop.f32.mrb[55].mxu0  ;;  %v1761_v1 = vpop.f32.mrb[55].mxu1  ;;  %6854 = vmatprep.mubr.bf16.mxu0 %v2272_v51 }
 0x168   : > { %6867 = vmatpush3.bf16.msra.mxu0 %v7897_v0  ;;  %v2225_v2 = vmax.f32 %v2177_v52, %v2197_v58  ;;  %1504 = vst [vmem:[#allocation2 + $0x2a0] sm:$0xff] %v1472_v54  ;;  %1857 = vst [vmem:[#allocation2 + $0x3a0] sm:$0xff] %v1825_v55  ;;  %v1409_v3 = vadd.f32 %v7911_v19, %v1408_v63  ;;  %v1762_v4 = vadd.f32 %v7911_v19, %v1761_v1  ;;  %v7969_v6 = vld [vmem:[%s8749_s3 + $0x8] sm:$0xff]   ;;  %v2260_v30 = vld [vmem:[#allocation3 + $0x37] sm:$0xff] }
 0x169   : > { %6868 = vmatprep.subr.bf16.mxu0 %v7949_v36  ;;  %v7971_v17 = vmax.f32 %v2185_v60, %v2213_v53  ;;  %v2261_v7 = vld [vmem:[#allocation3 + $0x3f] sm:$0xff]  ;;  %v2262_v12 = vld [vmem:[#allocation3 + $0x47] sm:$0xff]  ;;  %v2263_v13 = vld [vmem:[#allocation3 + $0x4f] sm:$0xff]  ;;  %v1475_v20 = vmax.f32 %v1417_v61, 0.0  ;;  %v1828_v21 = vmax.f32 %v1770_v62, 0.0  ;;  %v6748_v29 = vpop.f32.mrb[56].mxu0 }
 0x16a   : > { %v2071_v0 = vld [vmem:[#allocation2 + $0x280] ss:$4 sm:$0xff]  ;;  %v2103_v24 = vld [vmem:[#allocation2 + $0x281] ss:$4 sm:$0xff]  ;;  %2241 = vst [vmem:[#allocation3 + $0xa0] sm:$0xff] %v2225_v2  ;;  %v2938_v11 = vpack.c.bf16 %v2225_v2, %v7942_v34  ;;  %v1473_v25 = vmax.f32 %v1409_v3, 0.0  ;;  %v2273_v31 = vpack.c.bf16 %v2261_v7, %v2260_v30  ;;  %v1430_v35 = vadd.f32 %v7911_v19, %v6748_v29 }
 0x16b   : > { %v2130_v8 = vmax.f32 %v2071_v0, %v2103_v24  ;;  %v2087_v9 = vld [vmem:[#allocation2 + $0x380] ss:$4 sm:$0xff]  ;;  %v2119_v10 = vld [vmem:[#allocation2 + $0x381] ss:$4 sm:$0xff]  ;;  %2249 = vst [vmem:[#allocation3 + $0xe0] sm:$0xff] %v7971_v17  ;;  %v1826_v28 = vmax.f32 %v1762_v4, 0.0 }
 0x16c   : > { %v7977_v14 = vld [vmem:[%s8749_s3 + $0x98] sm:$0xff]   ;;  %v2138_v16 = vmax.f32 %v2087_v9, %v2119_v10  ;;  %6869 = vmatpush3.bf16.msra.mxu0 %v7949_v36  ;;  %v6796_v34 = vpop.f32.mrb[56].mxu1  ;;  %6915 = vmatmul.mubr.bf16.vlgmr.msra.gmra.mrb[64].mxu1 %v2938_v11  ;;  %1507 = vst [vmem:[#allocation2 + $0x2b8] sm:$0xff] %v1475_v20  ;;  %1860 = vst [vmem:[#allocation2 + $0x3b8] sm:$0xff] %v1828_v21  ;;  %v1421_v39 = vpop.f32.mrb[57].mxu0  ;;  %v2274_v36 = vpack.c.bf16 %v2263_v13, %v2262_v12  ;;  %v7457_v57 = vld [vmem:[%s8749_s3] sm:$0xff]  }
 0x16d   : > { %v2151_v15 = vld [vmem:[#allocation2 + $0x282] ss:$4 sm:$0xff]  ;;  %v2215_v23 = vld [vmem:[#allocation2 + $0x383] ss:$4 sm:$0xff]  ;;  %6870 = vmatprep.subr.bf16.mxu0 %v7274_v5  ;;  %v1783_v37 = vadd.f32 %v7911_v19, %v6796_v34  ;;  %v1774_v27 = vpop.f32.mrb[57].mxu1  ;;  %6931 = vmatpush3.bf16.msra.mxu1 %v7457_v57  ;;  %1505 = vst [vmem:[#allocation2 + $0x2a8] sm:$0xff] %v1473_v25  ;;  %v1422_v41 = vadd.f32 %v7911_v19, %v1421_v39 }
 0x16e   : > { %v2167_v18 = vld [vmem:[#allocation2 + $0x382] ss:$4 sm:$0xff]  ;;  %v2178_v22 = vmax.f32 %v2130_v8, %v2151_v15  ;;  %v2199_v32 = vld [vmem:[#allocation2 + $0x283] ss:$4 sm:$0xff]  ;;  %1858 = vst [vmem:[#allocation2 + $0x3a8] sm:$0xff] %v1826_v28  ;;  %v1775_v42 = vadd.f32 %v7911_v19, %v1774_v27  ;;  %v6749_v43 = vpop.f32.mrb[58].mxu0  ;;  %6855 = vmatmul.mubr.bf16.gmra.mrb[68].mxu0 %v2273_v31  ;;  %6932 = vmatprep.subr.bf16.mxu1 %v7969_v6 }
 0x16f   : > { %v2186_v33 = vmax.f32 %v2138_v16, %v2167_v18  ;;  %v6797_v44 = vpop.f32.mrb[58].mxu1  ;;  %v7282_v45 = vld [vmem:[%s8749_s3 + $0x10] sm:$0xff]   ;;  %v1478_v47 = vmax.f32 %v1430_v35, 0.0  ;;  %v1831_v48 = vmax.f32 %v1783_v37, 0.0  ;;  %v1433_v49 = vadd.f32 %v7911_v19, %v6749_v43  ;;  %v1424_v50 = vpop.f32.mrb[59].mxu0  ;;  %6858 = vmatprep.mubr.bf16.mxu0 %v2274_v36  ;;  %v2265_v55 = vld [vmem:[#allocation3 + $0x5f] sm:$0xff] }
 0x170   : > { %v7986_v40 = vmax.f32 %v2178_v22, %v2199_v32  ;;  %v1777_v26 = vpop.f32.mrb[59].mxu1  ;;  %6871 = vmatpush3.bf16.msra.mxu0 %v7274_v5  ;;  %v1476_v51 = vmax.f32 %v1422_v41, 0.0  ;;  %v1829_v52 = vmax.f32 %v1775_v42, 0.0  ;;  %v1786_v53 = vadd.f32 %v7911_v19, %v6797_v44  ;;  %v7276_v56 = vld [vmem:[%s8749_s3 + $0xa0] sm:$0xff]   ;;  %v8010_v62 = vld [vmem:[%s8749_s3 + $0x18] sm:$0xff]   ;;  %v2267_v24 = vld [vmem:[#allocation3 + $0x6f] sm:$0xff] }
 0x171   : > { %v7994_v46 = vmax.f32 %v2186_v33, %v2215_v23  ;;  %v1425_v54 = vadd.f32 %v7911_v19, %v1424_v50  ;;  %6872 = vmatprep.subr.bf16.mxu0 %v7977_v14  ;;  %1510 = vst [vmem:[#allocation2 + $0x2d0] sm:$0xff] %v1478_v47  ;;  %1863 = vst [vmem:[#allocation2 + $0x3d0] sm:$0xff] %v1831_v48  ;;  %v1479_v59 = vmax.f32 %v1433_v49, 0.0  ;;  %v6752_v60 = vpop.f32.mrb[60].mxu0  ;;  %v6800_v61 = vpop.f32.mrb[60].mxu1  ;;  %6933 = vmatpush3.bf16.msra.mxu1 %v7969_v6  ;;  %v2264_v0 = vld [vmem:[#allocation3 + $0x57] sm:$0xff] }
 0x172   : > { %2242 = vst [vmem:[#allocation3 + $0xa8] sm:$0xff] %v7986_v40  ;;  %v1778_v58 = vadd.f32 %v7911_v19, %v1777_v26  ;;  %1508 = vst [vmem:[#allocation2 + $0x2c0] sm:$0xff] %v1476_v51  ;;  %v1832_v63 = vmax.f32 %v1786_v53, 0.0  ;;  %v1446_v2 = vadd.f32 %v7911_v19, %v6752_v60  ;;  %v1799_v3 = vadd.f32 %v7911_v19, %v6800_v61  ;;  %v1437_v4 = vpop.f32.mrb[61].mxu0  ;;  %v1790_v5 = vpop.f32.mrb[61].mxu1  ;;  %v2266_v20 = vld [vmem:[#allocation3 + $0x67] sm:$0xff] }
 0x173   : > { %2250 = vst [vmem:[#allocation3 + $0xe8] sm:$0xff] %v7994_v46  ;;  %1861 = vst [vmem:[#allocation2 + $0x3c0] sm:$0xff] %v1829_v52  ;;  %v1477_v1 = vmax.f32 %v1425_v54, 0.0  ;;  %6934 = vmatprep.subr.bf16.mxu1 %v7282_v45  ;;  %v1438_v30 = vadd.f32 %v7911_v19, %v1437_v4  ;;  %v1791_v7 = vadd.f32 %v7911_v19, %v1790_v5  ;;  %v6753_v8 = vpop.f32.mrb[62].mxu0  ;;  %v6801_v9 = vpop.f32.mrb[62].mxu1  ;;  %v7277_v21 = vld [vmem:[%s8749_s3 + $0xa8] sm:$0xff]  }
 0x174   : > { %1511 = vst [vmem:[#allocation2 + $0x2d8] sm:$0xff] %v1479_v59  ;;  %v1830_v6 = vmax.f32 %v1778_v58, 0.0  ;;  %6873 = vmatpush3.bf16.msra.mxu0 %v7977_v14  ;;  %v2275_v10 = vpack.c.bf16 %v2265_v55, %v2264_v0  ;;  %1864 = vst [vmem:[#allocation2 + $0x3d8] sm:$0xff] %v1832_v63  ;;  %v1482_v11 = vmax.f32 %v1446_v2, 0.0  ;;  %v1835_v12 = vmax.f32 %v1799_v3, 0.0  ;;  %v1440_v16 = vpop.f32.mrb[63].mxu0 }
 0x175   : > { %1509 = vst [vmem:[#allocation2 + $0x2c8] sm:$0xff] %v1477_v1  ;;  %v1449_v13 = vadd.f32 %v7911_v19, %v6753_v8  ;;  %v1802_v15 = vadd.f32 %v7911_v19, %v6801_v9  ;;  %v1793_v18 = vpop.f32.mrb[63].mxu1  ;;  %6874 = vmatprep.subr.bf16.mxu0 %v7276_v56  ;;  %v2073_v22 = vld [vmem:[#allocation2 + $0x2a0] ss:$4 sm:$0xff]  ;;  %v2105_v23 = vld [vmem:[#allocation2 + $0x2a1] ss:$4 sm:$0xff]  ;;  %v1441_v14 = vadd.f32 %v7911_v19, %v1440_v16 }
 0x176   : > { %1862 = vst [vmem:[#allocation2 + $0x3c8] sm:$0xff] %v1830_v6  ;;  %v1794_v25 = vadd.f32 %v7911_v19, %v1793_v18  ;;  %v2276_v28 = vpack.c.bf16 %v2267_v24, %v2266_v20  ;;  %6935 = vmatpush3.bf16.msra.mxu1 %v7282_v45  ;;  %v2131_v29 = vmax.f32 %v2073_v22, %v2105_v23  ;;  %v2089_v34 = vld [vmem:[#allocation2 + $0x3a0] ss:$4 sm:$0xff]  ;;  %v2121_v31 = vld [vmem:[#allocation2 + $0x3a1] ss:$4 sm:$0xff]  ;;  %1514 = vst [vmem:[#allocation2 + $0x2f0] sm:$0xff] %v1482_v11 }
 0x177   : > { %1867 = vst [vmem:[#allocation2 + $0x3f0] sm:$0xff] %v1835_v12  ;;  %6859 = vmatmul.mubr.bf16.gmra.mrb[72].mxu0 %v2275_v10  ;;  %6936 = vmatprep.subr.bf16.mxu1 %v8010_v62  ;;  %v7284_v32 = vld [vmem:[%s8749_s3 + $0x20] sm:$0xff]   ;;  %v2139_v35 = vmax.f32 %v2089_v34, %v2121_v31  ;;  %v1480_v39 = vmax.f32 %v1438_v30, 0.0  ;;  %v1833_v27 = vmax.f32 %v1791_v7, 0.0  ;;  %v1483_v57 = vmax.f32 %v1449_v13, 0.0  ;;  %v7278_v43 = vld [vmem:[%s8749_s3 + $0xb0] sm:$0xff]  }
 0x178   : > { %v2153_v33 = vld [vmem:[#allocation2 + $0x2a2] ss:$4 sm:$0xff]  ;;  %6862 = vmatprep.mubr.bf16.mxu0 %v2276_v28  ;;  %6875 = vmatpush3.bf16.msra.mxu0 %v7276_v56  ;;  %v2217_v36 = vld [vmem:[#allocation2 + $0x3a3] ss:$4 sm:$0xff]  ;;  %v1836_v41 = vmax.f32 %v1802_v15, 0.0  ;;  %v1481_v42 = vmax.f32 %v1441_v14, 0.0 }
 0x179   : > { %v2169_v37 = vld [vmem:[#allocation2 + $0x3a2] ss:$4 sm:$0xff]  ;;  %v2179_v19 = vmax.f32 %v2131_v29, %v2153_v33  ;;  %6876 = vmatprep.subr.bf16.mxu0 %v7277_v21  ;;  %v2201_v44 = vld [vmem:[#allocation2 + $0x2a3] ss:$4 sm:$0xff]  ;;  %1512 = vst [vmem:[#allocation2 + $0x2e0] sm:$0xff] %v1480_v39  ;;  %1865 = vst [vmem:[#allocation2 + $0x3e0] sm:$0xff] %v1833_v27 }
 0x17a   : > { %v2187_v45 = vmax.f32 %v2139_v35, %v2169_v37  ;;  %v1834_v47 = vmax.f32 %v1794_v25, 0.0  ;;  %v2269_v48 = vld [vmem:[#allocation3 + $0x7f] sm:$0xff]  ;;  %6937 = vmatpush3.bf16.msra.mxu1 %v8010_v62  ;;  %1515 = vst [vmem:[#allocation2 + $0x2f8] sm:$0xff] %v1483_v57  ;;  %1868 = vst [vmem:[#allocation2 + $0x3f8] sm:$0xff] %v1836_v41  ;;  %v2626_v50 = vld [vmem:[#allocation3 + $0x11] sm:$0xff] }
 0x17b   : > { %v2227_v49 = vmax.f32 %v2179_v19, %v2201_v44  ;;  %1513 = vst [vmem:[#allocation2 + $0x2e8] sm:$0xff] %v1481_v42  ;;  %v7279_v26 = vld [vmem:[%s8749_s3 + $0xb8] sm:$0xff]   ;;  %6938 = vmatprep.subr.bf16.mxu1 %v7284_v32  ;;  %v7285_v51 = vld [vmem:[%s8749_s3 + $0x28] sm:$0xff]   ;;  %v7286_v0 = vld [vmem:[%s8749_s3 + $0x30] sm:$0xff]   ;;  %v2942_v44 = vpack.c.bf16 %v7971_v17, %v7951_v38 }
 0x17c   : > { %v8038_v52 = vmax.f32 %v2187_v45, %v2217_v36  ;;  %v2075_v53 = vld [vmem:[#allocation2 + $0x2c0] ss:$4 sm:$0xff]  ;;  %v2107_v54 = vld [vmem:[#allocation2 + $0x2c1] ss:$4 sm:$0xff]  ;;  %1866 = vst [vmem:[#allocation2 + $0x3e8] sm:$0xff] %v1834_v47  ;;  %6877 = vmatpush3.bf16.msra.mxu0 %v7277_v21 }
 0x17d   : > { %v2268_v55 = vld [vmem:[#allocation3 + $0x77] sm:$0xff]  ;;  %2243 = vst [vmem:[#allocation3 + $0xb0] sm:$0xff] %v2227_v49  ;;  %v2132_v56 = vmax.f32 %v2075_v53, %v2107_v54  ;;  %6878 = vmatprep.subr.bf16.mxu0 %v7278_v43  ;;  %v2939_v61 = vpack.c.bf16 %v2227_v49, %v7986_v40  ;;  %v2625_v62 = vld [vmem:[#allocation3 + $0x9] sm:$0xff]  ;;  %v2628_v10 = vld [vmem:[#allocation3 + $0x21] sm:$0xff] }
 0x17e   : > { %v2091_v59 = vld [vmem:[#allocation2 + $0x3c0] ss:$4 sm:$0xff]  ;;  %v2123_v58 = vld [vmem:[#allocation2 + $0x3c1] ss:$4 sm:$0xff]  ;;  %v2277_v60 = vpack.c.bf16 %v2269_v48, %v2268_v55  ;;  %2251 = vst [vmem:[#allocation3 + $0xf0] sm:$0xff] %v8038_v52  ;;  %v2641_v3 = vpack.c.bf16 %v2626_v50, %v2625_v62  ;;  %6939 = vmatpush3.bf16.msra.mxu1 %v7284_v32  ;;  %v2943_v47 = vpack.c.bf16 %v8038_v52, %v7994_v46 }
 0x17f   : > { %v2155_v63 = vld [vmem:[#allocation2 + $0x2c2] ss:$4 sm:$0xff]  ;;  %v2140_v1 = vmax.f32 %v2091_v59, %v2123_v58  ;;  %v2219_v5 = vld [vmem:[#allocation2 + $0x3c3] ss:$4 sm:$0xff]  ;;  %6918 = vmatprep.mubr.bf16.mxu1 %v2939_v61  ;;  %6940 = vmatprep.subr.bf16.mxu1 %v7285_v51 }
 0x180   : > { %v2171_v2 = vld [vmem:[#allocation2 + $0x3c2] ss:$4 sm:$0xff]  ;;  %v2180_v4 = vmax.f32 %v2132_v56, %v2155_v63  ;;  %6863 = vmatmul.mubr.bf16.gmra.mrb[76].mxu0 %v2277_v60  ;;  %v2203_v24 = vld [vmem:[#allocation2 + $0x2c3] ss:$4 sm:$0xff] }
 0x181   : > { %v2188_v6 = vmax.f32 %v2140_v1, %v2171_v2  ;;  %6879 = vmatpush3.bf16.msra.mxu0 %v7278_v43  ;;  %6882 = vmatprep.mubr.bf16.mxu0 %v2641_v3  ;;  %v7287_v30 = vld [vmem:[%s8749_s3 + $0x38] sm:$0xff]   ;;  %v2629_v25 = vld [vmem:[#allocation3 + $0x29] sm:$0xff]  ;;  %v7288_v35 = vld [vmem:[%s8749_s3 + $0x80] sm:$0xff]  }
 0x182   : > { %v2228_v40 = vmax.f32 %v2180_v4, %v2203_v24  ;;  %6880 = vmatprep.subr.bf16.mxu0 %v7279_v26  ;;  %v2077_v8 = vld [vmem:[#allocation2 + $0x2e0] ss:$4 sm:$0xff]  ;;  %v2109_v9 = vld [vmem:[#allocation2 + $0x2e1] ss:$4 sm:$0xff]  ;;  %6941 = vmatpush3.bf16.msra.mxu1 %v7285_v51  ;;  %v2157_v16 = vld [vmem:[#allocation2 + $0x2e2] ss:$4 sm:$0xff] }
 0x183   : > { %v8048_v7 = vmax.f32 %v2188_v6, %v2219_v5  ;;  %v2133_v11 = vmax.f32 %v2077_v8, %v2109_v9  ;;  %v2093_v12 = vld [vmem:[#allocation2 + $0x3e0] ss:$4 sm:$0xff]  ;;  %v2125_v13 = vld [vmem:[#allocation2 + $0x3e1] ss:$4 sm:$0xff]  ;;  %6942 = vmatprep.subr.bf16.mxu1 %v7286_v0  ;;  %v2173_v20 = vld [vmem:[#allocation2 + $0x3e2] ss:$4 sm:$0xff] }
 0x184   : > { %2244 = vst [vmem:[#allocation3 + $0xb8] sm:$0xff] %v2228_v40  ;;  %v2630_v15 = vld [vmem:[#allocation3 + $0x31] sm:$0xff]  ;;  %v2141_v18 = vmax.f32 %v2093_v12, %v2125_v13  ;;  %v2627_v21 = vld [vmem:[#allocation3 + $0x19] sm:$0xff]  ;;  %v2929_v32 = vld [vmem:[#allocation3 + $0xc8] sm:$0xff] }
 0x185   : > { %2252 = vst [vmem:[#allocation3 + $0xf8] sm:$0xff] %v8048_v7  ;;  %6881 = vmatpush3.bf16.msra.mxu0 %v7279_v26  ;;  %v2181_v22 = vmax.f32 %v2133_v11, %v2157_v16  ;;  %v2221_v23 = vld [vmem:[#allocation2 + $0x3e3] ss:$4 sm:$0xff]  ;;  %v2642_v14 = vpack.c.bf16 %v2628_v10, %v2627_v21  ;;  %v2643_v34 = vpack.c.bf16 %v2630_v15, %v2629_v25 }
 0x186   : > { %v2205_v28 = vld [vmem:[#allocation2 + $0x2e3] ss:$4 sm:$0xff]  ;;  %v2189_v29 = vmax.f32 %v2141_v18, %v2173_v20  ;;  %6943 = vmatpush3.bf16.msra.mxu1 %v7286_v0 }
 0x187   : > { %v2229_v31 = vmax.f32 %v2181_v22, %v2205_v28  ;;  %v2930_v33 = vld [vmem:[#allocation3 + $0xd0] sm:$0xff]  ;;  %6944 = vmatprep.subr.bf16.mxu1 %v7287_v30  ;;  %v2631_v27 = vld [vmem:[#allocation3 + $0x39] sm:$0xff]  ;;  %v2632_v19 = vld [vmem:[#allocation3 + $0x41] sm:$0xff] }
 0x188   : > { %6883 = vmatmul.mubr.bf16.vlgmr.msra.gmra.mrb[64].mxu0 %v2642_v14  ;;  %v2237_v37 = vmax.f32 %v2189_v29, %v2221_v23  ;;  %v2941_v36 = vpack.c.bf16 %v2930_v33, %v2929_v32  ;;  %v2634_v57 = vld [vmem:[#allocation3 + $0x51] sm:$0xff]  ;;  %v2644_v41 = vpack.c.bf16 %v2632_v19, %v2631_v27  ;;  %v2633_v42 = vld [vmem:[#allocation3 + $0x49] sm:$0xff]  ;;  %v2636_v45 = vld [vmem:[#allocation3 + $0x61] sm:$0xff] }
 0x189   : > { %6886 = vmatprep.mubr.bf16.mxu0 %v2643_v34  ;;  %2245 = vst [vmem:[#allocation3 + $0xc0] sm:$0xff] %v2229_v31  ;;  %v2940_v39 = vpack.c.bf16 %v2229_v31, %v2228_v40  ;;  %v2645_v43 = vpack.c.bf16 %v2634_v57, %v2633_v42  ;;  %v2638_v48 = vld [vmem:[#allocation3 + $0x71] sm:$0xff]  ;;  %v2635_v49 = vld [vmem:[#allocation3 + $0x59] sm:$0xff]  ;;  %v2637_v26 = vld [vmem:[#allocation3 + $0x69] sm:$0xff] }
 0x18a   : > { %2253 = vst [vmem:[#allocation3 + $0x100] sm:$0xff] %v2237_v37  ;;  %6945 = vmatpush3.bf16.msra.mxu1 %v7287_v30  ;;  %v2646_v50 = vpack.c.bf16 %v2636_v45, %v2635_v49  ;;  %v2647_v51 = vpack.c.bf16 %v2638_v48, %v2637_v26  ;;  %v2882_v53 = vld [vmem:[#allocation3 + $0x8f] sm:$0xff]  ;;  %v2944_v54 = vpack.c.bf16 %v2237_v37, %v8048_v7  ;;  %v2881_v55 = vld [vmem:[#allocation3 + $0x87] sm:$0xff]  ;;  %v2639_v38 = vld [vmem:[#allocation3 + $0x79] sm:$0xff] }
 0x18b   : > { %6919 = vmatmul.mubr.bf16.gmra.mrb[68].mxu1 %v2940_v39  ;;  %6962 = vmatprep.subr.bf16.mxu1 %v7288_v35  ;;  %v2640_v56 = vld [vmem:[#allocation3 + $0x81] sm:$0xff]  ;;  %v2897_v59 = vpack.c.bf16 %v2882_v53, %v2881_v55  ;;  %v2886_v52 = vld [vmem:[#allocation3 + $0xaf] sm:$0xff]  ;;  %v2883_v58 = vld [vmem:[#allocation3 + $0x97] sm:$0xff] }
 0x18c   : > { %6922 = vmatprep.mubr.bf16.mxu1 %v2941_v36  ;;  %v2648_v17 = vpack.c.bf16 %v2640_v56, %v2639_v38  ;;  %v2884_v46 = vld [vmem:[#allocation3 + $0x9f] sm:$0xff]  ;;  %v2885_v61 = vld [vmem:[#allocation3 + $0xa7] sm:$0xff]  ;;  %v7290_v1 = vld [vmem:[%s8749_s3 + $0x90] sm:$0xff]  }
 0x18d   : > { %v2898_v60 = vpack.c.bf16 %v2884_v46, %v2883_v58  ;;  %v7289_v62 = vld [vmem:[%s8749_s3 + $0x88] sm:$0xff]   ;;  %v2899_v63 = vpack.c.bf16 %v2886_v52, %v2885_v61  ;;  %v2887_v4 = vld [vmem:[#allocation3 + $0xb7] sm:$0xff]  ;;  %v7292_v40 = vld [vmem:[%s8749_s3 + $0xa0] sm:$0xff]  }
 0x18e   : > { %v2890_v0 = vld [vmem:[#allocation3 + $0xcf] sm:$0xff]  ;;  %v7291_v24 = vld [vmem:[%s8749_s3 + $0x98] sm:$0xff]   ;;  %v2893_v10 = vld [vmem:[#allocation3 + $0xe7] sm:$0xff] }
 0x18f   : > { %v2892_v30 = vld [vmem:[#allocation3 + $0xdf] sm:$0xff]  ;;  %v2894_v7 = vld [vmem:[#allocation3 + $0xef] sm:$0xff]  ;;  %v2891_v8 = vld [vmem:[#allocation3 + $0xd7] sm:$0xff] }
 0x190   : > { %6887 = vmatmul.mubr.bf16.gmra.mrb[68].mxu0 %v2644_v41  ;;  %v2888_v2 = vld [vmem:[#allocation3 + $0xbf] sm:$0xff]  ;;  %v2889_v3 = vld [vmem:[#allocation3 + $0xc7] sm:$0xff]  ;;  %v2902_v9 = vpack.c.bf16 %v2892_v30, %v2891_v8  ;;  %v2903_v12 = vpack.c.bf16 %v2894_v7, %v2893_v10  ;;  %v7294_v13 = vld [vmem:[%s8749_s3 + $0xb0] sm:$0xff]  }
 0x191   : > { %6890 = vmatprep.mubr.bf16.mxu0 %v2645_v43  ;;  %v2900_v5 = vpack.c.bf16 %v2888_v2, %v2887_v4  ;;  %v2901_v6 = vpack.c.bf16 %v2890_v0, %v2889_v3  ;;  %v7293_v11 = vld [vmem:[%s8749_s3 + $0xa8] sm:$0xff]   ;;  %v2896_v15 = vld [vmem:[#allocation3 + $0xff] sm:$0xff]  ;;  %v3252_v16 = vld [vmem:[#allocation3 + $0x91] sm:$0xff] }
 0x192   : > { %v2895_v18 = vld [vmem:[#allocation3 + $0xf7] sm:$0xff]  ;;  %v3251_v21 = vld [vmem:[#allocation3 + $0x89] sm:$0xff]  ;;  %v3254_v14 = vld [vmem:[#allocation3 + $0xa1] sm:$0xff] }
 0x193   : > { %6923 = vmatmul.mubr.bf16.gmra.mrb[72].mxu1 %v2942_v44  ;;  %v2904_v20 = vpack.c.bf16 %v2896_v15, %v2895_v18  ;;  %v7295_v22 = vld [vmem:[%s8749_s3 + $0xb8] sm:$0xff]   ;;  %v3267_v23 = vpack.c.bf16 %v3252_v16, %v3251_v21  ;;  %v3255_v34 = vld [vmem:[#allocation3 + $0xa9] sm:$0xff]  ;;  %v3258_v33 = vld [vmem:[#allocation3 + $0xc1] sm:$0xff] }
 0x194   : > { %6926 = vmatprep.mubr.bf16.mxu1 %v2943_v47  ;;  %v3256_v25 = vld [vmem:[#allocation3 + $0xb1] sm:$0xff]  ;;  %v3253_v28 = vld [vmem:[#allocation3 + $0x99] sm:$0xff]  ;;  %v3259_v39 = vld [vmem:[#allocation3 + $0xc9] sm:$0xff] }
 0x195   : > { %v3268_v29 = vpack.c.bf16 %v3254_v14, %v3253_v28  ;;  %v3269_v31 = vpack.c.bf16 %v3256_v25, %v3255_v34  ;;  %v3257_v32 = vld [vmem:[#allocation3 + $0xb9] sm:$0xff]  ;;  %v3262_v19 = vld [vmem:[#allocation3 + $0xe1] sm:$0xff]  ;;  %v3264_v36 = vld [vmem:[#allocation3 + $0xf1] sm:$0xff] }
 0x196   : > { %v3270_v37 = vpack.c.bf16 %v3258_v33, %v3257_v32  ;;  %v3261_v57 = vld [vmem:[#allocation3 + $0xd9] sm:$0xff]  ;;  %v3263_v42 = vld [vmem:[#allocation3 + $0xe9] sm:$0xff]  ;;  %v3266_v45 = vld [vmem:[#allocation3 + $0x101] sm:$0xff] }
 0x197   : > { %v3272_v41 = vpack.c.bf16 %v3262_v19, %v3261_v57  ;;  %v3273_v43 = vpack.c.bf16 %v3264_v36, %v3263_v42  ;;  %v3265_v44 = vld [vmem:[#allocation3 + $0xf9] sm:$0xff]  ;;  %v7297_v49 = vld [vmem:[%s8751_s5 + $0x48] sm:$0xff]  }
 0x198   : > { %6891 = vmatmul.mubr.bf16.gmra.mrb[72].mxu0 %v2646_v50  ;;  %v3274_v47 = vpack.c.bf16 %v3266_v45, %v3265_v44  ;;  %v7296_v48 = vld [vmem:[%s8751_s5 + $0x40] sm:$0xff]   ;;  %v7298_v50 = vld [vmem:[%s8751_s5 + $0x50] sm:$0xff]   ;;  %v7299_v26 = vld [vmem:[%s8751_s5 + $0x58] sm:$0xff]  }
 0x199   : > { %6894 = vmatprep.mubr.bf16.mxu0 %v2647_v51  ;;  %6994 = vmatprep.subr.bf16.mxu0 %v7296_v48  ;;  %v7300_v51 = vld [vmem:[%s8751_s5 + $0x60] sm:$0xff]   ;;  %v7301_v53 = vld [vmem:[%s8751_s5 + $0x68] sm:$0xff]   ;;  %v7303_v55 = vld [vmem:[%s8751_s5 + $0x78] sm:$0xff]  }
 0x19a   : > { %6995 = vmatpush3.bf16.msra.mxu0 %v7296_v48  ;;  %v8107_v56 = vld [vmem:[%s8751_s5] sm:$0xff]  }
 0x19b   : > { %6927 = vmatmul.mubr.bf16.gmra.mrb[76].mxu1 %v2944_v54  ;;  %6996 = vmatprep.subr.bf16.mxu0 %v7297_v49  ;;  %v7302_v54 = vld [vmem:[%s8751_s5 + $0x70] sm:$0xff]  }
 0x19c   : > { %6946 = vmatprep.mubr.bf16.mxu1 %v2897_v59  ;;  %v8113_v59 = vld [vmem:[%s8750_s4] ss:$0 sm:$0xff] }
 0x19e   : > { %6997 = vmatpush3.bf16.msra.mxu0 %v7297_v49 }
 0x19f   : > { %6998 = vmatprep.subr.bf16.mxu0 %v7298_v50 }
 0x1a0   : > { %6895 = vmatmul.mubr.bf16.gmra.mrb[76].mxu0 %v2648_v17 }
 0x1a2   : > { %6999 = vmatpush3.bf16.msra.mxu0 %v7298_v50 }
 0x1a3   : > { %6947 = vmatmul.mubr.bf16.vlgmr.msra.gmra.mrb[64].mxu1 %v2898_v60  ;;  %7000 = vmatprep.subr.bf16.mxu0 %v7299_v26 }
 0x1a4   : > { %6950 = vmatprep.mubr.bf16.mxu1 %v2899_v63  ;;  %6963 = vmatpush3.bf16.msra.mxu1 %v7288_v35  ;;  %v3260_v35 = vld [vmem:[#allocation3 + $0xd1] sm:$0xff] }
 0x1a5   : > { %6964 = vmatprep.subr.bf16.mxu1 %v7289_v62  ;;  %v3271_v27 = vpack.c.bf16 %v3260_v35, %v3259_v39 }
 0x1a6   : > { %7001 = vmatpush3.bf16.msra.mxu0 %v7299_v26 }
 0x1a7   : > { %7002 = vmatprep.subr.bf16.mxu0 %v7300_v51 }
 0x1a8   : > { %6965 = vmatpush3.bf16.msra.mxu1 %v7289_v62 }
 0x1a9   : > { %6966 = vmatprep.subr.bf16.mxu1 %v7290_v1 }
 0x1aa   : > { %7003 = vmatpush3.bf16.msra.mxu0 %v7300_v51 }
 0x1ab   : > { %6951 = vmatmul.mubr.bf16.gmra.mrb[68].mxu1 %v2900_v5  ;;  %7004 = vmatprep.subr.bf16.mxu0 %v7301_v53 }
 0x1ac   : > { %6954 = vmatprep.mubr.bf16.mxu1 %v2901_v6  ;;  %6967 = vmatpush3.bf16.msra.mxu1 %v7290_v1 }
 0x1ad   : > { %6968 = vmatprep.subr.bf16.mxu1 %v7291_v24 }
 0x1ae   : > { %7005 = vmatpush3.bf16.msra.mxu0 %v7301_v53 }
 0x1af   : > { %7006 = vmatprep.subr.bf16.mxu0 %v7302_v54 }
 0x1b0   : > { %6969 = vmatpush3.bf16.msra.mxu1 %v7291_v24 }
 0x1b1   : > { %6970 = vmatprep.subr.bf16.mxu1 %v7292_v40 }
 0x1b2   : > { %7007 = vmatpush3.bf16.msra.mxu0 %v7302_v54 }
 0x1b3   : > { %6955 = vmatmul.mubr.bf16.gmra.mrb[72].mxu1 %v2902_v9  ;;  %7008 = vmatprep.subr.bf16.mxu0 %v7303_v55 }
 0x1b4   : > { %6958 = vmatprep.mubr.bf16.mxu1 %v2903_v12  ;;  %6971 = vmatpush3.bf16.msra.mxu1 %v7292_v40 }
 0x1b5   : > { %6972 = vmatprep.subr.bf16.mxu1 %v7293_v11 }
 0x1b6   : > { %7009 = vmatpush3.bf16.msra.mxu0 %v7303_v55 }
 0x1b7   : > { %7018 = vmatprep.subr.bf16.mxu0 %v8107_v56 }
 0x1b8   : > { %6973 = vmatpush3.bf16.msra.mxu1 %v7293_v11 }
 0x1b9   : > { %6974 = vmatprep.subr.bf16.mxu1 %v7294_v13 }
 0x1bb   : > { %6959 = vmatmul.mubr.bf16.gmra.mrb[76].mxu1 %v2904_v20 }
 0x1bc   : > { %6975 = vmatpush3.bf16.msra.mxu1 %v7294_v13  ;;  %6978 = vmatprep.mubr.bf16.mxu1 %v3267_v23 }
 0x1bd   : > { %6976 = vmatprep.subr.bf16.mxu1 %v7295_v22 }
 0x1c0   : > { %6977 = vmatpush3.bf16.msra.mxu1 %v7295_v22 }
 0x1c3   : > { %6979 = vmatmul.mubr.bf16.vlgmr.msra.gmra.mrb[64].mxu1 %v3268_v29 }
 0x1c4   : > { %6982 = vmatprep.mubr.bf16.mxu1 %v3269_v31 }
 0x1cb   : > { %6983 = vmatmul.mubr.bf16.gmra.mrb[68].mxu1 %v3270_v37 }
 0x1cc   : > { %6986 = vmatprep.mubr.bf16.mxu1 %v3271_v27 }
 0x1d3   : > { %6987 = vmatmul.mubr.bf16.gmra.mrb[72].mxu1 %v3272_v41 }
 0x1d4   : > { %6990 = vmatprep.mubr.bf16.mxu1 %v3273_v43 }
 0x1db   : > { %6991 = vmatmul.mubr.bf16.gmra.mrb[76].mxu1 %v3274_v47 }
 0x25b   : > { %v6884_v38 = vpop.f32.mrb[64].mxu0 }
 0x25c   : > { %v2835_v17 = vadd.f32 %v6884_v38, %v8113_v59  ;;  %v2748_v46 = vpop.f32.mrb[65].mxu0 }
 0x25d   : > { %v2833_v52 = vadd.f32 %v8113_v59, %v2748_v46  ;;  %v6885_v58 = vpop.f32.mrb[66].mxu0 }
 0x25e   : > { %v2851_v60 = vmax.f32 %v2835_v17, 0.0  ;;  %v2836_v61 = vadd.f32 %v6885_v58, %v8113_v59  ;;  %v2751_v62 = vpop.f32.mrb[67].mxu0 }
 0x25f   : > { %v2849_v63 = vmax.f32 %v2833_v52, 0.0  ;;  %v2834_v1 = vadd.f32 %v8113_v59, %v2751_v62 }
 0x260   : > { %2867 = vst [vmem:[#allocation4 + $0x10] sm:$0xff] %v2851_v60  ;;  %v2852_v2 = vmax.f32 %v2836_v61, 0.0 }
 0x261   : > { %2865 = vst [vmem:[#allocation4] sm:$0xff] %v2849_v63  ;;  %v2850_v3 = vmax.f32 %v2834_v1, 0.0 }
 0x262   : > { %2868 = vst [vmem:[#allocation4 + $0x18] sm:$0xff] %v2852_v2 }
 0x263   : > { %2866 = vst [vmem:[#allocation4 + $0x8] sm:$0xff] %v2850_v3  ;;  %v6888_v4 = vpop.f32.mrb[68].mxu0 }
 0x264   : > { %v2839_v5 = vadd.f32 %v6888_v4, %v8113_v59  ;;  %v2764_v0 = vpop.f32.mrb[69].mxu0 }
 0x265   : > { %v2837_v24 = vadd.f32 %v8113_v59, %v2764_v0  ;;  %v6889_v6 = vpop.f32.mrb[70].mxu0 }
 0x266   : > { %v2855_v40 = vmax.f32 %v2839_v5, 0.0  ;;  %v2840_v30 = vadd.f32 %v6889_v6, %v8113_v59  ;;  %v2767_v7 = vpop.f32.mrb[71].mxu0  ;;  %v7305_v6 = vld [vmem:[%s8751_s5 + $0x8] sm:$0xff]  }
 0x267   : > { %v2853_v8 = vmax.f32 %v2837_v24, 0.0  ;;  %v2838_v9 = vadd.f32 %v8113_v59, %v2767_v7  ;;  %v7308_v7 = vld [vmem:[%s8751_s5 + $0x20] sm:$0xff]  }
 0x268   : > { %2871 = vst [vmem:[#allocation4 + $0x30] sm:$0xff] %v2855_v40  ;;  %v2856_v10 = vmax.f32 %v2840_v30, 0.0  ;;  %v7306_v40 = vld [vmem:[%s8751_s5 + $0x10] sm:$0xff]   ;;  %v7307_v30 = vld [vmem:[%s8751_s5 + $0x18] sm:$0xff]  }
 0x269   : > { %2869 = vst [vmem:[#allocation4 + $0x20] sm:$0xff] %v2853_v8  ;;  %v2854_v11 = vmax.f32 %v2838_v9, 0.0 }
 0x26a   : > { %v3502_v12 = vld [vmem:[#allocation4] ss:$4 sm:$0xff]  ;;  %v3518_v13 = vld [vmem:[#allocation4 + $0x1] ss:$4 sm:$0xff]  ;;  %2872 = vst [vmem:[#allocation4 + $0x38] sm:$0xff] %v2856_v10 }
 0x26b   : > { %v3533_v15 = vmax.f32 %v3502_v12, %v3518_v13  ;;  %2870 = vst [vmem:[#allocation4 + $0x28] sm:$0xff] %v2854_v11  ;;  %v6892_v16 = vpop.f32.mrb[72].mxu0  ;;  %v3542_v18 = vld [vmem:[#allocation4 + $0x2] ss:$4 sm:$0xff]  ;;  %v3566_v25 = vld [vmem:[#allocation4 + $0x3] ss:$4 sm:$0xff] }
 0x26c   : > { %v2843_v20 = vadd.f32 %v6892_v16, %v8113_v59  ;;  %v2780_v21 = vpop.f32.mrb[73].mxu0  ;;  %v7309_v12 = vld [vmem:[%s8751_s5 + $0x28] sm:$0xff]  }
 0x26d   : > { %v3557_v22 = vmax.f32 %v3533_v15, %v3542_v18  ;;  %v2841_v23 = vadd.f32 %v8113_v59, %v2780_v21  ;;  %v6893_v14 = vpop.f32.mrb[74].mxu0 }
 0x26e   : > { %v2859_v28 = vmax.f32 %v2843_v20, 0.0  ;;  %v2844_v29 = vadd.f32 %v6893_v14, %v8113_v59  ;;  %v2783_v34 = vpop.f32.mrb[75].mxu0 }
 0x26f   : > { %v3581_v31 = vmax.f32 %v3557_v22, %v3566_v25  ;;  %v2857_v32 = vmax.f32 %v2841_v23, 0.0  ;;  %v2842_v33 = vadd.f32 %v8113_v59, %v2783_v34  ;;  %v7310_v23 = vld [vmem:[%s8751_s5 + $0x30] sm:$0xff]  }
 0x270   : > { %2875 = vst [vmem:[#allocation4 + $0x50] sm:$0xff] %v2859_v28  ;;  %v2860_v35 = vmax.f32 %v2844_v29, 0.0 }
 0x271   : > { %3589 = vst [vmem:[#allocation5 + $0x8] sm:$0xff] %v3581_v31  ;;  %2873 = vst [vmem:[#allocation4 + $0x40] sm:$0xff] %v2857_v32  ;;  %v2858_v37 = vmax.f32 %v2842_v33, 0.0 }
 0x272   : > { %v3504_v39 = vld [vmem:[#allocation4 + $0x20] ss:$4 sm:$0xff]  ;;  %v3520_v27 = vld [vmem:[#allocation4 + $0x21] ss:$4 sm:$0xff]  ;;  %2876 = vst [vmem:[#allocation4 + $0x58] sm:$0xff] %v2860_v35 }
 0x273   : > { %v3534_v19 = vmax.f32 %v3504_v39, %v3520_v27  ;;  %2874 = vst [vmem:[#allocation4 + $0x48] sm:$0xff] %v2858_v37  ;;  %v6896_v36 = vpop.f32.mrb[76].mxu0  ;;  %v3544_v57 = vld [vmem:[#allocation4 + $0x22] ss:$4 sm:$0xff]  ;;  %v3568_v47 = vld [vmem:[#allocation4 + $0x23] ss:$4 sm:$0xff] }
 0x274   : > { %v2847_v41 = vadd.f32 %v6896_v36, %v8113_v59  ;;  %v2796_v42 = vpop.f32.mrb[77].mxu0  ;;  %v8164_v36 = vld [vmem:[%s8751_s5 + $0x80] sm:$0xff]  }
 0x275   : > { %v3558_v43 = vmax.f32 %v3534_v19, %v3544_v57  ;;  %v2845_v44 = vadd.f32 %v8113_v59, %v2796_v42  ;;  %v6897_v45 = vpop.f32.mrb[78].mxu0 }
 0x276   : > { %v2863_v48 = vmax.f32 %v2847_v41, 0.0  ;;  %v2848_v49 = vadd.f32 %v6897_v45, %v8113_v59  ;;  %v2799_v50 = vpop.f32.mrb[79].mxu0 }
 0x277   : > { %v3582_v26 = vmax.f32 %v3558_v43, %v3568_v47  ;;  %v2861_v51 = vmax.f32 %v2845_v44, 0.0  ;;  %v2846_v53 = vadd.f32 %v8113_v59, %v2799_v50 }
 0x278   : > { %2879 = vst [vmem:[#allocation4 + $0x70] sm:$0xff] %v2863_v48  ;;  %v2864_v54 = vmax.f32 %v2848_v49, 0.0 }
 0x279   : > { %3590 = vst [vmem:[#allocation5 + $0x10] sm:$0xff] %v3582_v26  ;;  %2877 = vst [vmem:[#allocation4 + $0x60] sm:$0xff] %v2861_v51  ;;  %v2862_v55 = vmax.f32 %v2846_v53, 0.0  ;;  %v3633_v38 = vpack.c.bf16 %v3582_v26, %v3581_v31  ;;  %v7311_v31 = vld [vmem:[%s8751_s5 + $0x38] sm:$0xff]  }
 0x27a   : > { %v3506_v17 = vld [vmem:[#allocation4 + $0x40] ss:$4 sm:$0xff]  ;;  %v3522_v46 = vld [vmem:[#allocation4 + $0x41] ss:$4 sm:$0xff]  ;;  %2880 = vst [vmem:[#allocation4 + $0x78] sm:$0xff] %v2864_v54 }
 0x27b   : > { %v3535_v52 = vmax.f32 %v3506_v17, %v3522_v46  ;;  %2878 = vst [vmem:[#allocation4 + $0x68] sm:$0xff] %v2862_v55  ;;  %7010 = vmatprep.mubr.bf16.mxu0 %v3633_v38  ;;  %v3546_v58 = vld [vmem:[#allocation4 + $0x42] ss:$4 sm:$0xff]  ;;  %v3570_v61 = vld [vmem:[#allocation4 + $0x43] ss:$4 sm:$0xff] }
 0x27d   : > { %v3559_v60 = vmax.f32 %v3535_v52, %v3546_v58 }
 0x27f   : > { %v3583_v62 = vmax.f32 %v3559_v60, %v3570_v61 }
 0x281   : > { %3591 = vst [vmem:[#allocation5 + $0x18] sm:$0xff] %v3583_v62 }
 0x282   : > { %v3508_v63 = vld [vmem:[#allocation4 + $0x60] ss:$4 sm:$0xff]  ;;  %v3524_v1 = vld [vmem:[#allocation4 + $0x61] ss:$4 sm:$0xff]  ;;  %v3548_v3 = vld [vmem:[#allocation4 + $0x62] ss:$4 sm:$0xff] }
 0x283   : > { %v3536_v2 = vmax.f32 %v3508_v63, %v3524_v1  ;;  %v3572_v5 = vld [vmem:[#allocation4 + $0x63] ss:$4 sm:$0xff] }
 0x285   : > { %v3560_v4 = vmax.f32 %v3536_v2, %v3548_v3 }
 0x287   : > { %v3584_v0 = vmax.f32 %v3560_v4, %v3572_v5 }
 0x289   : > { %3592 = vst [vmem:[#allocation5 + $0x20] sm:$0xff] %v3584_v0  ;;  %v3634_v24 = vpack.c.bf16 %v3584_v0, %v3583_v62 }
 0x28b   : > { %7011 = vmatmul.mubr.bf16.vlgmr.msra.gmra.mrb[80].mxu0 %v3634_v24 }
 0x28c   : > { %7019 = vmatpush3.bf16.msra.mxu0 %v8107_v56 }
 0x28d   : > { %7020 = vmatprep.subr.bf16.mxu0 %v7305_v6 }
 0x290   : > { %7021 = vmatpush3.bf16.msra.mxu0 %v7305_v6 }
 0x291   : > { %7022 = vmatprep.subr.bf16.mxu0 %v7306_v40 }
 0x294   : > { %7023 = vmatpush3.bf16.msra.mxu0 %v7306_v40 }
 0x295   : > { %7024 = vmatprep.subr.bf16.mxu0 %v7307_v30 }
 0x296   : > { %v6980_v8 = vpop.f32.mrb[64].mxu1 }
 0x297   : > { %v3454_v56 = vadd.f32 %v6980_v8, %v8113_v59  ;;  %v3373_v9 = vpop.f32.mrb[65].mxu1 }
 0x298   : > { %7025 = vmatpush3.bf16.msra.mxu0 %v7307_v30  ;;  %v3452_v10 = vadd.f32 %v8113_v59, %v3373_v9  ;;  %v6981_v11 = vpop.f32.mrb[66].mxu1 }
 0x299   : > { %7026 = vmatprep.subr.bf16.mxu0 %v7308_v7  ;;  %v3470_v13 = vmax.f32 %v3454_v56, 0.0  ;;  %v3455_v15 = vadd.f32 %v6981_v11, %v8113_v59  ;;  %v3376_v16 = vpop.f32.mrb[67].mxu1 }
 0x29a   : > { %v3468_v18 = vmax.f32 %v3452_v10, 0.0  ;;  %v3453_v20 = vadd.f32 %v8113_v59, %v3376_v16 }
 0x29b   : > { %3486 = vst [vmem:[#allocation4 + $0x90] sm:$0xff] %v3470_v13  ;;  %v3471_v21 = vmax.f32 %v3455_v15, 0.0 }
 0x29c   : > { %7027 = vmatpush3.bf16.msra.mxu0 %v7308_v7  ;;  %3484 = vst [vmem:[#allocation4 + $0x80] sm:$0xff] %v3468_v18  ;;  %v3469_v22 = vmax.f32 %v3453_v20, 0.0 }
 0x29d   : > { %7028 = vmatprep.subr.bf16.mxu0 %v7309_v12  ;;  %3487 = vst [vmem:[#allocation4 + $0x98] sm:$0xff] %v3471_v21 }
 0x29e   : > { %3485 = vst [vmem:[#allocation4 + $0x88] sm:$0xff] %v3469_v22  ;;  %v6984_v14 = vpop.f32.mrb[68].mxu1 }
 0x29f   : > { %v3458_v25 = vadd.f32 %v6984_v14, %v8113_v59  ;;  %v3389_v28 = vpop.f32.mrb[69].mxu1 }
 0x2a0   : > { %7029 = vmatpush3.bf16.msra.mxu0 %v7309_v12  ;;  %v3456_v29 = vadd.f32 %v8113_v59, %v3389_v28  ;;  %v6985_v34 = vpop.f32.mrb[70].mxu1 }
 0x2a1   : > { %7030 = vmatprep.subr.bf16.mxu0 %v7310_v23  ;;  %v3474_v32 = vmax.f32 %v3458_v25, 0.0  ;;  %v3459_v33 = vadd.f32 %v6985_v34, %v8113_v59  ;;  %v3392_v35 = vpop.f32.mrb[71].mxu1 }
 0x2a2   : > { %v3472_v37 = vmax.f32 %v3456_v29, 0.0  ;;  %v3457_v39 = vadd.f32 %v8113_v59, %v3392_v35  ;;  %v3598_v29 = vld [vmem:[#allocation5 + $0xf] sm:$0xff] }
 0x2a3   : > { %3490 = vst [vmem:[#allocation4 + $0xb0] sm:$0xff] %v3474_v32  ;;  %v3475_v27 = vmax.f32 %v3459_v33, 0.0  ;;  %v3600_v33 = vld [vmem:[#allocation5 + $0x1f] sm:$0xff] }
 0x2a4   : > { %7031 = vmatpush3.bf16.msra.mxu0 %v7310_v23  ;;  %3488 = vst [vmem:[#allocation4 + $0xa0] sm:$0xff] %v3472_v37  ;;  %v3473_v19 = vmax.f32 %v3457_v39, 0.0  ;;  %v3599_v37 = vld [vmem:[#allocation5 + $0x17] sm:$0xff] }
 0x2a5   : > { %7032 = vmatprep.subr.bf16.mxu0 %v7311_v31  ;;  %v3510_v57 = vld [vmem:[#allocation4 + $0x80] ss:$4 sm:$0xff]  ;;  %v3526_v41 = vld [vmem:[#allocation4 + $0x81] ss:$4 sm:$0xff]  ;;  %3491 = vst [vmem:[#allocation4 + $0xb8] sm:$0xff] %v3475_v27  ;;  %v3606_v39 = vpack.c.bf16 %v3600_v33, %v3599_v37 }
 0x2a6   : > { %v3537_v42 = vmax.f32 %v3510_v57, %v3526_v41  ;;  %3489 = vst [vmem:[#allocation4 + $0xa8] sm:$0xff] %v3473_v19  ;;  %v6988_v43 = vpop.f32.mrb[72].mxu1  ;;  %v3550_v44 = vld [vmem:[#allocation4 + $0x82] ss:$4 sm:$0xff]  ;;  %v3574_v26 = vld [vmem:[#allocation4 + $0x83] ss:$4 sm:$0xff] }
 0x2a7   : > { %v3462_v45 = vadd.f32 %v6988_v43, %v8113_v59  ;;  %v3405_v47 = vpop.f32.mrb[73].mxu1  ;;  %v7313_v19 = vld [vmem:[%s8751_s5 + $0x88] sm:$0xff]   ;;  %v7314_v41 = vld [vmem:[%s8751_s5 + $0x90] sm:$0xff]  }
 0x2a8   : > { %7033 = vmatpush3.bf16.msra.mxu0 %v7311_v31  ;;  %v3561_v48 = vmax.f32 %v3537_v42, %v3550_v44  ;;  %v3460_v49 = vadd.f32 %v8113_v59, %v3405_v47  ;;  %v6989_v50 = vpop.f32.mrb[74].mxu1  ;;  %v3597_v31 = vld [vmem:[#allocation5 + $0x7] sm:$0xff]  ;;  %v3881_v43 = vld [vmem:[#allocation5 + $0x11] sm:$0xff] }
 0x2a9   : > { %7042 = vmatprep.subr.bf16.mxu0 %v8164_v36  ;;  %v3478_v51 = vmax.f32 %v3462_v45, 0.0  ;;  %v3463_v53 = vadd.f32 %v6989_v50, %v8113_v59  ;;  %v3408_v54 = vpop.f32.mrb[75].mxu1  ;;  %v3605_v32 = vpack.c.bf16 %v3598_v29, %v3597_v31  ;;  %v3880_v47 = vld [vmem:[#allocation5 + $0x9] sm:$0xff]  ;;  %v7317_v50 = vld [vmem:[%s8751_s5 + $0xa8] sm:$0xff]  }
 0x2aa   : > { %v3585_v55 = vmax.f32 %v3561_v48, %v3574_v26  ;;  %v3476_v38 = vmax.f32 %v3460_v49, 0.0  ;;  %v3461_v17 = vadd.f32 %v8113_v59, %v3408_v54  ;;  %v7315_v48 = vld [vmem:[%s8751_s5 + $0x98] sm:$0xff]   ;;  %v3888_v49 = vpack.c.bf16 %v3881_v43, %v3880_v47  ;;  %v7318_v26 = vld [vmem:[%s8751_s5 + $0xb0] sm:$0xff]   ;;  %v7352_v29 = vld [vmem:[%s8753_s7 + $0xc0] sm:$0xff]  }
 0x2ab   : > { %3494 = vst [vmem:[#allocation4 + $0xd0] sm:$0xff] %v3478_v51  ;;  %v3479_v46 = vmax.f32 %v3463_v53, 0.0  ;;  %v7319_v51 = vld [vmem:[%s8751_s5 + $0xb8] sm:$0xff]   ;;  %v6057_v31 = vld [vmem:[%s8752_s6] ss:$0 sm:$0xff] }
 0x2ac   : > { %3593 = vst [vmem:[#allocation5 + $0x28] sm:$0xff] %v3585_v55  ;;  %3492 = vst [vmem:[#allocation4 + $0xc0] sm:$0xff] %v3476_v38  ;;  %v3477_v52 = vmax.f32 %v3461_v17, 0.0 }
 0x2ad   : > { %v3512_v58 = vld [vmem:[#allocation4 + $0xa0] ss:$4 sm:$0xff]  ;;  %v3528_v60 = vld [vmem:[#allocation4 + $0xa1] ss:$4 sm:$0xff]  ;;  %3495 = vst [vmem:[#allocation4 + $0xd8] sm:$0xff] %v3479_v46 }
 0x2ae   : > { %v3538_v61 = vmax.f32 %v3512_v58, %v3528_v60  ;;  %3493 = vst [vmem:[#allocation4 + $0xc8] sm:$0xff] %v3477_v52  ;;  %v6992_v62 = vpop.f32.mrb[76].mxu1  ;;  %v3552_v63 = vld [vmem:[#allocation4 + $0xa2] ss:$4 sm:$0xff]  ;;  %v3576_v0 = vld [vmem:[#allocation4 + $0xa3] ss:$4 sm:$0xff] }
 0x2af   : > { %v3466_v1 = vadd.f32 %v6992_v62, %v8113_v59  ;;  %v3421_v2 = vpop.f32.mrb[77].mxu1  ;;  %v7321_v62 = vld [vmem:[%s8753_s7 + $0x1c0] sm:$0xff]  }
 0x2b0   : > { %v3562_v3 = vmax.f32 %v3538_v61, %v3552_v63  ;;  %v3464_v4 = vadd.f32 %v8113_v59, %v3421_v2  ;;  %v6993_v5 = vpop.f32.mrb[78].mxu1  ;;  %v7320_v61 = vld [vmem:[%s8753_s7 + $0x40] sm:$0xff]   ;;  %v7324_v2 = vld [vmem:[%s8753_s7 + $0x48] sm:$0xff]  }
 0x2b1   : > { %v3482_v24 = vmax.f32 %v3466_v1, 0.0  ;;  %v3467_v6 = vadd.f32 %v6993_v5, %v8113_v59  ;;  %v3424_v40 = vpop.f32.mrb[79].mxu1  ;;  %v7322_v63 = vld [vmem:[%s8753_s7] sm:$0xff]   ;;  %6425 = vmatprep.subr.bf16.mxu1 %v7320_v61  ;;  %v7327_v5 = vld [vmem:[%s8753_s7 + $0x188] sm:$0xff]  }
 0x2b2   : > { %v3586_v30 = vmax.f32 %v3562_v3, %v3576_v0  ;;  %v3480_v7 = vmax.f32 %v3464_v4, 0.0  ;;  %v3465_v8 = vadd.f32 %v8113_v59, %v3424_v40  ;;  %v7323_v1 = vld [vmem:[%s8753_s7 + $0x180] sm:$0xff]   ;;  %6426 = vmatpush3.bf16.msra.mxu1 %v7322_v63  ;;  %v7325_v3 = vld [vmem:[%s8753_s7 + $0x1c8] sm:$0xff]   ;;  %v7328_v0 = vld [vmem:[%s8753_s7 + $0x50] sm:$0xff]  }
 0x2b3   : > { %3498 = vst [vmem:[#allocation4 + $0xf0] sm:$0xff] %v3482_v24  ;;  %v3483_v56 = vmax.f32 %v3467_v6, 0.0  ;;  %v3601_v27 = vld [vmem:[#allocation5 + $0x27] sm:$0xff]  ;;  %v7326_v4 = vld [vmem:[%s8753_s7 + $0x8] sm:$0xff]   ;;  %6427 = vmatprep.subr.bf16.mxu1 %v7324_v2 }
 0x2b4   : > { %3594 = vst [vmem:[#allocation5 + $0x30] sm:$0xff] %v3586_v30  ;;  %3496 = vst [vmem:[#allocation4 + $0xe0] sm:$0xff] %v3480_v7  ;;  %v3481_v9 = vmax.f32 %v3465_v8, 0.0  ;;  %v3635_v10 = vpack.c.bf16 %v3586_v30, %v3585_v55  ;;  %v3883_v53 = vld [vmem:[#allocation5 + $0x21] sm:$0xff]  ;;  %v3882_v55 = vld [vmem:[#allocation5 + $0x19] sm:$0xff] }
 0x2b5   : > { %v3514_v11 = vld [vmem:[#allocation4 + $0xc0] ss:$4 sm:$0xff]  ;;  %v3530_v12 = vld [vmem:[#allocation4 + $0xc1] ss:$4 sm:$0xff]  ;;  %3499 = vst [vmem:[#allocation4 + $0xf8] sm:$0xff] %v3483_v56  ;;  %v3889_v38 = vpack.c.bf16 %v3883_v53, %v3882_v55 }
 0x2b6   : > { %v3539_v13 = vmax.f32 %v3514_v11, %v3530_v12  ;;  %3497 = vst [vmem:[#allocation4 + $0xe8] sm:$0xff] %v3481_v9  ;;  %7014 = vmatprep.mubr.bf16.mxu0 %v3635_v10  ;;  %v3554_v15 = vld [vmem:[#allocation4 + $0xc2] ss:$4 sm:$0xff]  ;;  %v3578_v18 = vld [vmem:[#allocation4 + $0xc3] ss:$4 sm:$0xff]  ;;  %6428 = vmatpush3.bf16.msra.mxu1 %v7326_v4 }
 0x2b7   : > { %v7329_v24 = vld [vmem:[%s8753_s7 + $0x1d0] sm:$0xff]   ;;  %6429 = vmatprep.subr.bf16.mxu1 %v7328_v0  ;;  %v7332_v30 = vld [vmem:[%s8753_s7 + $0x58] sm:$0xff]   ;;  %v7336_v9 = vld [vmem:[%s8753_s7 + $0x60] sm:$0xff]  }
 0x2b8   : > { %v3563_v16 = vmax.f32 %v3539_v13, %v3554_v15  ;;  %v7330_v6 = vld [vmem:[%s8753_s7 + $0x10] sm:$0xff]   ;;  %v7333_v7 = vld [vmem:[%s8753_s7 + $0x1d8] sm:$0xff]   ;;  %v7337_v10 = vld [vmem:[%s8753_s7 + $0x1e0] sm:$0xff]  }
 0x2b9   : > { %v7331_v40 = vld [vmem:[%s8753_s7 + $0x190] sm:$0xff]   ;;  %v7334_v8 = vld [vmem:[%s8753_s7 + $0x18] sm:$0xff]   ;;  %v7338_v11 = vld [vmem:[%s8753_s7 + $0x20] sm:$0xff]  }
 0x2ba   : > { %v3587_v20 = vmax.f32 %v3563_v16, %v3578_v18  ;;  %6430 = vmatpush3.bf16.msra.mxu1 %v7330_v6  ;;  %v7335_v56 = vld [vmem:[%s8753_s7 + $0x198] sm:$0xff]   ;;  %v7339_v12 = vld [vmem:[%s8753_s7 + $0x1a0] sm:$0xff]   ;;  %v7340_v13 = vld [vmem:[%s8753_s7 + $0x68] sm:$0xff]  }
 0x2bb   : > { %v3602_v35 = vld [vmem:[#allocation5 + $0x2f] sm:$0xff]  ;;  %6431 = vmatprep.subr.bf16.mxu1 %v7332_v30  ;;  %v7341_v15 = vld [vmem:[%s8753_s7 + $0x1e8] sm:$0xff]  }
 0x2bc   : > { %3595 = vst [vmem:[#allocation5 + $0x38] sm:$0xff] %v3587_v20  ;;  %v3607_v57 = vpack.c.bf16 %v3602_v35, %v3601_v27  ;;  %v3884_v17 = vld [vmem:[#allocation5 + $0x29] sm:$0xff]  ;;  %v7342_v16 = vld [vmem:[%s8753_s7 + $0x28] sm:$0xff]  }
 0x2bd   : > { %v3516_v21 = vld [vmem:[#allocation4 + $0xe0] ss:$4 sm:$0xff]  ;;  %v3532_v22 = vld [vmem:[#allocation4 + $0xe1] ss:$4 sm:$0xff]  ;;  %v3556_v23 = vld [vmem:[#allocation4 + $0xe2] ss:$4 sm:$0xff] }
 0x2be   : > { %v3540_v59 = vmax.f32 %v3516_v21, %v3532_v22  ;;  %v3580_v25 = vld [vmem:[#allocation4 + $0xe3] ss:$4 sm:$0xff]  ;;  %6432 = vmatpush3.bf16.msra.mxu1 %v7334_v8 }
 0x2bf   : > { %6433 = vmatprep.subr.bf16.mxu1 %v7336_v9  ;;  %v7343_v18 = vld [vmem:[%s8753_s7 + $0x1a8] sm:$0xff]   ;;  %v7345_v21 = vld [vmem:[%s8753_s7 + $0x1f0] sm:$0xff]  }
 0x2c0   : > { %v3564_v14 = vmax.f32 %v3540_v59, %v3556_v23  ;;  %v7346_v22 = vld [vmem:[%s8753_s7 + $0x30] sm:$0xff]   ;;  %v7348_v23 = vld [vmem:[%s8753_s7 + $0x78] sm:$0xff]  }
 0x2c1   : > { %v7347_v59 = vld [vmem:[%s8753_s7 + $0x1b0] sm:$0xff]  }
 0x2c2   : > { %v3588_v28 = vmax.f32 %v3564_v14, %v3580_v25  ;;  %6434 = vmatpush3.bf16.msra.mxu1 %v7338_v11  ;;  %v7349_v14 = vld [vmem:[%s8753_s7 + $0x1f8] sm:$0xff]  }
 0x2c3   : > { %v3603_v44 = vld [vmem:[#allocation5 + $0x37] sm:$0xff]  ;;  %6435 = vmatprep.subr.bf16.mxu1 %v7340_v13  ;;  %v7350_v25 = vld [vmem:[%s8753_s7 + $0x38] sm:$0xff]  }
 0x2c4   : > { %3596 = vst [vmem:[#allocation5 + $0x40] sm:$0xff] %v3588_v28  ;;  %v3636_v34 = vpack.c.bf16 %v3588_v28, %v3587_v20  ;;  %v3885_v54 = vld [vmem:[#allocation5 + $0x31] sm:$0xff]  ;;  %v7344_v20 = vld [vmem:[%s8753_s7 + $0x70] sm:$0xff]   ;;  %v7351_v28 = vld [vmem:[%s8753_s7 + $0x1b8] sm:$0xff]  }
 0x2c5   : > { %v3890_v46 = vpack.c.bf16 %v3885_v54, %v3884_v17 }
 0x2c6   : > { %7015 = vmatmul.mubr.bf16.gmra.mrb[84].mxu0 %v3636_v34  ;;  %6436 = vmatpush3.bf16.msra.mxu1 %v7342_v16  ;;  %v7353_v34 = vld [vmem:[%s8753_s7 + $0x2c0] sm:$0xff]  }
 0x2c7   : > { %7034 = vmatprep.mubr.bf16.mxu0 %v3605_v32  ;;  %6437 = vmatprep.subr.bf16.mxu1 %v7344_v20 }
 0x2ca   : > { %6438 = vmatpush3.bf16.msra.mxu1 %v7346_v22 }
 0x2cb   : > { %v3604_v42 = vld [vmem:[#allocation5 + $0x3f] sm:$0xff]  ;;  %6439 = vmatprep.subr.bf16.mxu1 %v7348_v23 }
 0x2cc   : > { %v3608_v45 = vpack.c.bf16 %v3604_v42, %v3603_v44  ;;  %v3886_v52 = vld [vmem:[#allocation5 + $0x39] sm:$0xff]  ;;  %v3887_v58 = vld [vmem:[#allocation5 + $0x41] sm:$0xff] }
 0x2cd   : > { %v3891_v60 = vpack.c.bf16 %v3887_v58, %v3886_v52 }
 0x2ce   : > { %7035 = vmatmul.mubr.bf16.vlgmr.msra.gmra.mrb[80].mxu0 %v3606_v39  ;;  %6440 = vmatpush3.bf16.msra.mxu1 %v7350_v25 }
 0x2cf   : > { %7043 = vmatpush3.bf16.msra.mxu0 %v8164_v36  ;;  %7038 = vmatprep.mubr.bf16.mxu0 %v3607_v57  ;;  %v7316_v36 = vld [vmem:[%s8751_s5 + $0xa0] sm:$0xff]  }
 0x2d0   : > { %7044 = vmatprep.subr.bf16.mxu0 %v7313_v19  ;;  %6447 = vmatprep.subr.bf16.mxu1 %v7352_v29 }
 0x2d3   : > { %7045 = vmatpush3.bf16.msra.mxu0 %v7313_v19 }
 0x2d4   : > { %7046 = vmatprep.subr.bf16.mxu0 %v7314_v41 }
 0x2d6   : > { %7039 = vmatmul.mubr.bf16.gmra.mrb[84].mxu0 %v3608_v45 }
 0x2d7   : > { %7047 = vmatpush3.bf16.msra.mxu0 %v7314_v41  ;;  %7058 = vmatprep.mubr.bf16.mxu0 %v3888_v49 }
 0x2d8   : > { %7048 = vmatprep.subr.bf16.mxu0 %v7315_v48 }
 0x2db   : > { %7049 = vmatpush3.bf16.msra.mxu0 %v7315_v48 }
 0x2dc   : > { %7050 = vmatprep.subr.bf16.mxu0 %v7316_v36 }
 0x2df   : > { %7051 = vmatpush3.bf16.msra.mxu0 %v7316_v36 }
 0x2e0   : > { %7052 = vmatprep.subr.bf16.mxu0 %v7317_v50 }
 0x2e3   : > { %7053 = vmatpush3.bf16.msra.mxu0 %v7317_v50  ;;  %v4069_v50 = vlaneseq }
 0x2e4   : > { %7054 = vmatprep.subr.bf16.mxu0 %v7318_v26 }
 0x2e5   : > { %v8302_v17 = vshrl.u32 %v4069_v50, 7  ;;  %vm8311_vm1 = vcmp.lt.s32.totalorder %v4069_v50, 128 }
 0x2e7   : > { %7055 = vmatpush3.bf16.msra.mxu0 %v7318_v26 }
 0x2e8   : > { %7056 = vmatprep.subr.bf16.mxu0 %v7319_v51 }
 0x2eb   : > { %7057 = vmatpush3.bf16.msra.mxu0 %v7319_v51 }
 0x2ec   : > { %6491 = vmatprep.subr.bf16.mxu0 %v7321_v62 }
 0x2ee   : > { %7059 = vmatmul.mubr.bf16.vlgmr.msra.gmra.mrb[80].mxu0 %v3889_v38 }
 0x2ef   : > { %7062 = vmatprep.mubr.bf16.mxu0 %v3890_v46  ;;  %6492 = vmatpush3.bf16.msra.mxu0 %v7323_v1 }
 0x2f0   : > { %6493 = vmatprep.subr.bf16.mxu0 %v7325_v3 }
 0x2f3   : > { %6494 = vmatpush3.bf16.msra.mxu0 %v7327_v5 }
 0x2f4   : > { %6495 = vmatprep.subr.bf16.mxu0 %v7329_v24 }
 0x2f6   : > { %7063 = vmatmul.mubr.bf16.gmra.mrb[84].mxu0 %v3891_v60 }
 0x2f7   : > { %6496 = vmatpush3.bf16.msra.mxu0 %v7331_v40  ;;  %v7369_v40 = vld [vmem:[%s8753_s7 + $0x2e0] sm:$0xff]  }
 0x2f8   : > { %6497 = vmatprep.subr.bf16.mxu0 %v7333_v7 }
 0x2fb   : > { %6498 = vmatpush3.bf16.msra.mxu0 %v7335_v56 }
 0x2fc   : > { %6499 = vmatprep.subr.bf16.mxu0 %v7337_v10 }
 0x2ff   : > { %6500 = vmatpush3.bf16.msra.mxu0 %v7339_v12 }
 0x300   : > { %6501 = vmatprep.subr.bf16.mxu0 %v7341_v15 }
 0x303   : > { %6502 = vmatpush3.bf16.msra.mxu0 %v7343_v18 }
 0x304   : > { %6503 = vmatprep.subr.bf16.mxu0 %v7345_v21 }
 0x307   : > { %6504 = vmatpush3.bf16.msra.mxu0 %v7347_v59 }
 0x308   : > { %6505 = vmatprep.subr.bf16.mxu0 %v7349_v14 }
 0x30b   : > { %6506 = vmatpush3.bf16.msra.mxu0 %v7351_v28 }
 0x30c   : > { %6535 = vmatprep.subr.bf16.mxu0 %v7353_v34 }
 0x3c1   : > { %v7060_v32 = vpop.f32.mrb[80].mxu0 }
 0x3c2   : > { %v4038_v33 = vadd.f32 %v7060_v32, %v6057_v31  ;;  %v3991_v35 = vpop.f32.mrb[81].mxu0 }
 0x3c3   : > { %v4036_v37 = vadd.f32 %v6057_v31, %v3991_v35  ;;  %v7061_v39 = vpop.f32.mrb[82].mxu0 }
 0x3c4   : > { %v4046_v27 = vmax.f32 %v4038_v33, 0.0  ;;  %v4039_v19 = vadd.f32 %v7061_v39, %v6057_v31  ;;  %v3994_v57 = vpop.f32.mrb[83].mxu0 }
 0x3c5   : > { %v4044_v41 = vmax.f32 %v4036_v37, 0.0  ;;  %v4037_v42 = vadd.f32 %v6057_v31, %v3994_v57 }
 0x3c6   : > { %4054 = vst [vmem:[#allocation6 + $0x10] sm:$0xff] %v4046_v27  ;;  %v4047_v43 = vmax.f32 %v4039_v19, 0.0 }
 0x3c7   : > { %4052 = vst [vmem:[#allocation6] sm:$0xff] %v4044_v41  ;;  %v4045_v44 = vmax.f32 %v4037_v42, 0.0 }
 0x3c8   : > { %4055 = vst [vmem:[#allocation6 + $0x18] sm:$0xff] %v4047_v43 }
 0x3c9   : > { %4053 = vst [vmem:[#allocation6 + $0x8] sm:$0xff] %v4045_v44  ;;  %v7064_v45 = vpop.f32.mrb[84].mxu0 }
 0x3ca   : > { %v4042_v47 = vadd.f32 %v7064_v45, %v6057_v31  ;;  %v4007_v48 = vpop.f32.mrb[85].mxu0 }
 0x3cb   : > { %v4040_v49 = vadd.f32 %v6057_v31, %v4007_v48  ;;  %v7065_v36 = vpop.f32.mrb[86].mxu0 }
 0x3cc   : > { %v4050_v26 = vmax.f32 %v4042_v47, 0.0  ;;  %v4043_v51 = vadd.f32 %v7065_v36, %v6057_v31  ;;  %v4010_v53 = vpop.f32.mrb[87].mxu0 }
 0x3cd   : > { %v4101_v54 = vld [vmem:[#allocation6 + $0x10] sm:$0xf]  ;;  %v4110_v55 = vld [vmem:[#allocation6 + $0x14] sm:$0xf]  ;;  %v4048_v38 = vmax.f32 %v4040_v49, 0.0  ;;  %v8306_v61 = vadd.f32 %v6057_v31, %v4010_v53 }
 0x3ce   : > { %v4102_v46 = vsel %vm4061_vm0, %v4101_v54, -inf  ;;  %v4111_v52 = vsel %vm4061_vm0, %v4110_v55, -inf  ;;  %v4060_v58 = vld [vmem:[#allocation6] sm:$0xf]  ;;  %v4074_v60 = vld [vmem:[#allocation6 + $0x4] sm:$0xf] }
 0x3cf   : > { %4058 = vst [vmem:[#allocation6 + $0x30] sm:$0xff] %v4050_v26  ;;  %v4103_v62 = vrot.slane %v4102_v46, 4  ;;  %v4112_v63 = vrot.slane %v4111_v52, 4  ;;  %v4062_v1 = vsel %vm4061_vm0, %v4060_v58, -inf  ;;  %v4075_v2 = vsel %vm4061_vm0, %v4074_v60, -inf  ;;  %4056 = vst [vmem:[#allocation6 + $0x20] sm:$0xff] %v4048_v38 }
 0x3d0   : > { %v4119_v3 = vld [vmem:[#allocation6 + $0x18] sm:$0xf]  ;;  %v4063_v4 = vrot.slane %v4062_v1, 4  ;;  %v4076_v5 = vrot.slane %v4075_v2, 4  ;;  %v4128_v24 = vld [vmem:[#allocation6 + $0x1c] sm:$0xf] }
 0x3d1   : > { %v4120_v0 = vsel %vm4061_vm0, %v4119_v3, -inf  ;;  %v4051_v6 = vmax.f32 %v4043_v51, 0.0  ;;  %v4104_v30 = vmax.f32 %v4102_v46, %v4103_v62  ;;  %v4113_v7 = vmax.f32 %v4111_v52, %v4112_v63  ;;  %v4083_v9 = vld [vmem:[#allocation6 + $0x8] sm:$0xf]  ;;  %v4092_v10 = vld [vmem:[#allocation6 + $0xc] sm:$0xf] }
 0x3d2   : > { %v4121_v8 = vrot.slane %v4120_v0, 4  ;;  %v4129_v56 = vsel %vm4061_vm0, %v4128_v24, -inf  ;;  %v4064_v11 = vmax.f32 %v4062_v1, %v4063_v4  ;;  %v4077_v12 = vmax.f32 %v4075_v2, %v4076_v5 }
 0x3d3   : > { %v4130_v13 = vrot.slane %v4129_v56, 4  ;;  %v4084_v15 = vsel %vm4061_vm0, %v4083_v9, -inf  ;;  %4059 = vst [vmem:[#allocation6 + $0x38] sm:$0xff] %v4051_v6  ;;  %v4105_v16 = vrot.slane %v4104_v30, 2  ;;  %v4114_v18 = vrot.slane %v4113_v7, 2 }
 0x3d4   : > { %v4122_v20 = vmax.f32 %v4120_v0, %v4121_v8  ;;  %v4085_v21 = vrot.slane %v4084_v15, 4  ;;  %v4065_v22 = vrot.slane %v4064_v11, 2  ;;  %v4078_v59 = vrot.slane %v4077_v12, 2 }
 0x3d5   : > { %v4131_v23 = vmax.f32 %v4129_v56, %v4130_v13  ;;  %v4093_v14 = vsel %vm4061_vm0, %v4092_v10, -inf  ;;  %v4106_v25 = vmax.f32 %v4104_v30, %v4105_v16  ;;  %v4115_v28 = vmax.f32 %v4113_v7, %v4114_v18 }
 0x3d6   : > { %v4123_v29 = vrot.slane %v4122_v20, 2  ;;  %v4086_v34 = vmax.f32 %v4084_v15, %v4085_v21  ;;  %v4066_v31 = vmax.f32 %v4064_v11, %v4065_v22  ;;  %v4079_v32 = vmax.f32 %v4077_v12, %v4078_v59  ;;  %v4173_v44 = vld [vmem:[#allocation6 + $0x30] sm:$0xf]  ;;  %v4182_v45 = vld [vmem:[#allocation6 + $0x34] sm:$0xf] }
 0x3d7   : > { %v4132_v33 = vrot.slane %v4131_v23, 2  ;;  %v4094_v35 = vrot.slane %v4093_v14, 4  ;;  %v4107_v37 = vrot.slane %v4106_v25, 1  ;;  %v4116_v39 = vrot.slane %v4115_v28, 1  ;;  %v4137_v50 = vld [vmem:[#allocation6 + $0x20] sm:$0xf] }
 0x3d8   : > { %v4124_v27 = vmax.f32 %v4122_v20, %v4123_v29  ;;  %v4087_v19 = vrot.slane %v4086_v34, 2  ;;  %v4067_v57 = vrot.slane %v4066_v31, 1  ;;  %v4080_v41 = vrot.slane %v4079_v32, 1  ;;  %v4146_v55 = vld [vmem:[#allocation6 + $0x24] sm:$0xf] }
 0x3d9   : > { %v4133_v42 = vmax.f32 %v4131_v23, %v4132_v33  ;;  %v4095_v43 = vmax.f32 %v4093_v14, %v4094_v35  ;;  %v4108_v47 = vmax.f32 %v4106_v25, %v4107_v37  ;;  %v4117_v48 = vmax.f32 %v4115_v28, %v4116_v39 }
 0x3da   : > { %v4125_v49 = vrot.slane %v4124_v27, 1  ;;  %v4088_v36 = vmax.f32 %v4086_v34, %v4087_v19  ;;  %v4068_v26 = vmax.f32 %v4066_v31, %v4067_v57  ;;  %v4081_v51 = vmax.f32 %v4079_v32, %v4080_v41  ;;  %v4191_v38 = vld [vmem:[#allocation6 + $0x38] sm:$0xf]  ;;  %v4200_v3 = vld [vmem:[#allocation6 + $0x3c] sm:$0xf] }
 0x3db   : > { %v4134_v53 = vrot.slane %v4133_v42, 1  ;;  %v4096_v54 = vrot.slane %v4095_v43, 2  ;;  %v4174_v58 = vsel %vm4061_vm0, %v4173_v44, -inf  ;;  %v4183_v60 = vsel %vm4061_vm0, %v4182_v45, -inf  ;;  %4109 = vst.msk [vmem:[#allocation7 + $0x4] sm:$0x1] %vm8311_vm1, %v4108_v47 }
 0x3dc   : > { %v4126_v46 = vmax.f32 %v4124_v27, %v4125_v49  ;;  %v4089_v52 = vrot.slane %v4088_v36, 1  ;;  %4118 = vst.msk [vmem:[#allocation7 + $0x5] sm:$0x1] %vm8311_vm1, %v4117_v48  ;;  %v4175_v1 = vrot.slane %v4174_v58, 4  ;;  %v4184_v2 = vrot.slane %v4183_v60, 4 }
 0x3dd   : > { %v4135_v62 = vmax.f32 %v4133_v42, %v4134_v53  ;;  %v4097_v63 = vmax.f32 %v4095_v43, %v4096_v54  ;;  %4073 = vst.msk [vmem:[#allocation7] sm:$0x1] %vm8311_vm1, %v4068_v26  ;;  %4082 = vst.msk [vmem:[#allocation7 + $0x1] sm:$0x1] %vm8311_vm1, %v4081_v51  ;;  %v4138_v5 = vsel %vm4061_vm0, %v4137_v50, -inf  ;;  %v4147_v0 = vsel %vm4061_vm0, %v4146_v55, -inf }
 0x3de   : > { %v4090_v4 = vmax.f32 %v4088_v36, %v4089_v52  ;;  %v4192_v24 = vsel %vm4061_vm0, %v4191_v38, -inf  ;;  %4127 = vst.msk [vmem:[#allocation7 + $0x6] sm:$0x1] %vm8311_vm1, %v4126_v46  ;;  %v4176_v30 = vmax.f32 %v4174_v58, %v4175_v1  ;;  %v4185_v7 = vmax.f32 %v4183_v60, %v4184_v2 }
 0x3df   : > { %v4098_v6 = vrot.slane %v4097_v63, 1  ;;  %v4139_v8 = vrot.slane %v4138_v5, 4  ;;  %4136 = vst.msk [vmem:[#allocation7 + $0x7] sm:$0x1] %vm8311_vm1, %v4135_v62  ;;  %v4148_v56 = vrot.slane %v4147_v0, 4  ;;  %v4193_v9 = vrot.slane %v4192_v24, 4 }
 0x3e0   : > { %v4201_v10 = vsel %vm4061_vm0, %v4200_v3, -inf  ;;  %v4049_v11 = vmax.f32 %v8306_v61, 0.0  ;;  %4091 = vst.msk [vmem:[#allocation7 + $0x2] sm:$0x1] %vm8311_vm1, %v4090_v4  ;;  %v4177_v13 = vrot.slane %v4176_v30, 2  ;;  %v4186_v15 = vrot.slane %v4185_v7, 2 }
 0x3e1   : > { %v4099_v12 = vmax.f32 %v4097_v63, %v4098_v6  ;;  %v4140_v16 = vmax.f32 %v4138_v5, %v4139_v8  ;;  %v4149_v18 = vmax.f32 %v4147_v0, %v4148_v56  ;;  %v4194_v20 = vmax.f32 %v4192_v24, %v4193_v9  ;;  %v7354_v4 = vld [vmem:[%s8753_s7 + $0x80] sm:$0xff]   ;;  %v7357_v56 = vld [vmem:[%s8753_s7 + $0x2c8] sm:$0xff]  }
 0x3e2   : > { %v4202_v21 = vrot.slane %v4201_v10, 4  ;;  %4057 = vst [vmem:[#allocation6 + $0x28] sm:$0xff] %v4049_v11  ;;  %v4178_v22 = vmax.f32 %v4176_v30, %v4177_v13  ;;  %v4187_v59 = vmax.f32 %v4185_v7, %v4186_v15  ;;  %v4219_v31 = vsub.s32 1, %v8302_v17  ;;  %v7355_v5 = vld [vmem:[%s8753_s7 + $0x280] sm:$0xff]   ;;  %v7356_v7 = vld [vmem:[%s8753_s7 + $0xc8] sm:$0xff]  }
 0x3e3   : > { %v4141_v23 = vrot.slane %v4140_v16, 2  ;;  %4100 = vst.msk [vmem:[#allocation7 + $0x3] sm:$0x1] %vm8311_vm1, %v4099_v12  ;;  %v4150_v14 = vrot.slane %v4149_v18, 2  ;;  %v4195_v25 = vrot.slane %v4194_v20, 2  ;;  %v4243_v37 = vsub.s32 7, %v8302_v17 }
 0x3e4   : > { %v4203_v61 = vmax.f32 %v4201_v10, %v4202_v21  ;;  %v4179_v28 = vrot.slane %v4178_v22, 1  ;;  %v4188_v29 = vrot.slane %v4187_v59, 1  ;;  %v4215_v57 = vsub.s32 0, %v8302_v17  ;;  %v7358_v13 = vld [vmem:[%s8753_s7 + $0x88] sm:$0xff]  }
 0x3e5   : > { %v4142_v34 = vmax.f32 %v4140_v16, %v4141_v23  ;;  %v4151_v32 = vmax.f32 %v4149_v18, %v4150_v14  ;;  %v4196_v33 = vmax.f32 %v4194_v20, %v4195_v25  ;;  %v4239_v44 = vsub.s32 6, %v8302_v17  ;;  %v7359_v15 = vld [vmem:[%s8753_s7 + $0x288] sm:$0xff]   ;;  %v7360_v18 = vld [vmem:[%s8753_s7 + $0xd0] sm:$0xff]  }
 0x3e6   : > { %v4204_v35 = vrot.slane %v4203_v61, 2  ;;  %v4180_v39 = vmax.f32 %v4178_v22, %v4179_v28  ;;  %v4189_v27 = vmax.f32 %v4187_v59, %v4188_v29  ;;  %v4227_v49 = vsub.s32 3, %v8302_v17  ;;  %v7361_v20 = vld [vmem:[%s8753_s7 + $0x2d0] sm:$0xff]   ;;  %v7365_v28 = vld [vmem:[%s8753_s7 + $0x2d8] sm:$0xff]  }
 0x3e7   : > { %v4143_v19 = vrot.slane %v4142_v34, 1  ;;  %v4152_v41 = vrot.slane %v4151_v32, 1  ;;  %v4197_v42 = vrot.slane %v4196_v33, 1  ;;  %v4231_v36 = vsub.s32 4, %v8302_v17  ;;  %v7362_v23 = vld [vmem:[%s8753_s7 + $0x90] sm:$0xff]   ;;  %v7366_v29 = vld [vmem:[%s8753_s7 + $0x98] sm:$0xff]  }
 0x3e8   : > { %v4205_v43 = vmax.f32 %v4203_v61, %v4204_v35  ;;  %4181 = vst.msk [vmem:[#allocation7 + $0xc] sm:$0x1] %vm8311_vm1, %v4180_v39  ;;  %4190 = vst.msk [vmem:[#allocation7 + $0xd] sm:$0x1] %vm8311_vm1, %v4189_v27  ;;  %v7363_v14 = vld [vmem:[%s8753_s7 + $0x290] sm:$0xff]   ;;  %v7364_v61 = vld [vmem:[%s8753_s7 + $0xd8] sm:$0xff]  }
 0x3e9   : > { %v4144_v45 = vmax.f32 %v4142_v34, %v4143_v19  ;;  %v4155_v47 = vld [vmem:[#allocation6 + $0x28] sm:$0xf]  ;;  %v4164_v48 = vld [vmem:[#allocation6 + $0x2c] sm:$0xf]  ;;  %v4153_v50 = vmax.f32 %v4151_v32, %v4152_v41  ;;  %v4198_v26 = vmax.f32 %v4196_v33, %v4197_v42  ;;  %v7367_v34 = vld [vmem:[%s8753_s7 + $0x298] sm:$0xff]   ;;  %v4235_v41 = vsub.s32 5, %v8302_v17 }
 0x3ea   : > { %v4206_v51 = vrot.slane %v4205_v43, 1  ;;  %v4156_v53 = vsel %vm4061_vm0, %v4155_v47, -inf  ;;  %v8352_v54 = vld [vmem:[#allocation7] sm:$0xff]  ;;  %v4165_v38 = vsel %vm4061_vm0, %v4164_v48, -inf  ;;  %v7372_v39 = vld [vmem:[%s8753_s7 + $0xe8] sm:$0xff]  }
 0x3eb   : > { %v4157_v55 = vrot.slane %v4156_v53, 4  ;;  %v4220_v46 = vrot.slane %v8352_v54, %v4219_v31  ;;  %4145 = vst.msk [vmem:[#allocation7 + $0x8] sm:$0x1] %vm8311_vm1, %v4144_v45  ;;  %v4244_v52 = vrot.slane %v8352_v54, %v4243_v37  ;;  %v4166_v60 = vrot.slane %v4165_v38, 4  ;;  %4154 = vst.msk [vmem:[#allocation7 + $0x9] sm:$0x1] %vm8311_vm1, %v4153_v50 }
 0x3ec   : > { %v4207_v58 = vmax.f32 %v4205_v43, %v4206_v51  ;;  %4199 = vst.msk [vmem:[#allocation7 + $0xe] sm:$0x1] %vm8311_vm1, %v4198_v26  ;;  %v4216_v62 = vrot.slane %v8352_v54, %v4215_v57  ;;  %v4240_v63 = vrot.slane %v8352_v54, %v4239_v44  ;;  %v4228_v0 = vrot.slane %v8352_v54, %v4227_v49  ;;  %v7368_v32 = vld [vmem:[%s8753_s7 + $0xe0] sm:$0xff]   ;;  %v7373_v27 = vld [vmem:[%s8753_s7 + $0x2e8] sm:$0xff]   ;;  %v7377_v26 = vld [vmem:[%s8753_s7 + $0x2f0] sm:$0xff]  }
 0x3ed   : > { %v4158_v1 = vmax.f32 %v4156_v53, %v4157_v55  ;;  %v4294_v2 = vpack.c.bf16 %v4220_v46, %v4220_v46  ;;  %v4300_v3 = vpack.c.bf16 %v4244_v52, %v4244_v52  ;;  %v4167_v24 = vmax.f32 %v4165_v38, %v4166_v60  ;;  %v7370_v33 = vld [vmem:[%s8753_s7 + $0xa0] sm:$0xff]   ;;  %v7374_v43 = vld [vmem:[%s8753_s7 + $0xa8] sm:$0xff]   ;;  %v7378_v51 = vld [vmem:[%s8753_s7 + $0xb0] sm:$0xff]  }
 0x3ee   : > { %4208 = vst.msk [vmem:[#allocation7 + $0xf] sm:$0x1] %vm8311_vm1, %v4207_v58  ;;  %v4293_v6 = vpack.c.bf16 %v4216_v62, %v4216_v62  ;;  %v4299_v30 = vpack.c.bf16 %v4240_v63, %v4240_v63  ;;  %v8393_v9 = vrot.slane %v8352_v54, %v4231_v36  ;;  %v4296_v11 = vpack.c.bf16 %v4228_v0, %v4228_v0  ;;  %v7371_v35 = vld [vmem:[%s8753_s7 + $0x2a0] sm:$0xff]   ;;  %v7375_v45 = vld [vmem:[%s8753_s7 + $0x2a8] sm:$0xff]   ;;  %v7379_v53 = vld [vmem:[%s8753_s7 + $0x2b0] sm:$0xff]  }
 0x3ef   : > { %v4159_v8 = vrot.slane %v4158_v1, 2  ;;  %5366 = vmatprep.mubr.bf16.mxu1 %v4294_v2  ;;  %5486 = vmatprep.mubr.bf16.mxu0 %v4300_v3  ;;  %v4168_v10 = vrot.slane %v4167_v24, 2  ;;  %v7380_v55 = vld [vmem:[%s8753_s7 + $0xf8] sm:$0xff]   ;;  %v4223_v38 = vsub.s32 2, %v8302_v17  ;;  %v7384_v60 = vld [vmem:[%s8753_s7 + $0x140] sm:$0xff]   ;;  %v7419_v17 = vld [vmem:[%s8753_s7 + $0x208] sm:$0xff]  }
 0x3f0   : > { %5367 = vmatmul.mubr.bf16.vlgmr.msra.gmra.mrb[80].mxu1 %v4293_v6  ;;  %5487 = vmatmul.mubr.bf16.vlgmr.msra.gmra.mrb[88].mxu0 %v4299_v30  ;;  %v7382_v46 = vld [vmem:[%s8753_s7 + $0xb8] sm:$0xff]   ;;  %v7385_v63 = vld [vmem:[%s8753_s7 + $0x3c0] sm:$0xff]   ;;  %v7390_v30 = vld [vmem:[%s8753_s7 + $0x108] sm:$0xff]  }
 0x3f1   : > { %v4160_v12 = vmax.f32 %v4158_v1, %v4159_v8  ;;  %6448 = vmatpush3.bf16.msra.mxu1 %v7354_v4  ;;  %6536 = vmatpush3.bf16.msra.mxu0 %v7355_v5  ;;  %v4169_v16 = vmax.f32 %v4167_v24, %v4168_v10  ;;  %v7383_v52 = vld [vmem:[%s8753_s7 + $0x2b8] sm:$0xff]   ;;  %v4224_v58 = vrot.slane %v8352_v54, %v4223_v38  ;;  %v7386_v3 = vld [vmem:[%s8753_s7 + $0x100] sm:$0xff]   ;;  %v7392_v8 = vld [vmem:[%s8753_s7 + $0x150] sm:$0xff]  }
 0x3f2   : > { %5406 = vmatprep.mubr.bf16.mxu1 %v4296_v11  ;;  %6449 = vmatprep.subr.bf16.mxu1 %v7356_v7  ;;  %v4236_v1 = vrot.slane %v8352_v54, %v4235_v41  ;;  %v7387_v0 = vld [vmem:[%s8753_s7 + $0x380] sm:$0xff]   ;;  %v7388_v54 = vld [vmem:[%s8753_s7 + $0x148] sm:$0xff]   ;;  %v7394_v10 = vld [vmem:[%s8753_s7 + $0x110] sm:$0xff]  }
 0x3f3   : > { %v4161_v21 = vrot.slane %v4160_v12, 1  ;;  %6537 = vmatprep.subr.bf16.mxu0 %v7357_v56  ;;  %v4170_v22 = vrot.slane %v4169_v16, 1  ;;  %v4295_v4 = vpack.c.bf16 %v4224_v58, %v4224_v58  ;;  %v7391_v7 = vld [vmem:[%s8753_s7 + $0x388] sm:$0xff]   ;;  %v7393_v56 = vld [vmem:[%s8753_s7 + $0x3d0] sm:$0xff]   ;;  %v7432_v58 = vld [vmem:[%s8753_s7 + $0x340] sm:$0xff]  }
 0x3f4   : > { %v4298_v24 = vpack.c.bf16 %v4236_v1, %v4236_v1  ;;  %v7395_v11 = vld [vmem:[%s8753_s7 + $0x390] sm:$0xff]  }
 0x3f5   : > { %v4162_v59 = vmax.f32 %v4160_v12, %v4161_v21  ;;  %6450 = vmatpush3.bf16.msra.mxu1 %v7358_v13  ;;  %6538 = vmatpush3.bf16.msra.mxu0 %v7359_v15  ;;  %v4171_v25 = vmax.f32 %v4169_v16, %v4170_v22  ;;  %v7396_v12 = vld [vmem:[%s8753_s7 + $0x158] sm:$0xff]   ;;  %v7402_v21 = vld [vmem:[%s8753_s7 + $0x120] sm:$0xff]  }
 0x3f6   : > { %6451 = vmatprep.subr.bf16.mxu1 %v7360_v18  ;;  %6539 = vmatprep.subr.bf16.mxu0 %v7361_v20  ;;  %v7397_v13 = vld [vmem:[%s8753_s7 + $0x3d8] sm:$0xff]   ;;  %v7400_v18 = vld [vmem:[%s8753_s7 + $0x160] sm:$0xff]  }
 0x3f7   : > { %4163 = vst.msk [vmem:[#allocation7 + $0xa] sm:$0x1] %vm8311_vm1, %v4162_v59  ;;  %4172 = vst.msk [vmem:[#allocation7 + $0xb] sm:$0x1] %vm8311_vm1, %v4171_v25  ;;  %v7398_v15 = vld [vmem:[%s8753_s7 + $0x118] sm:$0xff]   ;;  %v7401_v20 = vld [vmem:[%s8753_s7 + $0x3e0] sm:$0xff]  }
 0x3f8   : > { %v7399_v16 = vld [vmem:[%s8753_s7 + $0x398] sm:$0xff]   ;;  %v7403_v22 = vld [vmem:[%s8753_s7 + $0x3a0] sm:$0xff]   ;;  %v7404_v59 = vld [vmem:[%s8753_s7 + $0x168] sm:$0xff]  }
 0x3f9   : > { %6452 = vmatpush3.bf16.msra.mxu1 %v7362_v23  ;;  %6540 = vmatpush3.bf16.msra.mxu0 %v7363_v14  ;;  %v7405_v23 = vld [vmem:[%s8753_s7 + $0x3e8] sm:$0xff]  }
 0x3fa   : > { %6453 = vmatprep.subr.bf16.mxu1 %v7364_v61  ;;  %6541 = vmatprep.subr.bf16.mxu0 %v7365_v28  ;;  %v7406_v14 = vld [vmem:[%s8753_s7 + $0x128] sm:$0xff]   ;;  %v7408_v61 = vld [vmem:[%s8753_s7 + $0x170] sm:$0xff]  }
 0x3fb   : > { %v7407_v25 = vld [vmem:[%s8753_s7 + $0x3a8] sm:$0xff]   ;;  %v7409_v28 = vld [vmem:[%s8753_s7 + $0x3f0] sm:$0xff]  }
 0x3fd   : > { %6454 = vmatpush3.bf16.msra.mxu1 %v7366_v29  ;;  %6542 = vmatpush3.bf16.msra.mxu0 %v7367_v34  ;;  %v7410_v29 = vld [vmem:[%s8753_s7 + $0x130] sm:$0xff]  }
 0x3fe   : > { %6455 = vmatprep.subr.bf16.mxu1 %v7368_v32  ;;  %6543 = vmatprep.subr.bf16.mxu0 %v7369_v40  ;;  %v8447_v19 = vld [vmem:[#allocation7 + $0x8] sm:$0xff]  ;;  %v7411_v34 = vld [vmem:[%s8753_s7 + $0x3b0] sm:$0xff]   ;;  %v7412_v32 = vld [vmem:[%s8753_s7 + $0x178] sm:$0xff]  }
 0x3ff   : > { %v4260_v42 = vrot.slane %v8447_v19, %v4227_v49  ;;  %v8462_v47 = vrot.slane %v8447_v19, %v4215_v57  ;;  %v8465_v48 = vrot.slane %v8447_v19, %v4235_v41  ;;  %v7376_v49 = vld [vmem:[%s8753_s7 + $0xf0] sm:$0xff]   ;;  %v8476_v57 = vrot.slane %v8447_v19, %v4231_v36  ;;  %v7381_v36 = vld [vmem:[%s8753_s7 + $0x2f8] sm:$0xff]  }
 0x400   : > { %v4256_v62 = vrot.slane %v8447_v19, %v4223_v38  ;;  %v4276_v2 = vrot.slane %v8447_v19, %v4243_v37  ;;  %v7389_v37 = vld [vmem:[%s8753_s7 + $0x3c8] sm:$0xff]   ;;  %v7413_v40 = vld [vmem:[%s8753_s7 + $0x3f8] sm:$0xff]   ;;  %v4252_v41 = vrot.slane %v8447_v19, %v4219_v31  ;;  %v7420_v31 = vld [vmem:[%s8753_s7 + $0x250] sm:$0xff]  }
 0x401   : > { %6456 = vmatpush3.bf16.msra.mxu1 %v7370_v33  ;;  %6544 = vmatpush3.bf16.msra.mxu0 %v7371_v35  ;;  %v4304_v50 = vpack.c.bf16 %v4260_v42, %v4260_v42  ;;  %v7414_v33 = vld [vmem:[%s8753_s7 + $0x138] sm:$0xff]   ;;  %v7417_v42 = vld [vmem:[%s8753_s7 + $0x200] sm:$0xff]   ;;  %v7429_v38 = vld [vmem:[%s8753_s7 + $0x230] sm:$0xff]   ;;  %v4306_v1 = vpack.c.bf16 %v8465_v48, %v8465_v48 }
 0x402   : > { %6457 = vmatprep.subr.bf16.mxu1 %v7372_v39  ;;  %6545 = vmatprep.subr.bf16.mxu0 %v7373_v27  ;;  %v4303_v5 = vpack.c.bf16 %v4256_v62, %v4256_v62  ;;  %v4308_v6 = vpack.c.bf16 %v4276_v2, %v4276_v2  ;;  %v7415_v35 = vld [vmem:[%s8753_s7 + $0x3b8] sm:$0xff]   ;;  %v7416_v39 = vld [vmem:[%s8753_s7 + $0x240] sm:$0xff]   ;;  %v4272_v27 = vrot.slane %v8447_v19, %v4239_v44  ;;  %v7435_v2 = vld [vmem:[%s8753_s7 + $0x308] sm:$0xff]  }
 0x403   : > { %5566 = vmatprep.mubr.bf16.mxu0 %v4304_v50  ;;  %v4302_v44 = vpack.c.bf16 %v4252_v41, %v4252_v41  ;;  %v7422_v19 = vld [vmem:[%s8753_s7 + $0x258] sm:$0xff]   ;;  %v4301_v62 = vpack.c.bf16 %v8462_v47, %v8462_v47  ;;  %v7436_v47 = vld [vmem:[%s8753_s7 + $0x350] sm:$0xff]  }
 0x404   : > { %v4307_v50 = vpack.c.bf16 %v4272_v27, %v4272_v27  ;;  %v7438_v48 = vld [vmem:[%s8753_s7 + $0x358] sm:$0xff]  }
 0x405   : > { %6458 = vmatpush3.bf16.msra.mxu1 %v7374_v43  ;;  %6546 = vmatpush3.bf16.msra.mxu0 %v7375_v45  ;;  %v4297_v43 = vpack.c.bf16 %v8393_v9, %v8393_v9  ;;  %v7418_v45 = vld [vmem:[%s8753_s7 + $0x248] sm:$0xff]   ;;  %v7421_v9 = vld [vmem:[%s8753_s7 + $0x210] sm:$0xff]  }
 0x406   : > { %6459 = vmatprep.subr.bf16.mxu1 %v7376_v49  ;;  %6547 = vmatprep.subr.bf16.mxu0 %v7377_v26  ;;  %v7423_v49 = vld [vmem:[%s8753_s7 + $0x218] sm:$0xff]   ;;  %v7424_v26 = vld [vmem:[%s8753_s7 + $0x260] sm:$0xff]  }
 0x409   : > { %6460 = vmatpush3.bf16.msra.mxu1 %v7378_v51  ;;  %6548 = vmatpush3.bf16.msra.mxu0 %v7379_v53  ;;  %v7425_v51 = vld [vmem:[%s8753_s7 + $0x220] sm:$0xff]   ;;  %v7426_v53 = vld [vmem:[%s8753_s7 + $0x268] sm:$0xff]  }
 0x40a   : > { %6461 = vmatprep.subr.bf16.mxu1 %v7380_v55  ;;  %6549 = vmatprep.subr.bf16.mxu0 %v7381_v36  ;;  %v7427_v55 = vld [vmem:[%s8753_s7 + $0x228] sm:$0xff]   ;;  %v7428_v36 = vld [vmem:[%s8753_s7 + $0x270] sm:$0xff]  }
 0x40d   : > { %6462 = vmatpush3.bf16.msra.mxu1 %v7382_v46  ;;  %6550 = vmatpush3.bf16.msra.mxu0 %v7383_v52  ;;  %v7430_v46 = vld [vmem:[%s8753_s7 + $0x278] sm:$0xff]  }
 0x40e   : > { %6469 = vmatprep.subr.bf16.mxu1 %v7384_v60  ;;  %6579 = vmatprep.subr.bf16.mxu0 %v7385_v63  ;;  %v7431_v52 = vld [vmem:[%s8753_s7 + $0x238] sm:$0xff]   ;;  %v7433_v60 = vld [vmem:[%s8753_s7 + $0x300] sm:$0xff]   ;;  %v7434_v63 = vld [vmem:[%s8753_s7 + $0x348] sm:$0xff]  }
 0x410   : > { %5407 = vmatmul.mubr.bf16.vlgmr.msra.gmra.mrb[84].mxu1 %v4295_v4  ;;  %5567 = vmatmul.mubr.bf16.vlgmr.msra.gmra.mrb[92].mxu0 %v4303_v5  ;;  %v7439_v4 = vld [vmem:[%s8753_s7 + $0x318] sm:$0xff]   ;;  %v7440_v5 = vld [vmem:[%s8753_s7 + $0x360] sm:$0xff]  }
 0x411   : > { %6470 = vmatpush3.bf16.msra.mxu1 %v7386_v3  ;;  %5446 = vmatprep.mubr.bf16.mxu1 %v4298_v24  ;;  %v7437_v3 = vld [vmem:[%s8753_s7 + $0x310] sm:$0xff]   ;;  %v7442_v24 = vld [vmem:[%s8753_s7 + $0x368] sm:$0xff]  }
 0x412   : > { %6580 = vmatpush3.bf16.msra.mxu0 %v7387_v0  ;;  %5646 = vmatprep.mubr.bf16.mxu0 %v4308_v6  ;;  %v7441_v0 = vld [vmem:[%s8753_s7 + $0x320] sm:$0xff]   ;;  %v7445_v6 = vld [vmem:[%s8753_s7 + $0x330] sm:$0xff]  }
 0x413   : > { %6471 = vmatprep.subr.bf16.mxu1 %v7388_v54  ;;  %6581 = vmatprep.subr.bf16.mxu0 %v7389_v37  ;;  %v7443_v54 = vld [vmem:[%s8753_s7 + $0x328] sm:$0xff]   ;;  %v7444_v37 = vld [vmem:[%s8753_s7 + $0x370] sm:$0xff]  }
 0x415   : > { %6472 = vmatpush3.bf16.msra.mxu1 %v7390_v30  ;;  %v7446_v30 = vld [vmem:[%s8753_s7 + $0x378] sm:$0xff]  }
 0x416   : > { %6582 = vmatpush3.bf16.msra.mxu0 %v7391_v7  ;;  %6473 = vmatprep.subr.bf16.mxu1 %v7392_v8  ;;  %v7447_v7 = vld [vmem:[%s8753_s7 + $0x338] sm:$0xff]   ;;  %v4305_v8 = vpack.c.bf16 %v8476_v57, %v8476_v57 }
 0x417   : > { %6583 = vmatprep.subr.bf16.mxu0 %v7393_v56  ;;  %v7458_v56 = vld [vmem:[#allocation3] sm:$0xff]  ;;  %v7451_v57 = vld [vmem:[%s8755_s9 + $0x18] sm:$0xff]  }
 0x419   : > { %6474 = vmatpush3.bf16.msra.mxu1 %v7394_v10  ;;  %v7448_v10 = vld [vmem:[%s8755_s9] sm:$0xff]  }
 0x41a   : > { %6584 = vmatpush3.bf16.msra.mxu0 %v7395_v11  ;;  %6475 = vmatprep.subr.bf16.mxu1 %v7396_v12  ;;  %v7449_v11 = vld [vmem:[%s8755_s9 + $0x8] sm:$0xff]   ;;  %v7450_v12 = vld [vmem:[%s8755_s9 + $0x10] sm:$0xff]  }
 0x41b   : > { %6585 = vmatprep.subr.bf16.mxu0 %v7397_v13  ;;  %v7452_v13 = vld [vmem:[%s8755_s9 + $0x20] sm:$0xff]  }
 0x41d   : > { %6476 = vmatpush3.bf16.msra.mxu1 %v7398_v15  ;;  %v7453_v15 = vld [vmem:[%s8755_s9 + $0x28] sm:$0xff]  }
 0x41e   : > { %6586 = vmatpush3.bf16.msra.mxu0 %v7399_v16  ;;  %6477 = vmatprep.subr.bf16.mxu1 %v7400_v18 }
 0x41f   : > { %6587 = vmatprep.subr.bf16.mxu0 %v7401_v20 }
 0x421   : > { %6478 = vmatpush3.bf16.msra.mxu1 %v7402_v21 }
 0x422   : > { %6588 = vmatpush3.bf16.msra.mxu0 %v7403_v22  ;;  %6479 = vmatprep.subr.bf16.mxu1 %v7404_v59 }
 0x423   : > { %6589 = vmatprep.subr.bf16.mxu0 %v7405_v23 }
 0x425   : > { %6480 = vmatpush3.bf16.msra.mxu1 %v7406_v14 }
 0x426   : > { %6590 = vmatpush3.bf16.msra.mxu0 %v7407_v25  ;;  %6481 = vmatprep.subr.bf16.mxu1 %v7408_v61 }
 0x427   : > { %6591 = vmatprep.subr.bf16.mxu0 %v7409_v28  ;;  %v7454_v28 = vld [vmem:[%s8755_s9 + $0x30] sm:$0xff]  }
 0x429   : > { %6482 = vmatpush3.bf16.msra.mxu1 %v7410_v29  ;;  %v7455_v29 = vld [vmem:[%s8755_s9 + $0x38] sm:$0xff]  }
 0x42a   : > { %6592 = vmatpush3.bf16.msra.mxu0 %v7411_v34  ;;  %6483 = vmatprep.subr.bf16.mxu1 %v7412_v32  ;;  %v4565_v34 = vld [vmem:[%s8754_s8] sm:$0x1] }
 0x42b   : > { %6593 = vmatprep.subr.bf16.mxu0 %v7413_v40 }
 0x42d   : > { %6484 = vmatpush3.bf16.msra.mxu1 %v7414_v33 }
 0x42e   : > { %6594 = vmatpush3.bf16.msra.mxu0 %v7415_v35  ;;  %6513 = vmatprep.subr.bf16.mxu1 %v7416_v39 }
 0x430   : > { %5447 = vmatmul.mubr.bf16.vlgmr.msra.gmra.mrb[88].mxu1 %v4297_v43 }
 0x431   : > { %5647 = vmatmul.mubr.bf16.vlgmr.msra.gmra.mrb[96].mxu0 %v4307_v50  ;;  %6514 = vmatpush3.bf16.msra.mxu1 %v7417_v42 }
 0x432   : > { %5526 = vmatprep.mubr.bf16.mxu1 %v4302_v44  ;;  %6515 = vmatprep.subr.bf16.mxu1 %v7418_v45 }
 0x435   : > { %6516 = vmatpush3.bf16.msra.mxu1 %v7419_v17 }
 0x436   : > { %6517 = vmatprep.subr.bf16.mxu1 %v7420_v31 }
 0x439   : > { %6518 = vmatpush3.bf16.msra.mxu1 %v7421_v9 }
 0x43a   : > { %6519 = vmatprep.subr.bf16.mxu1 %v7422_v19 }
 0x43d   : > { %6520 = vmatpush3.bf16.msra.mxu1 %v7423_v49 }
 0x43e   : > { %6521 = vmatprep.subr.bf16.mxu1 %v7424_v26 }
 0x441   : > { %6522 = vmatpush3.bf16.msra.mxu1 %v7425_v51 }
 0x442   : > { %6523 = vmatprep.subr.bf16.mxu1 %v7426_v53 }
 0x445   : > { %6524 = vmatpush3.bf16.msra.mxu1 %v7427_v55 }
 0x446   : > { %6525 = vmatprep.subr.bf16.mxu1 %v7428_v36 }
 0x449   : > { %6526 = vmatpush3.bf16.msra.mxu1 %v7429_v38 }
 0x44a   : > { %6527 = vmatprep.subr.bf16.mxu1 %v7430_v46 }
 0x44d   : > { %6528 = vmatpush3.bf16.msra.mxu1 %v7431_v52 }
 0x44e   : > { %6557 = vmatprep.subr.bf16.mxu1 %v7432_v58 }
 0x450   : > { %5527 = vmatmul.mubr.bf16.vlgmr.msra.gmra.mrb[92].mxu1 %v4301_v62 }
 0x451   : > { %6558 = vmatpush3.bf16.msra.mxu1 %v7433_v60  ;;  %5606 = vmatprep.mubr.bf16.mxu1 %v4306_v1 }
 0x452   : > { %6559 = vmatprep.subr.bf16.mxu1 %v7434_v63 }
 0x455   : > { %6560 = vmatpush3.bf16.msra.mxu1 %v7435_v2 }
 0x456   : > { %6561 = vmatprep.subr.bf16.mxu1 %v7436_v47 }
 0x459   : > { %6562 = vmatpush3.bf16.msra.mxu1 %v7437_v3 }
 0x45a   : > { %6563 = vmatprep.subr.bf16.mxu1 %v7438_v48 }
 0x45d   : > { %6564 = vmatpush3.bf16.msra.mxu1 %v7439_v4 }
 0x45e   : > { %6565 = vmatprep.subr.bf16.mxu1 %v7440_v5 }
 0x461   : > { %6566 = vmatpush3.bf16.msra.mxu1 %v7441_v0 }
 0x462   : > { %6567 = vmatprep.subr.bf16.mxu1 %v7442_v24 }
 0x465   : > { %6568 = vmatpush3.bf16.msra.mxu1 %v7443_v54 }
 0x466   : > { %6569 = vmatprep.subr.bf16.mxu1 %v7444_v37  ;;  %v5671_v37 = vld [vmem:[%s8756_s10] sm:$0x1] }
 0x469   : > { %6570 = vmatpush3.bf16.msra.mxu1 %v7445_v6 }
 0x46a   : > { %6571 = vmatprep.subr.bf16.mxu1 %v7446_v30 }
 0x46d   : > { %6572 = vmatpush3.bf16.msra.mxu1 %v7447_v7 }
 0x46e   : > { %7066 = vmatprep.subr.bf16.mxu1 %v7458_v56 }
 0x470   : > { %5607 = vmatmul.mubr.bf16.vlgmr.msra.gmra.mrb[96].mxu1 %v4305_v8 }
 0x471   : > { %7067 = vmatpush3.bf16.msra.mxu1 %v7448_v10  ;;  %7082 = vmatprep.mubr.msk.bf16.mxu1 %vm7468_vm2, %v7458_v56 }
 0x472   : > { %7068 = vmatprep.subr.bf16.mxu1 %v7458_v56 }
 0x475   : > { %7069 = vmatpush3.bf16.msra.mxu1 %v7449_v11 }
 0x476   : > { %7070 = vmatprep.subr.bf16.mxu1 %v7458_v56 }
 0x479   : > { %7071 = vmatpush3.bf16.msra.mxu1 %v7450_v12 }
 0x47a   : > { %7072 = vmatprep.subr.bf16.mxu1 %v7458_v56 }
 0x47d   : > { %7073 = vmatpush3.bf16.msra.mxu1 %v7451_v57 }
 0x47e   : > { %7074 = vmatprep.subr.bf16.mxu1 %v7458_v56 }
 0x481   : > { %7075 = vmatpush3.bf16.msra.mxu1 %v7452_v13 }
 0x482   : > { %7076 = vmatprep.subr.bf16.mxu1 %v7458_v56 }
 0x485   : > { %7077 = vmatpush3.bf16.msra.mxu1 %v7453_v15 }
 0x486   : > { %7078 = vmatprep.subr.bf16.mxu1 %v7458_v56 }
 0x489   : > { %7079 = vmatpush3.bf16.msra.mxu1 %v7454_v28 }
 0x48a   : > { %7080 = vmatprep.subr.bf16.mxu1 %v7458_v56 }
 0x48d   : > { %7081 = vmatpush3.bf16.msra.mxu1 %v7455_v29 }
 0x4c3   : > { %v6441_v16 = vpop.f32.mrb[80].mxu1  ;;  %v6507_v18 = vpop.f32.mrb[88].mxu0 }
 0x4c4   : > { %v6442_v20 = vpop.f32.mrb[81].mxu1  ;;  %v6508_v21 = vpop.f32.mrb[89].mxu0 }
 0x4c5   : > { %v6443_v22 = vadd.f32 %v6442_v20, %v6441_v16  ;;  %v6509_v59 = vadd.f32 %v6508_v21, %v6507_v18  ;;  %v6444_v23 = vpop.f32.mrb[82].mxu1  ;;  %v6510_v14 = vpop.f32.mrb[90].mxu0 }
 0x4c6   : > { %v6445_v25 = vpop.f32.mrb[83].mxu1  ;;  %v6511_v61 = vpop.f32.mrb[91].mxu0 }
 0x4c7   : > { %v5369_v39 = vadd.f32 %v6443_v22, %v4565_v34 }
 0x4e3   : > { %v6463_v32 = vpop.f32.mrb[84].mxu1  ;;  %v6551_v40 = vpop.f32.mrb[92].mxu0 }
 0x4e4   : > { %v6464_v33 = vpop.f32.mrb[85].mxu1  ;;  %v6552_v35 = vpop.f32.mrb[93].mxu0 }
 0x4e5   : > { %v6465_v27 = vadd.f32 %v6464_v33, %v6463_v32  ;;  %v6553_v41 = vadd.f32 %v6552_v35, %v6551_v40  ;;  %v6466_v42 = vpop.f32.mrb[86].mxu1  ;;  %v6554_v43 = vpop.f32.mrb[94].mxu0 }
 0x4e6   : > { %v6467_v45 = vpop.f32.mrb[87].mxu1  ;;  %v6555_v50 = vpop.f32.mrb[95].mxu0 }
 0x4e7   : > { %v5409_v44 = vadd.f32 %v6465_v27, %v5369_v39 }
 0x503   : > { %v6485_v17 = vpop.f32.mrb[88].mxu1 }
 0x504   : > { %v6595_v31 = vpop.f32.mrb[96].mxu0  ;;  %v6486_v9 = vpop.f32.mrb[89].mxu1 }
 0x505   : > { %v6487_v19 = vadd.f32 %v6486_v9, %v6485_v17  ;;  %v6596_v49 = vpop.f32.mrb[97].mxu0  ;;  %v6488_v26 = vpop.f32.mrb[90].mxu1 }
 0x506   : > { %v6597_v51 = vadd.f32 %v6596_v49, %v6595_v31  ;;  %v6598_v53 = vpop.f32.mrb[98].mxu0  ;;  %v6489_v55 = vpop.f32.mrb[91].mxu1 }
 0x507   : > { %v5449_v36 = vadd.f32 %v6487_v19, %v5409_v44  ;;  %v6599_v38 = vpop.f32.mrb[99].mxu0 }
 0x509   : > { %v5489_v46 = vadd.f32 %v6509_v59, %v5449_v36 }
 0x523   : > { %v6529_v52 = vpop.f32.mrb[92].mxu1 }
 0x524   : > { %v6530_v58 = vpop.f32.mrb[93].mxu1 }
 0x525   : > { %v6531_v60 = vadd.f32 %v6530_v58, %v6529_v52  ;;  %v6532_v62 = vpop.f32.mrb[94].mxu1 }
 0x526   : > { %v6533_v63 = vpop.f32.mrb[95].mxu1 }
 0x527   : > { %v5529_v1 = vadd.f32 %v6531_v60, %v5489_v46 }
 0x529   : > { %v5569_v2 = vadd.f32 %v6553_v41, %v5529_v1 }
 0x543   : > { %v6573_v47 = vpop.f32.mrb[96].mxu1 }
 0x544   : > { %v6574_v3 = vpop.f32.mrb[97].mxu1 }
 0x545   : > { %v6575_v48 = vadd.f32 %v6574_v3, %v6573_v47  ;;  %v6576_v4 = vpop.f32.mrb[98].mxu1 }
 0x546   : > { %v6577_v5 = vpop.f32.mrb[99].mxu1 }
 0x547   : > { %v5609_v0 = vadd.f32 %v6575_v48, %v5569_v2 }
 0x549   : > { %v5649_v24 = vadd.f32 %v6597_v51, %v5609_v0 }
 0x54b   : > { %v5654_v54 = vpack.c.bf16 %v5649_v24, %v5649_v24 }
 0x54d   : > { %7083 = vmatmul.mubr.bf16.vlgmr.msra.gmra.mrb[100].mxu1 %v5654_v54 }
 0x620   : > { %v5754_v6 = vpop.f32.mrb[100].mxu1 }
 0x621   : > { %v5755_v30 = vadd.f32 %v5754_v6, %v5671_v37  ;;  %v7084_v7 = vpop.f32.mrb[101].mxu1 }
 0x622   : > { %v5757_v8 = vpop.f32.mrb[102].mxu1 }
 0x623   : > { %5760 = vst [vmem:[%s382_s30] sm:$0x1] %v5755_v30  ;;  %v7085_v56 = vpop.f32.mrb[103].mxu1 }
 0x624 PF: > { %s21_s17 = sadd.s32 1, %s7465_s17  }
 0x625   : > { %p18_p4 = scmp.ge.s32.totalorder %s21_s17, 4  }
 0x627   :  { %20 = sbr.rel (!%p18_p4) target bundleno = 1 (0x1), region = 256 }

</bundles_post_ra>
